<compile_context>
chip_gen: v6e
topology: v6e:2x2x1
jax: 0.10.0
libtpu: 0.0.40
codegen_flags: <defaults>
</compile_context>

<pallas_src>
import functools

import jax
import jax.numpy as jnp
from jax.experimental import pallas as pl
from jax.experimental.pallas import tpu as pltpu

_LANE = 128
_SUBLANE = 8


def _round_up(x, m):
    return ((x + m - 1) // m) * m


def _cdiv(a, b):
    return -(-a // b)


def _vmem_budget():
    """Returns (vmem_limit_bytes for Mosaic, planning budget for blocks+scratch)."""
    try:
        cap = int(pltpu.get_tpu_info().vmem_capacity_bytes)
    except Exception:
        cap = 64 * 1024 * 1024          # conservative: assume v7x (64 MiB / core)
    limit = min(int(cap * 0.80), 100 * 1024 * 1024)
    budget = int(limit * 0.85)
    return limit, budget


def _plan_3x3(N, H, W_t, Cin_p, Cout_p, pad, out_bytes, budget):
    """Pick (TCi, n_ci, TH, n_h) for the 3x3 dilated path under a VMEM budget.

    Prefers full channel residency (n_ci == 1, blocks grid-invariant, no acc
    scratch) and the largest row tile; degrades to row tiling then Cin tiling.
    """
    Wp = W_t + 2 * pad

    def need(tci, th, n_h, n_ci):
        hp = n_h * th + 2 * pad
        b = 2 * hp * Wp * tci * 2                       # padded plane  (dbl-buffered)
        b += 2 * 9 * tci * Cout_p * 2                   # folded taps   (dbl-buffered)
        b += 2 * th * W_t * Cout_p * out_bytes          # output tile   (dbl-buffered)
        if n_ci > 1:
            b += th * W_t * Cout_p * 4                  # f32 accumulator scratch
        return b

    # Cin tile candidates: multiples of 128 dividing Cin_p, largest first.
    tci_cands = [t for t in range(Cin_p, 0, -_LANE) if Cin_p % t == 0]
    if not tci_cands:
        tci_cands = [Cin_p]

    for tci in tci_cands:
        n_ci = Cin_p // tci
        # With n_ci == 1 the plane block is grid-invariant across rows, so row
        # splitting is free: use >=2 row tiles when N == 1 (v7x dual TensorCore).
        n_h = 2 if (n_ci == 1 and N == 1 and H >= 2) else 1
        while True:
            th = _cdiv(H, n_h)
            n_h_eff = _cdiv(H, th)
            if need(tci, th, n_h_eff, n_ci) <= budget:
                return tci, n_ci, th, n_h_eff
            if th == 1:
                break
            n_h += 1

    # Nothing fit: smallest channel tile, single-row tiles; let Mosaic cope.
    tci = tci_cands[-1]
    return tci, Cin_p // tci, 1, H


# --------------------------- kernels ---------------------------


def _taps_3x3(x_ref, w_ref, row0, th, w_t, dilation):
    """Sum over the 9 dilated taps -> (th*w_t, Cout_p) f32."""
    tci = x_ref.shape[-1]
    acc = None
    tap = 0
    for kh in range(3):
        for kw in range(3):
            # TODO(synk): the kw*dilation start is sublane-misaligned for most
            # rates; a pltpu.roll-based pre-shift would move it to the XLU slot.
            patch = x_ref[0, pl.ds(row0 + kh * dilation, th),
                          pl.ds(kw * dilation, w_t), :]
            patch = patch.reshape(th * w_t, tci)     # layout-preserving: w_t % 8 == 0
            d = jnp.dot(patch, w_ref[tap], preferred_element_type=jnp.float32)
            acc = d if acc is None else acc + d
            tap += 1
    return acc


def _aspp3x3_kernel(x_ref, w_ref, shift_ref, o_ref, *, dilation):
    # Fully channel-resident path: no Cin reduction axis, no scratch.
    _, th, w_t, cout_p = o_ref.shape
    row0 = pl.program_id(1) * th
    acc = _taps_3x3(x_ref, w_ref, row0, th, w_t, dilation)
    y = jnp.maximum(acc + shift_ref[...], 0.0)           # fused BN shift + ReLU
    o_ref[...] = y.reshape(1, th, w_t, cout_p).astype(o_ref.dtype)


def _aspp3x3_kernel_cin_tiled(x_ref, w_ref, shift_ref, o_ref, acc_ref, *, dilation):
    # Fallback when plane + weights do not fit VMEM: reduce over Cin tiles.
    _, th, w_t, cout_p = o_ref.shape
    ci = pl.program_id(2)
    row0 = pl.program_id(1) * th
    contrib = _taps_3x3(x_ref, w_ref, row0, th, w_t, dilation)

    @pl.when(ci == 0)
    def _():
        acc_ref[...] = contrib

    @pl.when(ci > 0)
    def _():
        acc_ref[...] = acc_ref[...] + contrib

    @pl.when(ci == pl.num_programs(2) - 1)
    def _():
        y = jnp.maximum(acc_ref[...] + shift_ref[...], 0.0)
        o_ref[...] = y.reshape(1, th, w_t, cout_p).astype(o_ref.dtype)


def _aspp1x1_kernel(x_ref, w_ref, shift_ref, o_ref):
    acc = jnp.dot(x_ref[...], w_ref[...], preferred_element_type=jnp.float32)
    o_ref[...] = jnp.maximum(acc + shift_ref[...], 0.0).astype(o_ref.dtype)


# --------------------------- wrapper ---------------------------


def aspp_module_forward(x_nchw, weight, bn_gamma, bn_beta, bn_mean, bn_var,
                        *, rate, eps=1e-5, out_dtype=None,
                        _vmem_budget_override=None):
    """ASPP_module.forward (eval-mode BatchNorm). PyTorch NCHW in / NCHW out.

    x_nchw : (N, Cin, H, W)
    weight : (Cout, Cin, KH, KW)   (KH=KW=1 if rate==1 else 3)
    """
    N, Cin, H, W = x_nchw.shape
    Cout, _, KH, KW = weight.shape
    if rate == 1:
        assert (KH, KW) == (1, 1)
    else:
        assert (KH, KW) == (3, 3)

    out_dtype = x_nchw.dtype if out_dtype is None else out_dtype
    out_bytes = jnp.dtype(out_dtype).itemsize
    Cin_p = _round_up(Cin, _LANE)
    Cout_p = _round_up(Cout, _LANE)

    vmem_limit, budget = _vmem_budget()
    if _vmem_budget_override is not None:
        budget = _vmem_budget_override

    # ---- fold BN (inference) scale into the conv weight; keep shift + ReLU ----
    inv = (bn_gamma / jnp.sqrt(bn_var + eps)).astype(jnp.float32)
    w_folded = weight.astype(jnp.float32) * inv[:, None, None, None]
    shift = (bn_beta - bn_mean * inv).astype(jnp.float32)
    shift_p = jnp.pad(shift, (0, Cout_p - Cout)).reshape(1, Cout_p)

    x_nhwc = jnp.transpose(x_nchw, (0, 2, 3, 1)).astype(jnp.bfloat16)

    if rate == 1:
        # -------- 1x1 conv == GEMM over M = N*H*W, no reduction axis --------
        # TODO(synk): assumes the full (Cin_p, Cout_p) weight fits VMEM (true for
        #             all realistic ASPP sizes); no Cin-reduction fallback here.
        M = N * H * W
        w2d = jnp.transpose(w_folded[:, :, 0, 0], (1, 0))                 # (Cin, Cout)
        w2d = jnp.pad(w2d, ((0, Cin_p - Cin), (0, Cout_p - Cout))).astype(jnp.bfloat16)

        w_bytes = 2 * Cin_p * Cout_p * 2
        tm = min(2048, _round_up(M, _SUBLANE))
        while tm > _SUBLANE and (w_bytes + 2 * tm * (Cin_p * 2 + Cout_p * out_bytes)
                                 ) > budget:
            tm = _round_up(tm // 2, _SUBLANE)
        M_p = _round_up(M, tm)

        x2d = jnp.pad(x_nhwc.reshape(M, Cin), ((0, M_p - M), (0, Cin_p - Cin)))

        out2d = pl.pallas_call(
            _aspp1x1_kernel,
            out_shape=jax.ShapeDtypeStruct((M_p, Cout_p), out_dtype),
            grid_spec=pltpu.PrefetchScalarGridSpec(
                num_scalar_prefetch=0,
                grid=(M_p // tm,),
                in_specs=[
                    pl.BlockSpec((tm, Cin_p), lambda m: (m, 0)),
                    pl.BlockSpec((Cin_p, Cout_p), lambda m: (0, 0)),   # grid-invariant
                    pl.BlockSpec((1, Cout_p), lambda m: (0, 0)),
                ],
                out_specs=pl.BlockSpec((tm, Cout_p), lambda m: (m, 0)),
            ),
            compiler_params=pltpu.CompilerParams(
                dimension_semantics=("parallel",),
                vmem_limit_bytes=vmem_limit),
        )(x2d, w2d, shift_p)

        out_nhwc = out2d[:M, :Cout].reshape(N, H, W, Cout)
        return jnp.transpose(out_nhwc, (0, 3, 1, 2))

    # -------- 3x3 dilated conv, padding = rate --------
    pad = rate
    W_t = _round_up(W, _SUBLANE)       # output width padded -> layout-preserving reshapes
    TCi, n_ci, TH, n_h = _plan_3x3(N, H, W_t, Cin_p, Cout_p, pad, out_bytes, budget)
    H_t = n_h * TH
    Hp, Wp = H_t + 2 * pad, W_t + 2 * pad

    xp = jnp.pad(x_nhwc, ((0, 0), (pad, Hp - H - pad), (pad, Wp - W - pad),
                          (0, Cin_p - Cin)))

    # (Cout, Cin, 3, 3) -> (9, Cin_p, Cout_p), BN scale folded, bf16
    w = jnp.transpose(w_folded, (2, 3, 1, 0)).reshape(KH * KW, Cin, Cout)
    w = jnp.pad(w, ((0, 0), (0, Cin_p - Cin), (0, Cout_p - Cout))).astype(jnp.bfloat16)

    out_shape = jax.ShapeDtypeStruct((N, H_t, W_t, Cout_p), out_dtype)

    if n_ci == 1:
        # All channels resident; every block DMA'd once per image (x and w are
        # grid-invariant across the row axis), no accumulator scratch.
        out_nhwc = pl.pallas_call(
            functools.partial(_aspp3x3_kernel, dilation=rate),
            out_shape=out_shape,
            grid_spec=pltpu.PrefetchScalarGridSpec(
                num_scalar_prefetch=0,
                grid=(N, n_h),
                in_specs=[
                    pl.BlockSpec((1, Hp, Wp, Cin_p), lambda n, h: (n, 0, 0, 0)),
                    pl.BlockSpec((9, Cin_p, Cout_p), lambda n, h: (0, 0, 0)),
                    pl.BlockSpec((1, Cout_p), lambda n, h: (0, 0)),
                ],
                out_specs=pl.BlockSpec((1, TH, W_t, Cout_p),
                                       lambda n, h: (n, h, 0, 0)),
            ),
            compiler_params=pltpu.CompilerParams(
                dimension_semantics=("parallel", "parallel"),
                vmem_limit_bytes=vmem_limit),
        )(xp, w, shift_p)
    else:
        # VMEM-constrained fallback (v7x / huge Cin): reduce over Cin tiles.
        out_nhwc = pl.pallas_call(
            functools.partial(_aspp3x3_kernel_cin_tiled, dilation=rate),
            out_shape=out_shape,
            grid_spec=pltpu.PrefetchScalarGridSpec(
                num_scalar_prefetch=0,
                grid=(N, n_h, n_ci),
                in_specs=[
                    pl.BlockSpec((1, Hp, Wp, TCi), lambda n, h, ci: (n, 0, 0, ci)),
                    pl.BlockSpec((9, TCi, Cout_p), lambda n, h, ci: (0, ci, 0)),
                    pl.BlockSpec((1, Cout_p), lambda n, h, ci: (0, 0)),
                ],
                out_specs=pl.BlockSpec((1, TH, W_t, Cout_p),
                                       lambda n, h, ci: (n, h, 0, 0)),
                scratch_shapes=[pltpu.VMEM((TH * W_t, Cout_p), jnp.float32)],
            ),
            compiler_params=pltpu.CompilerParams(
                dimension_semantics=("parallel", "parallel", "arbitrary"),
                vmem_limit_bytes=vmem_limit),
        )(xp, w, shift_p)

    out_nhwc = out_nhwc[:, :H, :W, :Cout]
    return jnp.transpose(out_nhwc, (0, 3, 1, 2))


def _reference(x_nchw, weight, bn_gamma, bn_beta, bn_mean, bn_var, *, rate,
               eps=1e-5):
    """Pure-JAX reference (lax.conv, bf16 operands, f32 accumulation)."""
    pad = 0 if rate == 1 else rate
    inv = bn_gamma / jnp.sqrt(bn_var + eps)
    w_f = (weight.astype(jnp.float32) * inv[:, None, None, None]).astype(jnp.bfloat16)
    y = jax.lax.conv_general_dilated(
        x_nchw.astype(jnp.bfloat16), w_f,
        window_strides=(1, 1), padding=((pad, pad), (pad, pad)),
        rhs_dilation=(rate, rate),
        dimension_numbers=("NCHW", "OIHW", "NCHW"),
        preferred_element_type=jnp.float32)
    y = y + (bn_beta - bn_mean * inv)[None, :, None, None]
    return jnp.maximum(y, 0.0).astype(x_nchw.dtype)


if __name__ == "__main__":
    key = jax.random.PRNGKey(0)
    kx, kw3, kw1, kx2, kw2 = jax.random.split(key, 5)

    # BatchNorm2d params as in _init_weight / fresh-module running stats
    Cout = 8
    gamma = jnp.ones((Cout,), jnp.float32)
    beta = jnp.zeros((Cout,), jnp.float32)
    r_mean = jnp.zeros((Cout,), jnp.float32)
    r_var = jnp.ones((Cout,), jnp.float32)

    # ---- rate=2 -> 3x3 dilated conv (fully channel-resident path) ----
    N, Cin, H, W = 2, 4, 16, 16
    x = jax.random.normal(kx, (N, Cin, H, W), dtype=jnp.float32)
    std3 = (2.0 / (Cin * 9)) ** 0.5                       # kaiming_normal_, fan_in
    w3 = jax.random.normal(kw3, (Cout, Cin, 3, 3), jnp.float32) * std3
    out3 = jax.block_until_ready(
        aspp_module_forward(x, w3, gamma, beta, r_mean, r_var, rate=2))
    ref3 = _reference(x, w3, gamma, beta, r_mean, r_var, rate=2)
    assert out3.shape == (N, Cout, H, W)
    assert jnp.allclose(out3, ref3, atol=1e-2, rtol=1e-2), "3x3 dilated mismatch"

    # ---- rate=1 -> 1x1 conv (single-dot GEMM path) ----
    std1 = (2.0 / Cin) ** 0.5
    w1 = jax.random.normal(kw1, (Cout, Cin, 1, 1), jnp.float32) * std1
    out1 = jax.block_until_ready(
        aspp_module_forward(x, w1, gamma, beta, r_mean, r_var, rate=1))
    ref1 = _reference(x, w1, gamma, beta, r_mean, r_var, rate=1)
    assert out1.shape == (N, Cout, H, W)
    assert jnp.allclose(out1, ref1, atol=1e-2, rtol=1e-2), "1x1 mismatch"

    # ---- rate=3, odd spatial size, tiny forced VMEM budget:
    #      exercises the Cin-tiled / row-tiled fallback (v7x-style) path ----
    N2, Cin2, H2, W2 = 1, 256, 15, 15
    x2 = jax.random.normal(kx2, (N2, Cin2, H2, W2), dtype=jnp.float32)
    std3b = (2.0 / (Cin2 * 9)) ** 0.5
    w3b = jax.random.normal(kw2, (Cout, Cin2, 3, 3), jnp.float32) * std3b
    out3b = jax.block_until_ready(
        aspp_module_forward(x2, w3b, gamma, beta, r_mean, r_var, rate=3,
                            _vmem_budget_override=1 << 20))
    ref3b = _reference(x2, w3b, gamma, beta, r_mean, r_var, rate=3)
    assert out3b.shape == (N2, Cout, H2, W2)
    assert jnp.allclose(out3b, ref3b, atol=1e-2, rtol=1e-2), "tiled fallback mismatch"

    print("KERNEL_OK")
</pallas_src>

<mosaic_0001>
module attributes {stable_mosaic.version = 11 : i64} {
  func.func @_aspp3x3_kernel(%arg0: i32, %arg1: i32, %arg2: memref<1x20x20x128xbf16, #tpu.memory_space<vmem>>, %arg3: memref<9x128x128xbf16, #tpu.memory_space<vmem>>, %arg4: memref<1x128xf32, #tpu.memory_space<vmem>>, %arg5: memref<1x16x16x128xf32, #tpu.memory_space<vmem>>) attributes {dimension_semantics = [#tpu.dimension_semantics<parallel>, #tpu.dimension_semantics<parallel>], iteration_bounds = array<i64: 2, 1>, scalar_prefetch = 0 : i64, scratch_operands = 0 : i64, tpu.core_type = #tpu.core_type<tc>, window_params = [{transform_indices = @transform_0, window_bounds = array<i64: 1, 20, 20, 128>}, {pipeline_mode = #tpu.pipeline_mode<synchronous>, transform_indices = @transform_1, window_bounds = array<i64: 9, 128, 128>}, {pipeline_mode = #tpu.pipeline_mode<synchronous>, transform_indices = @transform_2, window_bounds = array<i64: 1, 128>}, {transform_indices = @transform_3, window_bounds = array<i64: 1, 16, 16, 128>}]} {
    %c16_i32 = arith.constant 16 : i32
    %0 = arith.muli %arg1, %c16_i32 : i32
    %c0_i32 = arith.constant 0 : i32
    %1 = arith.addi %0, %c0_i32 : i32
    %c0 = arith.constant 0 : index
    %2 = arith.index_cast %1 : i32 to index
    %c0_0 = arith.constant 0 : index
    %c0_1 = arith.constant 0 : index
    %3 = vector.load %arg2[%c0, %2, %c0_0, %c0_1] : memref<1x20x20x128xbf16, #tpu.memory_space<vmem>>, vector<1x16x16x128xbf16>
    %4 = vector.shape_cast %3 : vector<1x16x16x128xbf16> to vector<16x16x128xbf16>
    %5 = vector.shape_cast %4 : vector<16x16x128xbf16> to vector<256x128xbf16>
    %c0_2 = arith.constant 0 : index
    %c0_3 = arith.constant 0 : index
    %c0_4 = arith.constant 0 : index
    %6 = vector.load %arg3[%c0_2, %c0_3, %c0_4] : memref<9x128x128xbf16, #tpu.memory_space<vmem>>, vector<1x128x128xbf16>
    %7 = vector.shape_cast %6 : vector<1x128x128xbf16> to vector<128x128xbf16>
    %cst = arith.constant dense<0.000000e+00> : vector<256x128xf32>
    %8 = tpu.matmul %5, %7, %cst {dimension_numbers = #tpu.dot_dimension_numbers<[1], [0], [0], [1], [0, 0, 1, 1], [], []>} : vector<256x128xbf16>, vector<128x128xbf16>, vector<256x128xf32> -> vector<256x128xf32>
    %c0_i32_5 = arith.constant 0 : i32
    %9 = arith.addi %0, %c0_i32_5 : i32
    %c0_6 = arith.constant 0 : index
    %10 = arith.index_cast %9 : i32 to index
    %c2 = arith.constant 2 : index
    %c0_7 = arith.constant 0 : index
    %11 = vector.load %arg2[%c0_6, %10, %c2, %c0_7] : memref<1x20x20x128xbf16, #tpu.memory_space<vmem>>, vector<1x16x16x128xbf16>
    %12 = vector.shape_cast %11 : vector<1x16x16x128xbf16> to vector<16x16x128xbf16>
    %13 = vector.shape_cast %12 : vector<16x16x128xbf16> to vector<256x128xbf16>
    %c1 = arith.constant 1 : index
    %c0_8 = arith.constant 0 : index
    %c0_9 = arith.constant 0 : index
    %14 = vector.load %arg3[%c1, %c0_8, %c0_9] : memref<9x128x128xbf16, #tpu.memory_space<vmem>>, vector<1x128x128xbf16>
    %15 = vector.shape_cast %14 : vector<1x128x128xbf16> to vector<128x128xbf16>
    %cst_10 = arith.constant dense<0.000000e+00> : vector<256x128xf32>
    %16 = tpu.matmul %13, %15, %cst_10 {dimension_numbers = #tpu.dot_dimension_numbers<[1], [0], [0], [1], [0, 0, 1, 1], [], []>} : vector<256x128xbf16>, vector<128x128xbf16>, vector<256x128xf32> -> vector<256x128xf32>
    %17 = arith.addf %8, %16 : vector<256x128xf32>
    %c0_i32_11 = arith.constant 0 : i32
    %18 = arith.addi %0, %c0_i32_11 : i32
    %c0_12 = arith.constant 0 : index
    %19 = arith.index_cast %18 : i32 to index
    %c4 = arith.constant 4 : index
    %c0_13 = arith.constant 0 : index
    %20 = vector.load %arg2[%c0_12, %19, %c4, %c0_13] : memref<1x20x20x128xbf16, #tpu.memory_space<vmem>>, vector<1x16x16x128xbf16>
    %21 = vector.shape_cast %20 : vector<1x16x16x128xbf16> to vector<16x16x128xbf16>
    %22 = vector.shape_cast %21 : vector<16x16x128xbf16> to vector<256x128xbf16>
    %c2_14 = arith.constant 2 : index
    %c0_15 = arith.constant 0 : index
    %c0_16 = arith.constant 0 : index
    %23 = vector.load %arg3[%c2_14, %c0_15, %c0_16] : memref<9x128x128xbf16, #tpu.memory_space<vmem>>, vector<1x128x128xbf16>
    %24 = vector.shape_cast %23 : vector<1x128x128xbf16> to vector<128x128xbf16>
    %cst_17 = arith.constant dense<0.000000e+00> : vector<256x128xf32>
    %25 = tpu.matmul %22, %24, %cst_17 {dimension_numbers = #tpu.dot_dimension_numbers<[1], [0], [0], [1], [0, 0, 1, 1], [], []>} : vector<256x128xbf16>, vector<128x128xbf16>, vector<256x128xf32> -> vector<256x128xf32>
    %26 = arith.addf %17, %25 : vector<256x128xf32>
    %c2_i32 = arith.constant 2 : i32
    %27 = arith.addi %0, %c2_i32 : i32
    %c0_18 = arith.constant 0 : index
    %28 = arith.index_cast %27 : i32 to index
    %c0_19 = arith.constant 0 : index
    %c0_20 = arith.constant 0 : index
    %29 = vector.load %arg2[%c0_18, %28, %c0_19, %c0_20] : memref<1x20x20x128xbf16, #tpu.memory_space<vmem>>, vector<1x16x16x128xbf16>
    %30 = vector.shape_cast %29 : vector<1x16x16x128xbf16> to vector<16x16x128xbf16>
    %31 = vector.shape_cast %30 : vector<16x16x128xbf16> to vector<256x128xbf16>
    %c3 = arith.constant 3 : index
    %c0_21 = arith.constant 0 : index
    %c0_22 = arith.constant 0 : index
    %32 = vector.load %arg3[%c3, %c0_21, %c0_22] : memref<9x128x128xbf16, #tpu.memory_space<vmem>>, vector<1x128x128xbf16>
    %33 = vector.shape_cast %32 : vector<1x128x128xbf16> to vector<128x128xbf16>
    %cst_23 = arith.constant dense<0.000000e+00> : vector<256x128xf32>
    %34 = tpu.matmul %31, %33, %cst_23 {dimension_numbers = #tpu.dot_dimension_numbers<[1], [0], [0], [1], [0, 0, 1, 1], [], []>} : vector<256x128xbf16>, vector<128x128xbf16>, vector<256x128xf32> -> vector<256x128xf32>
    %35 = arith.addf %26, %34 : vector<256x128xf32>
    %c2_i32_24 = arith.constant 2 : i32
    %36 = arith.addi %0, %c2_i32_24 : i32
    %c0_25 = arith.constant 0 : index
    %37 = arith.index_cast %36 : i32 to index
    %c2_26 = arith.constant 2 : index
    %c0_27 = arith.constant 0 : index
    %38 = vector.load %arg2[%c0_25, %37, %c2_26, %c0_27] : memref<1x20x20x128xbf16, #tpu.memory_space<vmem>>, vector<1x16x16x128xbf16>
    %39 = vector.shape_cast %38 : vector<1x16x16x128xbf16> to vector<16x16x128xbf16>
    %40 = vector.shape_cast %39 : vector<16x16x128xbf16> to vector<256x128xbf16>
    %c4_28 = arith.constant 4 : index
    %c0_29 = arith.constant 0 : index
    %c0_30 = arith.constant 0 : index
    %41 = vector.load %arg3[%c4_28, %c0_29, %c0_30] : memref<9x128x128xbf16, #tpu.memory_space<vmem>>, vector<1x128x128xbf16>
    %42 = vector.shape_cast %41 : vector<1x128x128xbf16> to vector<128x128xbf16>
    %cst_31 = arith.constant dense<0.000000e+00> : vector<256x128xf32>
    %43 = tpu.matmul %40, %42, %cst_31 {dimension_numbers = #tpu.dot_dimension_numbers<[1], [0], [0], [1], [0, 0, 1, 1], [], []>} : vector<256x128xbf16>, vector<128x128xbf16>, vector<256x128xf32> -> vector<256x128xf32>
    %44 = arith.addf %35, %43 : vector<256x128xf32>
    %c2_i32_32 = arith.constant 2 : i32
    %45 = arith.addi %0, %c2_i32_32 : i32
    %c0_33 = arith.constant 0 : index
    %46 = arith.index_cast %45 : i32 to index
    %c4_34 = arith.constant 4 : index
    %c0_35 = arith.constant 0 : index
    %47 = vector.load %arg2[%c0_33, %46, %c4_34, %c0_35] : memref<1x20x20x128xbf16, #tpu.memory_space<vmem>>, vector<1x16x16x128xbf16>
    %48 = vector.shape_cast %47 : vector<1x16x16x128xbf16> to vector<16x16x128xbf16>
    %49 = vector.shape_cast %48 : vector<16x16x128xbf16> to vector<256x128xbf16>
    %c5 = arith.constant 5 : index
    %c0_36 = arith.constant 0 : index
    %c0_37 = arith.constant 0 : index
    %50 = vector.load %arg3[%c5, %c0_36, %c0_37] : memref<9x128x128xbf16, #tpu.memory_space<vmem>>, vector<1x128x128xbf16>
    %51 = vector.shape_cast %50 : vector<1x128x128xbf16> to vector<128x128xbf16>
    %cst_38 = arith.constant dense<0.000000e+00> : vector<256x128xf32>
    %52 = tpu.matmul %49, %51, %cst_38 {dimension_numbers = #tpu.dot_dimension_numbers<[1], [0], [0], [1], [0, 0, 1, 1], [], []>} : vector<256x128xbf16>, vector<128x128xbf16>, vector<256x128xf32> -> vector<256x128xf32>
    %53 = arith.addf %44, %52 : vector<256x128xf32>
    %c4_i32 = arith.constant 4 : i32
    %54 = arith.addi %0, %c4_i32 : i32
    %c0_39 = arith.constant 0 : index
    %55 = arith.index_cast %54 : i32 to index
    %c0_40 = arith.constant 0 : index
    %c0_41 = arith.constant 0 : index
    %56 = vector.load %arg2[%c0_39, %55, %c0_40, %c0_41] : memref<1x20x20x128xbf16, #tpu.memory_space<vmem>>, vector<1x16x16x128xbf16>
    %57 = vector.shape_cast %56 : vector<1x16x16x128xbf16> to vector<16x16x128xbf16>
    %58 = vector.shape_cast %57 : vector<16x16x128xbf16> to vector<256x128xbf16>
    %c6 = arith.constant 6 : index
    %c0_42 = arith.constant 0 : index
    %c0_43 = arith.constant 0 : index
    %59 = vector.load %arg3[%c6, %c0_42, %c0_43] : memref<9x128x128xbf16, #tpu.memory_space<vmem>>, vector<1x128x128xbf16>
    %60 = vector.shape_cast %59 : vector<1x128x128xbf16> to vector<128x128xbf16>
    %cst_44 = arith.constant dense<0.000000e+00> : vector<256x128xf32>
    %61 = tpu.matmul %58, %60, %cst_44 {dimension_numbers = #tpu.dot_dimension_numbers<[1], [0], [0], [1], [0, 0, 1, 1], [], []>} : vector<256x128xbf16>, vector<128x128xbf16>, vector<256x128xf32> -> vector<256x128xf32>
    %62 = arith.addf %53, %61 : vector<256x128xf32>
    %c4_i32_45 = arith.constant 4 : i32
    %63 = arith.addi %0, %c4_i32_45 : i32
    %c0_46 = arith.constant 0 : index
    %64 = arith.index_cast %63 : i32 to index
    %c2_47 = arith.constant 2 : index
    %c0_48 = arith.constant 0 : index
    %65 = vector.load %arg2[%c0_46, %64, %c2_47, %c0_48] : memref<1x20x20x128xbf16, #tpu.memory_space<vmem>>, vector<1x16x16x128xbf16>
    %66 = vector.shape_cast %65 : vector<1x16x16x128xbf16> to vector<16x16x128xbf16>
    %67 = vector.shape_cast %66 : vector<16x16x128xbf16> to vector<256x128xbf16>
    %c7 = arith.constant 7 : index
    %c0_49 = arith.constant 0 : index
    %c0_50 = arith.constant 0 : index
    %68 = vector.load %arg3[%c7, %c0_49, %c0_50] : memref<9x128x128xbf16, #tpu.memory_space<vmem>>, vector<1x128x128xbf16>
    %69 = vector.shape_cast %68 : vector<1x128x128xbf16> to vector<128x128xbf16>
    %cst_51 = arith.constant dense<0.000000e+00> : vector<256x128xf32>
    %70 = tpu.matmul %67, %69, %cst_51 {dimension_numbers = #tpu.dot_dimension_numbers<[1], [0], [0], [1], [0, 0, 1, 1], [], []>} : vector<256x128xbf16>, vector<128x128xbf16>, vector<256x128xf32> -> vector<256x128xf32>
    %71 = arith.addf %62, %70 : vector<256x128xf32>
    %c4_i32_52 = arith.constant 4 : i32
    %72 = arith.addi %0, %c4_i32_52 : i32
    %c0_53 = arith.constant 0 : index
    %73 = arith.index_cast %72 : i32 to index
    %c4_54 = arith.constant 4 : index
    %c0_55 = arith.constant 0 : index
    %74 = vector.load %arg2[%c0_53, %73, %c4_54, %c0_55] : memref<1x20x20x128xbf16, #tpu.memory_space<vmem>>, vector<1x16x16x128xbf16>
    %75 = vector.shape_cast %74 : vector<1x16x16x128xbf16> to vector<16x16x128xbf16>
    %76 = vector.shape_cast %75 : vector<16x16x128xbf16> to vector<256x128xbf16>
    %c8 = arith.constant 8 : index
    %c0_56 = arith.constant 0 : index
    %c0_57 = arith.constant 0 : index
    %77 = vector.load %arg3[%c8, %c0_56, %c0_57] : memref<9x128x128xbf16, #tpu.memory_space<vmem>>, vector<1x128x128xbf16>
    %78 = vector.shape_cast %77 : vector<1x128x128xbf16> to vector<128x128xbf16>
    %cst_58 = arith.constant dense<0.000000e+00> : vector<256x128xf32>
    %79 = tpu.matmul %76, %78, %cst_58 {dimension_numbers = #tpu.dot_dimension_numbers<[1], [0], [0], [1], [0, 0, 1, 1], [], []>} : vector<256x128xbf16>, vector<128x128xbf16>, vector<256x128xf32> -> vector<256x128xf32>
    %80 = arith.addf %71, %79 : vector<256x128xf32>
    %c0_59 = arith.constant 0 : index
    %c0_60 = arith.constant 0 : index
    %81 = vector.load %arg4[%c0_59, %c0_60] : memref<1x128xf32, #tpu.memory_space<vmem>>, vector<1x128xf32>
    %82 = vector.broadcast %81 : vector<1x128xf32> to vector<256x128xf32>
    %83 = arith.addf %80, %82 : vector<256x128xf32>
    %cst_61 = arith.constant 0.000000e+00 : f32
    %84 = vector.broadcast %cst_61 : f32 to vector<256x128xf32>
    %85 = arith.maximumf %83, %84 : vector<256x128xf32>
    %86 = vector.shape_cast %85 : vector<256x128xf32> to vector<1x16x16x128xf32>
    %c0_62 = arith.constant 0 : index
    %c0_63 = arith.constant 0 : index
    %c0_64 = arith.constant 0 : index
    %c0_65 = arith.constant 0 : index
    %87 = vector.load %arg5[%c0_62, %c0_63, %c0_64, %c0_65] : memref<1x16x16x128xf32, #tpu.memory_space<vmem>>, vector<1x16x16x128xf32>
    tpu.vector_store %arg5[%c0_62, %c0_63, %c0_64, %c0_65], %86 {strides = array<i32>} : memref<1x16x16x128xf32, #tpu.memory_space<vmem>>, vector<1x16x16x128xf32>,
    return
  }
  func.func @transform_0(%arg0: i32, %arg1: i32) -> (i32, i32, i32, i32) {
    %c0_i32 = arith.constant 0 : i32
    %c0_i32_0 = arith.constant 0 : i32
    %c0_i32_1 = arith.constant 0 : i32
    %c0_i32_2 = arith.constant 0 : i32
    return %arg0, %c0_i32, %c0_i32_0, %c0_i32_1 : i32, i32, i32, i32
  }
  func.func @transform_1(%arg0: i32, %arg1: i32) -> (i32, i32, i32) {
    %c0_i32 = arith.constant 0 : i32
    %c0_i32_0 = arith.constant 0 : i32
    %c0_i32_1 = arith.constant 0 : i32
    %c0_i32_2 = arith.constant 0 : i32
    return %c0_i32, %c0_i32_0, %c0_i32_1 : i32, i32, i32
  }
  func.func @transform_2(%arg0: i32, %arg1: i32) -> (i32, i32) {
    %c0_i32 = arith.constant 0 : i32
    %c0_i32_0 = arith.constant 0 : i32
    %c0_i32_1 = arith.constant 0 : i32
    return %c0_i32, %c0_i32_0 : i32, i32
  }
  func.func @transform_3(%arg0: i32, %arg1: i32) -> (i32, i32, i32, i32) {
    %c0_i32 = arith.constant 0 : i32
    %c0_i32_0 = arith.constant 0 : i32
    %c0_i32_1 = arith.constant 0 : i32
    return %arg0, %arg1, %c0_i32, %c0_i32_0 : i32, i32, i32, i32
  }
}

</mosaic_0001>

<bundles_post_ra>
// kernel: tpu_custom_call.1
= control target key start
LH: loop header
LB: loop body
LE: loop exit
PB: predicated region body
PF: predicated region fallthrough
CT: control target
= control target key end

     0   :  { %8 = vsyncpa [#allocation3], 0  ;;  %s8169_s0 = inlined_call_operand.vmem [shape: bf16[2,20,20,128], index: 0, kind: input, shape index: {}]   ;;  %s8170_s1 = inlined_call_operand.vmem [shape: bf16[9,128,128], index: 1, kind: input, shape index: {}]   ;;  %s8171_s2 = inlined_call_operand.vmem [shape: f32[1,128], index: 2, kind: input, shape index: {}]   ;;  %s8172_s3 = inlined_call_operand.hbm [shape: f32[2,16,16,128], index: 3, kind: output, shape index: {}]  }
   0x1   :  { %10 = vsyncpa [#allocation3 + $0x1], 0  ;;  %s6172_s12 = smov 0   ;;  %s6174_s13 = smov 0  }
   0x2   :  { %s6176_s14 = smov 0   ;;  %s6178_s15 = smov 0  }
   0x3   :  { %s6180_s16 = smov 0   ;;  %s6182_s17 = smov 0  }
   0x4 LB: > { %s4551_s18 = sadd.s32 4294967295, %s6147_s17   ;;  %s4552_s19 = sadd.s32 4294967294, %s6147_s17   ;;  %s6147_s17 = sphi %s6182_s17, %s16_s17   ;;  %s6143_s16 = sphi %s6180_s16, %s8301_s16   ;;  %s6139_s15 = sphi %s6178_s15, %s8300_s15   ;;  %s6135_s14 = sphi %s6176_s14, %s8299_s14   ;;  %s6131_s13 = sphi %s6174_s13, %s8298_s13   ;;  %s6127_s12 = sphi %s6172_s12, %s8297_s12  }
   0x5   : > { %s28_s20 = sadd.s32 1, %s6143_s16  ;;  %s105_s21 = sadd.s32 1, %s6135_s14 }
   0x6   : > { %p30_p0 = scmp.ge.s32.totalorder %s28_s20, 2  ;;  %p115_p1 = scmp.ne.s32.totalorder %s6135_s14, %s6131_s13 }
   0x7   : > { %p116_p2 = scmp.eq.s32.totalorder %s4551_s18, 1  ;;  %p121_p3 = scmp.ne.s32.totalorder %s6131_s13, %s6127_s12 }
   0x8   : > { %s8303_s20 = smov (%p30_p0, %s28_s20), 0  ;;  %p122_p5 = scmp.eq.s32.totalorder %s4552_s19, 1 }
   0x9   : > { %p6212_p4 = por %p116_p2, %p115_p1  ;;  %s100_s23 = ssub.s32 %s6143_s16, %s8303_s20 }
   0xa   : > { %p4555_p6 = scmp.ge.s32.totalorder %s6147_s17, 1  ;;  %p103_p7 = scmp.eq.s32.totalorder %s100_s23, 0 }
   0xb   : > { %p6219_p8 = por %p122_p5, %p121_p3  ;;  %p154_p9 = scmp.lt.s32.totalorder %s6147_s17, 3 }
   0xc   : > { %s6225_s25 = scalar_select %p103_p7, %s6135_s14, %s105_s21  }
   0xd   : > { %p155_p10 = pnand %p4555_p6, %p154_p9 }
   0xf   : > { %158 = sbr.rel (%p155_p10) target bundleno = 554 (0x22a), region = 32 }
  0x14   : > { %v5951_v0 = vld [vmem:[%s8170_s1 + $0x78] sm:$0xff]   ;;  %p178_p11 = scmp.lt.s32.totalorder %s6139_s15, 1  ;;  %v5952_v1 = vld [vmem:[%s8170_s1 + $0x70] sm:$0xff]   ;;  %v5953_v2 = vld [vmem:[%s8170_s1 + $0x68] sm:$0xff]   ;;  %vm317_vm0 = vcmask 1042432   ;;  %vm318_vm1 = vcmask 1046532  }
  0x15   : > { %5445 = vmatprep.subr.bf16.mxu0 %v5951_v0  ;;  %5877 = vmatprep.subr.bf16.mxu1 %v5951_v0  ;;  %v5954_v3 = vld [vmem:[%s8170_s1 + $0x60] sm:$0xff]   ;;  %vm6251_vm2 = vmor %vm317_vm0, %vm318_vm1  ;;  %v5955_v19 = vld [vmem:[%s8170_s1 + $0x58] sm:$0xff]   ;;  %vm1075_vm3 = vcmask 1041408   ;;  %vm1076_vm4 = vcmask 1045508   ;;  %s5228_s7 = sshll.u32 %s6139_s15, 12  ;;  %s6149_s21 = smov [#allocation2]  }
  0x16   : > { %s179_s30 = scalar_select %p178_p11, %s6139_s15, 1  ;;  %5446 = vmatpush3.bf16.msra.mxu0 %v5951_v0  ;;  %5885 = vmatpush3.bf16.msra.mxu1 %v5951_v0  ;;  %v5956_v29 = vld [vmem:[%s8170_s1 + $0x50] sm:$0xff]   ;;  %v5957_v36 = vld [vmem:[%s8170_s1 + $0x48] sm:$0xff]   ;;  %v5958_v52 = vld [vmem:[%s8170_s1 + $0x40] sm:$0xff]  }
  0x17   : > { %5447 = vmatprep.subr.bf16.mxu0 %v5952_v1  ;;  %5878 = vmatprep.subr.bf16.mxu1 %v5952_v1  ;;  %vm6463_vm5 = vmor %vm1075_vm3, %vm1076_vm4  ;;  %s8116_s18 = scalar_lea.hbm %s8172_s3, %s5228_s7  ;;  %s6075_s23 = sshll.u32 %s6149_s21, 4  ;;  %s6076_s23 = int_to_ptr.vmem [resolvable:$false] %s6075_s23 }
  0x18   : > { %s5893_s6 = smul.u32 240, %s179_s30  ;;  %s6077_s26 = scalar_lea.vmem %s6076_s23, 8192 }
  0x1a   : > { %s6241_s9 = scalar_lea.vmem %s8169_s0, %s5893_s6  ;;  %5448 = vmatpush3.bf16.msra.mxu0 %v5952_v1  ;;  %5886 = vmatpush3.bf16.msra.mxu1 %v5952_v1 }
  0x1b   : > { %5449 = vmatprep.subr.bf16.mxu0 %v5953_v2  ;;  %5879 = vmatprep.subr.bf16.mxu1 %v5953_v2  ;;  %v6247_v4 = vld [vmem:[%s6241_s9 + $0x4] sm:$0xf]  ;;  %v237_v5 = vld [vmem:[%s6241_s9] sm:$0xe]  ;;  %v238_v6 = vld [vmem:[%s6241_s9 + $0x8] sm:$0x1] }
  0x1c   : > { %v4558_v8 = vrot.slane %v237_v5, 9  ;;  %v322_v9 = vrot.slane %v6247_v4, 5  ;;  %v325_v10 = vrot.slane %v238_v6, 5  ;;  %v6257_v11 = vld [vmem:[%s6241_s9 + $0x64] sm:$0xf] }
  0x1d   : > { %v253_v12 = vld [vmem:[%s6241_s9 + $0x60] sm:$0xe]  ;;  %v254_v13 = vld [vmem:[%s6241_s9 + $0x68] sm:$0x1]  ;;  %v378_v14 = vrot.slane %v6257_v11, 5 }
  0x1e   : > { %5450 = vmatpush3.bf16.msra.mxu0 %v5953_v2  ;;  %5887 = vmatpush3.bf16.msra.mxu1 %v5953_v2  ;;  %v323_v15 = vsel %vm6251_vm2, %v4558_v8, %v322_v9  ;;  %v324_v16 = vrot.slane %v322_v9, 4  ;;  %v4566_v17 = vrot.slane %v253_v12, 9  ;;  %v381_v18 = vrot.slane %v254_v13, 5  ;;  %v6268_v21 = vld [vmem:[%s6241_s9 + $0x10] sm:$0xf]  ;;  %v5959_v2 = vld [vmem:[%s8170_s1 + $0x38] sm:$0xff]  }
  0x1f   : > { %5451 = vmatprep.subr.bf16.mxu0 %v5954_v3  ;;  %5880 = vmatprep.subr.bf16.mxu1 %v5954_v3  ;;  %v380_v20 = vrot.slane %v378_v14, 4  ;;  %v239_v24 = vld [vmem:[%s6241_s9 + $0xc] sm:$0xe]  ;;  %v240_v27 = vld [vmem:[%s6241_s9 + $0x14] sm:$0x1]  ;;  %v329_v31 = vrot.slane %v6268_v21, 5 }
  0x20   : > { %v326_v22 = vsel %vm6251_vm2, %v324_v16, %v325_v10  ;;  %v379_v23 = vsel %vm6251_vm2, %v4566_v17, %v378_v14  ;;  %v6279_v28 = vld [vmem:[%s6241_s9 + $0x70] sm:$0xf]  ;;  %v255_v32 = vld [vmem:[%s6241_s9 + $0x6c] sm:$0xe]  ;;  %v256_v33 = vld [vmem:[%s6241_s9 + $0x74] sm:$0x1] }
  0x21   : > { %v4590_v25 = vcombine.low %v323_v15, %v326_v22  ;;  %v382_v26 = vsel %vm6251_vm2, %v380_v20, %v381_v18  ;;  %v4559_v34 = vrot.slane %v239_v24, 9  ;;  %v385_v35 = vrot.slane %v6279_v28, 5  ;;  %v6292_v37 = vld [vmem:[%s6241_s9 + $0x1c] sm:$0xf]  ;;  %v241_v38 = vld [vmem:[%s6241_s9 + $0x18] sm:$0xe] }
  0x22   : > { %5452 = vmatpush3.bf16.msra.mxu0 %v5954_v3  ;;  %5888 = vmatpush3.bf16.msra.mxu1 %v5954_v3  ;;  %v4598_v30 = vcombine.low %v379_v23, %v382_v26  ;;  %v332_v39 = vrot.slane %v240_v27, 5  ;;  %v242_v40 = vld [vmem:[%s6241_s9 + $0x20] sm:$0x1]  ;;  %v336_v41 = vrot.slane %v6292_v37, 5  ;;  %v6298_v42 = vld [vmem:[%s6241_s9 + $0x7c] sm:$0xf] }
  0x23   : > { %5453 = vmatprep.subr.bf16.mxu0 %v5955_v19  ;;  %5881 = vmatprep.subr.bf16.mxu1 %v5955_v19  ;;  %v331_v43 = vrot.slane %v329_v31, 4  ;;  %v257_v44 = vld [vmem:[%s6241_s9 + $0x78] sm:$0xe]  ;;  %v258_v45 = vld [vmem:[%s6241_s9 + $0x80] sm:$0x1]  ;;  %v392_v46 = vrot.slane %v6298_v42, 5  ;;  %v330_v0 = vsel %vm6251_vm2, %v4559_v34, %v329_v31 }
  0x24   : > { %5461 = vmatprep.mubr.bf16.mxu0 %v4590_v25  ;;  %5477 = vmatprep.mubr.bf16.mxu1 %v4598_v30  ;;  %v4567_v47 = vrot.slane %v255_v32, 9  ;;  %v387_v48 = vrot.slane %v385_v35, 4  ;;  %v388_v49 = vrot.slane %v256_v33, 5  ;;  %v4560_v50 = vrot.slane %v241_v38, 9  ;;  %v6304_v51 = vld [vmem:[%s6241_s9 + $0x28] sm:$0xf] }
  0x25   : > { %v338_v53 = vrot.slane %v336_v41, 4  ;;  %v339_v54 = vrot.slane %v242_v40, 5  ;;  %v4568_v55 = vrot.slane %v257_v44, 9  ;;  %v395_v56 = vrot.slane %v258_v45, 5  ;;  %v243_v57 = vld [vmem:[%s6241_s9 + $0x24] sm:$0xe] }
  0x26   : > { %5454 = vmatpush3.bf16.msra.mxu0 %v5955_v19  ;;  %5889 = vmatpush3.bf16.msra.mxu1 %v5955_v19  ;;  %v244_v58 = vld [vmem:[%s6241_s9 + $0x2c] sm:$0x1]  ;;  %v6312_v59 = vld [vmem:[%s6241_s9 + $0x88] sm:$0xf]  ;;  %v394_v60 = vrot.slane %v392_v46, 4  ;;  %v343_v61 = vrot.slane %v6304_v51, 5  ;;  %v333_v1 = vsel %vm6251_vm2, %v331_v43, %v332_v39  ;;  %v386_v6 = vsel %vm6251_vm2, %v4567_v47, %v385_v35 }
  0x27   : > { %5455 = vmatprep.subr.bf16.mxu0 %v5956_v29  ;;  %5882 = vmatprep.subr.bf16.mxu1 %v5956_v29  ;;  %v259_v62 = vld [vmem:[%s6241_s9 + $0x84] sm:$0xe]  ;;  %v260_v63 = vld [vmem:[%s6241_s9 + $0x8c] sm:$0x1]  ;;  %v5960_v3 = vld [vmem:[%s8170_s1 + $0xb8] sm:$0xff]   ;;  %v399_v5 = vrot.slane %v6312_v59, 5  ;;  %v389_v8 = vsel %vm6251_vm2, %v387_v48, %v388_v49  ;;  %v337_v12 = vsel %vm6251_vm2, %v4560_v50, %v336_v41  ;;  %v340_v13 = vsel %vm6251_vm2, %v338_v53, %v339_v54 }
  0x28   : > { %v4561_v9 = vrot.slane %v243_v57, 9  ;;  %v346_v10 = vrot.slane %v244_v58, 5  ;;  %v345_v14 = vrot.slane %v343_v61, 4  ;;  %v4569_v15 = vrot.slane %v259_v62, 9  ;;  %v6337_v16 = vld [vmem:[%s6241_s9 + $0x34] sm:$0xf] }
  0x29   : > { %v393_v17 = vsel %vm6251_vm2, %v4568_v55, %v392_v46  ;;  %v396_v18 = vsel %vm6251_vm2, %v394_v60, %v395_v56  ;;  %v402_v19 = vrot.slane %v260_v63, 5  ;;  %v245_v20 = vld [vmem:[%s6241_s9 + $0x30] sm:$0xe]  ;;  %v246_v22 = vld [vmem:[%s6241_s9 + $0x38] sm:$0x1]  ;;  %v350_v23 = vrot.slane %v6337_v16, 5 }
  0x2a   : > { %5456 = vmatpush3.bf16.msra.mxu0 %v5956_v29  ;;  %5890 = vmatpush3.bf16.msra.mxu1 %v5956_v29  ;;  %v4591_v24 = vcombine.low %v330_v0, %v333_v1  ;;  %v4599_v25 = vcombine.low %v386_v6, %v389_v8  ;;  %v5961_v26 = vld [vmem:[%s8170_s1 + $0x30] sm:$0xff]   ;;  %v401_v27 = vrot.slane %v399_v5, 4  ;;  %v4562_v29 = vrot.slane %v245_v20, 9  ;;  %v262_v35 = vld [vmem:[%s6241_s9 + $0x98] sm:$0x1]  ;;  %v5963_v54 = vld [vmem:[%s8170_s1 + $0x28] sm:$0xff]  }
  0x2b   : > { %5457 = vmatprep.subr.bf16.mxu0 %v5957_v36  ;;  %5883 = vmatprep.subr.bf16.mxu1 %v5957_v36  ;;  %v6350_v30 = vld [vmem:[%s6241_s9 + $0x94] sm:$0xf]  ;;  %v261_v31 = vld [vmem:[%s6241_s9 + $0x90] sm:$0xe]  ;;  %v352_v33 = vrot.slane %v350_v23, 4  ;;  %v353_v34 = vrot.slane %v246_v22, 5  ;;  %v4592_v38 = vcombine.low %v337_v12, %v340_v13  ;;  %v4600_v39 = vcombine.low %v393_v17, %v396_v18 }
  0x2c   : > { %v5962_v32 = vld [vmem:[%s8170_s1 + $0xb0] sm:$0xff]   ;;  %v4570_v40 = vrot.slane %v261_v31, 9  ;;  %v409_v41 = vrot.slane %v262_v35, 5  ;;  %v6359_v43 = vld [vmem:[%s6241_s9 + $0x40] sm:$0xf]  ;;  %v344_v45 = vsel %vm6251_vm2, %v4561_v9, %v343_v61  ;;  %v347_v46 = vsel %vm6251_vm2, %v345_v14, %v346_v10  ;;  %v5964_v60 = vld [vmem:[%s8170_s1 + $0xa8] sm:$0xff]  }
  0x2d   : > { %v247_v44 = vld [vmem:[%s6241_s9 + $0x3c] sm:$0xe]  ;;  %v248_v48 = vld [vmem:[%s6241_s9 + $0x44] sm:$0x1]  ;;  %v6368_v49 = vld [vmem:[%s6241_s9 + $0xa0] sm:$0xf]  ;;  %v403_v53 = vsel %vm6251_vm2, %v401_v27, %v402_v19  ;;  %v6380_v55 = vsel %vm6251_vm2, %v4562_v29, %v350_v23  ;;  %v354_v61 = vsel %vm6251_vm2, %v352_v33, %v353_v34  ;;  %v4593_v9 = vcombine.low %v344_v45, %v347_v46 }
  0x2e   : > { %5458 = vmatpush3.bf16.msra.mxu0 %v5957_v36  ;;  %5891 = vmatpush3.bf16.msra.mxu1 %v5957_v36  ;;  %v406_v36 = vrot.slane %v6350_v30, 5  ;;  %v1080_v50 = vrot.slane %v6247_v4, 6  ;;  %v357_v56 = vrot.slane %v6359_v43, 5  ;;  %v263_v57 = vld [vmem:[%s6241_s9 + $0x9c] sm:$0xe]  ;;  %v4563_v62 = vrot.slane %v247_v44, 9 }
  0x2f   : > { %5459 = vmatprep.subr.bf16.mxu0 %v5958_v52  ;;  %5884 = vmatprep.subr.bf16.mxu1 %v5958_v52  ;;  %v264_v58 = vld [vmem:[%s6241_s9 + $0xa4] sm:$0x1]  ;;  %v360_v63 = vrot.slane %v248_v48, 5  ;;  %v413_v0 = vrot.slane %v6368_v49, 5  ;;  %v4594_v12 = vcombine.low %v6380_v55, %v354_v61  ;;  %v6397_v14 = vld [vmem:[%s6241_s9 + $0x4c] sm:$0xf] }
  0x30   : > { %v408_v47 = vrot.slane %v406_v36, 4  ;;  %v407_v1 = vsel %vm6251_vm2, %v4570_v40, %v406_v36  ;;  %v359_v6 = vrot.slane %v357_v56, 4  ;;  %v250_v17 = vld [vmem:[%s6241_s9 + $0x50] sm:$0x1]  ;;  %v5965_v18 = vld [vmem:[%s8170_s1 + $0x20] sm:$0xff]   ;;  %v358_v20 = vsel %vm6251_vm2, %v4563_v62, %v357_v56  ;;  %v5967_v34 = vld [vmem:[%s8170_s1 + $0x18] sm:$0xff]  }
  0x31   : > { %v415_v8 = vrot.slane %v413_v0, 4  ;;  %v5966_v19 = vld [vmem:[%s8170_s1 + $0xa0] sm:$0xff]   ;;  %v367_v29 = vrot.slane %v250_v17, 5  ;;  %v265_v31 = vld [vmem:[%s6241_s9 + $0xa8] sm:$0xe]  ;;  %v5968_v35 = vld [vmem:[%s8170_s1 + $0x98] sm:$0xff]  }
  0x32   : > { %5460 = vmatpush3.bf16.msra.mxu0 %v5958_v52  ;;  %5892 = vmatpush3.bf16.msra.mxu1 %v5958_v52  ;;  %v400_v52 = vsel %vm6251_vm2, %v4569_v15, %v399_v5  ;;  %v416_v5 = vrot.slane %v264_v58, 5  ;;  %v249_v15 = vld [vmem:[%s6241_s9 + $0x48] sm:$0xe]  ;;  %v6429_v40 = vld [vmem:[%s6241_s9 + $0x58] sm:$0xf]  ;;  %v5969_v62 = vld [vmem:[%s8170_s1 + $0x10] sm:$0xff]  }
  0x33   : > { %5493 = vmatprep.subr.bf16.mxu1 %v5959_v2  ;;  %5541 = vmatprep.subr.bf16.mxu0 %v5960_v3  ;;  %v4601_v10 = vcombine.low %v400_v52, %v403_v53  ;;  %v4564_v23 = vrot.slane %v249_v15, 9  ;;  %v251_v44 = vld [vmem:[%s6241_s9 + $0x54] sm:$0xe]  ;;  %v252_v45 = vld [vmem:[%s6241_s9 + $0x5c] sm:$0x1]  ;;  %v371_v46 = vrot.slane %v6429_v40, 5 }
  0x34   : > { %v417_v27 = vsel %vm6251_vm2, %v415_v8, %v416_v5  ;;  %v4565_v52 = vrot.slane %v251_v44, 9  ;;  %v374_v53 = vrot.slane %v252_v45, 5  ;;  %v6435_v55 = vld [vmem:[%s6241_s9 + $0xb8] sm:$0xf]  ;;  %v267_v56 = vld [vmem:[%s6241_s9 + $0xb4] sm:$0xe] }
  0x35   : > { %5462 = vmatmul.mubr.bf16.vlgmr.msra.gmra.mxu0 %v4591_v24  ;;  %5478 = vmatmul.mubr.bf16.vlgmr.msra.gmra.mxu1 %v4599_v25  ;;  %v364_v24 = vrot.slane %v6397_v14, 5  ;;  %v6413_v25 = vld [vmem:[%s6241_s9 + $0xac] sm:$0xf]  ;;  %v373_v58 = vrot.slane %v371_v46, 4  ;;  %v4573_v61 = vrot.slane %v267_v56, 9  ;;  %v5973_v44 = vld [vmem:[%s8170_s1] sm:$0xff]  }
  0x36   : > { %5494 = vmatpush3.bf16.msra.mxu1 %v5959_v2  ;;  %5542 = vmatpush3.bf16.msra.mxu0 %v5960_v3  ;;  %v410_v2 = vsel %vm6251_vm2, %v408_v47, %v409_v41  ;;  %v4571_v3 = vrot.slane %v263_v57, 9  ;;  %v420_v33 = vrot.slane %v6413_v25, 5 }
  0x37   : > { %5495 = vmatprep.subr.bf16.mxu1 %v5961_v26  ;;  %5543 = vmatprep.subr.bf16.mxu0 %v5962_v32  ;;  %v4602_v13 = vcombine.low %v407_v1, %v410_v2  ;;  %v366_v36 = vrot.slane %v364_v24, 4  ;;  %v427_v1 = vrot.slane %v6435_v55, 5 }
  0x38   : > { %5465 = vmatprep.mubr.bf16.mxu0 %v4592_v38  ;;  %5481 = vmatprep.mubr.bf16.mxu1 %v4600_v39  ;;  %v414_v22 = vsel %vm6251_vm2, %v4571_v3, %v413_v0  ;;  %v4572_v38 = vrot.slane %v265_v31, 9  ;;  %v422_v41 = vrot.slane %v420_v33, 4  ;;  %v5970_v3 = vld [vmem:[%s8170_s1 + $0x90] sm:$0xff]   ;;  %v1015_v31 = vld [vmem:[%s6241_s9 + $0x18] sm:$0xc] }
  0x39   : > { %v4603_v48 = vcombine.low %v414_v22, %v417_v27  ;;  %v368_v57 = vsel %vm6251_vm2, %v366_v36, %v367_v29  ;;  %v429_v5 = vrot.slane %v427_v1, 4  ;;  %v375_v22 = vsel %vm6251_vm2, %v373_v58, %v374_v53  ;;  %v1013_v27 = vld [vmem:[%s6241_s9 + $0xc] sm:$0xc]  ;;  %v1014_v29 = vld [vmem:[%s6241_s9 + $0x14] sm:$0x3] }
  0x3a   : > { %5496 = vmatpush3.bf16.msra.mxu1 %v5961_v26  ;;  %5544 = vmatpush3.bf16.msra.mxu0 %v5962_v32  ;;  %v361_v26 = vsel %vm6251_vm2, %v359_v6, %v360_v63  ;;  %v266_v32 = vld [vmem:[%s6241_s9 + $0xb0] sm:$0x1]  ;;  %v421_v63 = vsel %vm6251_vm2, %v4572_v38, %v420_v33  ;;  %v4639_v45 = vrot.slane %v1013_v27, 10  ;;  %v1021_v27 = vld [vmem:[%s6241_s9 + $0x3c] sm:$0xc] }
  0x3b   : > { %5497 = vmatprep.subr.bf16.mxu1 %v5963_v54  ;;  %5545 = vmatprep.subr.bf16.mxu0 %v5964_v60  ;;  %v423_v39 = vrot.slane %v266_v32, 5  ;;  %v4595_v47 = vcombine.low %v358_v20, %v361_v26  ;;  %v1087_v20 = vrot.slane %v6268_v21, 6  ;;  %v5972_v26 = vld [vmem:[%s8170_s1 + $0x88] sm:$0xff]   ;;  %v1094_v32 = vrot.slane %v6292_v37, 6 }
  0x3d   : > { %5466 = vmatmul.mubr.bf16.gmra.mxu0 %v4593_v9  ;;  %5482 = vmatmul.mubr.bf16.gmra.mxu1 %v4601_v10  ;;  %v424_v0 = vsel %vm6251_vm2, %v422_v41, %v423_v39  ;;  %v1011_v9 = vld [vmem:[%s6241_s9] sm:$0xc]  ;;  %v1012_v10 = vld [vmem:[%s6241_s9 + $0x8] sm:$0x3]  ;;  %v1016_v39 = vld [vmem:[%s6241_s9 + $0x20] sm:$0x3] }
  0x3e   : > { %5498 = vmatpush3.bf16.msra.mxu1 %v5963_v54  ;;  %5546 = vmatpush3.bf16.msra.mxu0 %v5964_v60  ;;  %v365_v54 = vsel %vm6251_vm2, %v4564_v23, %v364_v24  ;;  %v268_v60 = vld [vmem:[%s6241_s9 + $0xbc] sm:$0x1]  ;;  %v4604_v8 = vcombine.low %v421_v63, %v424_v0  ;;  %v4638_v17 = vrot.slane %v1011_v9, 10  ;;  %v428_v23 = vsel %vm6251_vm2, %v4573_v61, %v427_v1  ;;  %v1017_v61 = vld [vmem:[%s6241_s9 + $0x24] sm:$0xc] }
  0x3f   : > { %5499 = vmatprep.subr.bf16.mxu1 %v5965_v18  ;;  %5547 = vmatprep.subr.bf16.mxu0 %v5966_v19  ;;  %v430_v2 = vrot.slane %v268_v60, 5  ;;  %v4596_v6 = vcombine.low %v365_v54, %v368_v57  ;;  %v1089_v41 = vrot.slane %v1087_v20, 4  ;;  %v1096_v53 = vrot.slane %v1094_v32, 4  ;;  %v191_v54 = vld [vmem:[%s6241_s9 + $0xc] sm:$0xf]  ;;  %v5978_v63 = vld [vmem:[%s8170_s1 + $0x138] sm:$0xff]  }
  0x40   : > { %5469 = vmatprep.mubr.bf16.mxu0 %v4594_v12  ;;  %5485 = vmatprep.mubr.bf16.mxu1 %v4602_v13  ;;  %v372_v12 = vsel %vm6251_vm2, %v4565_v52, %v371_v46  ;;  %v5971_v13 = vld [vmem:[%s8170_s1 + $0x8] sm:$0xff]   ;;  %v1081_v36 = vsel %vm6463_vm5, %v4638_v17, %v1080_v50  ;;  %v1090_v46 = vrot.slane %v1014_v29, 6  ;;  %v1097_v56 = vrot.slane %v1016_v39, 6  ;;  %v193_v60 = vld [vmem:[%s6241_s9 + $0x18] sm:$0xf] }
  0x41   : > { %v431_v24 = vsel %vm6251_vm2, %v429_v5, %v430_v2  ;;  %v4597_v33 = vcombine.low %v372_v12, %v375_v22  ;;  %v1088_v57 = vsel %vm6463_vm5, %v4639_v45, %v1087_v20  ;;  %v1018_v0 = vld [vmem:[%s6241_s9 + $0x2c] sm:$0x3]  ;;  %v1019_v1 = vld [vmem:[%s6241_s9 + $0x30] sm:$0xc]  ;;  %v1108_v2 = vrot.slane %v6337_v16, 6 }
  0x42   : > { %5500 = vmatpush3.bf16.msra.mxu1 %v5965_v18  ;;  %5548 = vmatpush3.bf16.msra.mxu0 %v5966_v19  ;;  %v1082_v18 = vrot.slane %v1080_v50, 4  ;;  %v1083_v19 = vrot.slane %v1012_v10, 6  ;;  %v5974_v50 = vld [vmem:[%s8170_s1 + $0x80] sm:$0xff]   ;;  %v1091_v58 = vsel %vm6463_vm5, %v1089_v41, %v1090_v46  ;;  %v1098_v5 = vsel %vm6463_vm5, %v1096_v53, %v1097_v56  ;;  %v1024_v41 = vld [vmem:[%s6241_s9 + $0x50] sm:$0x3] }
  0x43   : > { %5501 = vmatprep.subr.bf16.mxu1 %v5967_v34  ;;  %5549 = vmatprep.subr.bf16.mxu0 %v5968_v35  ;;  %v4671_v9 = vcombine.low %v1088_v57, %v1091_v58  ;;  %v4616_v10 = vcombine.low %v193_v60, %v6292_v37  ;;  %v4641_v12 = vrot.slane %v1017_v61, 10  ;;  %v1104_v17 = vrot.slane %v1018_v0, 6  ;;  %v5982_v37 = vld [vmem:[%s8170_s1 + $0x130] sm:$0xff]   ;;  %v5989_v57 = vld [vmem:[%s8170_s1 + $0xe0] sm:$0xff]  }
  0x44   : > { %v1084_v38 = vsel %vm6463_vm5, %v1082_v18, %v1083_v19  ;;  %v4642_v19 = vrot.slane %v1019_v1, 10  ;;  %v1110_v20 = vrot.slane %v1108_v2, 4  ;;  %v1122_v39 = vrot.slane %v6397_v14, 6  ;;  %v5990_v58 = vld [vmem:[%s8170_s1 + $0x120] sm:$0xff]   ;;  %v1028_v1 = vld [vmem:[%s6241_s9 + $0x68] sm:$0x3] }
  0x45   : > { %5470 = vmatmul.mubr.bf16.gmra.mxu0 %v4595_v47  ;;  %5486 = vmatmul.mubr.bf16.gmra.mxu1 %v4603_v48  ;;  %v4640_v47 = vrot.slane %v1015_v31, 10  ;;  %v4670_v52 = vcombine.low %v1081_v36, %v1084_v38  ;;  %v5986_v36 = vld [vmem:[%s8170_s1 + $0x128] sm:$0xff]   ;;  %v4643_v46 = vrot.slane %v1021_v27, 10  ;;  %v1129_v60 = vrot.slane %v6429_v40, 6  ;;  %v1027_v0 = vld [vmem:[%s6241_s9 + $0x60] sm:$0xc] }
  0x46   : > { %5502 = vmatpush3.bf16.msra.mxu1 %v5967_v34  ;;  %5550 = vmatpush3.bf16.msra.mxu0 %v5968_v35  ;;  %v4605_v34 = vcombine.low %v428_v23, %v431_v24  ;;  %v189_v35 = vld [vmem:[%s6241_s9] sm:$0xf]  ;;  %v195_v23 = vld [vmem:[%s6241_s9 + $0x24] sm:$0xf]  ;;  %v1115_v24 = vrot.slane %v6359_v43, 6  ;;  %v1124_v56 = vrot.slane %v1122_v39, 4 }
  0x47   : > { %5503 = vmatprep.subr.bf16.mxu1 %v5969_v62  ;;  %5551 = vmatprep.subr.bf16.mxu0 %v5970_v3  ;;  %v4614_v48 = vcombine.low %v189_v35, %v6247_v4  ;;  %v5977_v4 = vld [vmem:[%s8170_s1 + $0xf8] sm:$0xff]   ;;  %v5985_v35 = vld [vmem:[%s8170_s1 + $0xe8] sm:$0xff]  }
  0x48   : > { %5473 = vmatprep.mubr.bf16.mxu0 %v4596_v6  ;;  %5489 = vmatprep.mubr.bf16.mxu1 %v4604_v8  ;;  %v1020_v6 = vld [vmem:[%s6241_s9 + $0x38] sm:$0x3]  ;;  %v4615_v8 = vcombine.low %v191_v54, %v6268_v21  ;;  %v5981_v21 = vld [vmem:[%s8170_s1 + $0xf0] sm:$0xff]   ;;  %v1023_v38 = vld [vmem:[%s6241_s9 + $0x48] sm:$0xc]  ;;  %v1125_v54 = vrot.slane %v1024_v41, 6  ;;  %v1116_v61 = vsel %vm6463_vm5, %v4643_v46, %v1115_v24 }
  0x49   : > { %v1111_v22 = vrot.slane %v1020_v6, 6  ;;  %v4644_v53 = vrot.slane %v1023_v38, 10  ;;  %v5993_v6 = vld [vmem:[%s8170_s1 + $0xd8] sm:$0xff]   ;;  %v1029_v27 = vld [vmem:[%s6241_s9 + $0x6c] sm:$0xc] }
  0x4a   : > { %5504 = vmatpush3.bf16.msra.mxu1 %v5969_v62  ;;  %5552 = vmatpush3.bf16.msra.mxu0 %v5970_v3  ;;  %v1101_v62 = vrot.slane %v6304_v51, 6  ;;  %v1095_v3 = vsel %vm6463_vm5, %v4640_v47, %v1094_v32  ;;  %v1022_v32 = vld [vmem:[%s6241_s9 + $0x44] sm:$0x3]  ;;  %v1032_v38 = vld [vmem:[%s6241_s9 + $0x80] sm:$0x3]  ;;  %v6002_v41 = vld [vmem:[%s8170_s1 + $0x108] sm:$0xff]  }
  0x4b   : > { %5505 = vmatprep.subr.bf16.mxu1 %v5971_v13  ;;  %5553 = vmatprep.subr.bf16.mxu0 %v5972_v26  ;;  %v4672_v18 = vcombine.low %v1095_v3, %v1098_v5  ;;  %v1126_v3 = vsel %vm6463_vm5, %v1124_v56, %v1125_v54  ;;  %v1136_v5 = vrot.slane %v6257_v11, 6  ;;  %v4647_v46 = vrot.slane %v1029_v27, 10  ;;  %v1040_v27 = vld [vmem:[%s6241_s9 + $0xb0] sm:$0x3] }
  0x4c   : > { %v1102_v29 = vsel %vm6463_vm5, %v4641_v12, %v1101_v62  ;;  %v1153_v54 = vrot.slane %v1032_v38, 6 }
  0x4d   : > { %5474 = vmatmul.mubr.bf16.gmra.mxu0 %v4597_v33  ;;  %5490 = vmatmul.mubr.bf16.gmra.mxu1 %v4605_v34  ;;  %v1109_v33 = vsel %vm6463_vm5, %v4642_v19, %v1108_v2  ;;  %v1112_v34 = vsel %vm6463_vm5, %v1110_v20, %v1111_v22  ;;  %v1123_v2 = vsel %vm6463_vm5, %v4644_v53, %v1122_v39  ;;  %v4646_v20 = vrot.slane %v1027_v0, 10  ;;  %v6001_v39 = vld [vmem:[%s8170_s1 + $0xc8] sm:$0xff]   ;;  %v1035_v0 = vld [vmem:[%s6241_s9 + $0x90] sm:$0xc] }
  0x4e   : > { %5506 = vmatpush3.bf16.msra.mxu1 %v5971_v13  ;;  %5554 = vmatpush3.bf16.msra.mxu0 %v5972_v26  ;;  %v1103_v13 = vrot.slane %v1101_v62, 4  ;;  %v197_v26 = vld [vmem:[%s6241_s9 + $0x30] sm:$0xf]  ;;  %v1138_v22 = vrot.slane %v1136_v5, 4  ;;  %v1157_v53 = vrot.slane %v6312_v59, 6 }
  0x4f   : > { %5507 = vmatprep.subr.bf16.mxu1 %v5973_v44  ;;  %5555 = vmatprep.subr.bf16.mxu0 %v5974_v50  ;;  %v4618_v47 = vcombine.low %v197_v26, %v6337_v16  ;;  %v201_v16 = vld [vmem:[%s6241_s9 + $0x48] sm:$0xf] }
  0x50   : > { %5509 = vmatprep.mubr.bf16.mxu1 %v4614_v48  ;;  %5557 = vmatprep.mubr.bf16.mxu0 %v4670_v52  ;;  %v1105_v31 = vsel %vm6463_vm5, %v1103_v13, %v1104_v17  ;;  %v4674_v48 = vcombine.low %v1109_v33, %v1112_v34  ;;  %v1118_v52 = vrot.slane %v1022_v32, 6  ;;  %v4620_v12 = vcombine.low %v201_v16, %v6397_v14  ;;  %v5998_v14 = vld [vmem:[%s8170_s1 + $0x110] sm:$0xff]   ;;  %v1031_v34 = vld [vmem:[%s6241_s9 + $0x78] sm:$0xc] }
  0x51   : > { %v4673_v45 = vcombine.low %v1102_v29, %v1105_v31  ;;  %v4676_v13 = vcombine.low %v1123_v2, %v1126_v3  ;;  %v1030_v29 = vld [vmem:[%s6241_s9 + $0x74] sm:$0x3]  ;;  %v205_v31 = vld [vmem:[%s6241_s9 + $0x60] sm:$0xf]  ;;  %v1137_v32 = vsel %vm6463_vm5, %v4646_v20, %v1136_v5  ;;  %v209_v16 = vld [vmem:[%s6241_s9 + $0x78] sm:$0xf] }
  0x52   : > { %5508 = vmatpush3.bf16.msra.mxu1 %v5973_v44  ;;  %5556 = vmatpush3.bf16.msra.mxu0 %v5974_v50  ;;  %v4617_v44 = vcombine.low %v195_v23, %v6304_v51  ;;  %v1117_v50 = vrot.slane %v1115_v24, 4  ;;  %v199_v51 = vld [vmem:[%s6241_s9 + $0x3c] sm:$0xf]  ;;  %v1139_v23 = vrot.slane %v1028_v1, 6  ;;  %v1164_v1 = vrot.slane %v6350_v30, 6 }
  0x53   : > { %5589 = vmatprep.subr.bf16.mxu1 %v5977_v4  ;;  %5637 = vmatprep.subr.bf16.mxu0 %v5978_v63  ;;  %v1036_v2 = vld [vmem:[%s6241_s9 + $0x98] sm:$0x3] }
  0x54   : > { %v1119_v62 = vsel %vm6463_vm5, %v1117_v50, %v1118_v52  ;;  %v1140_v33 = vsel %vm6463_vm5, %v1138_v22, %v1139_v23  ;;  %v1146_v50 = vrot.slane %v1030_v29, 6  ;;  %v4648_v52 = vrot.slane %v1031_v34, 10  ;;  %v1037_v23 = vld [vmem:[%s6241_s9 + $0x9c] sm:$0xc] }
  0x55   : > { %5510 = vmatmul.mubr.bf16.vlgmr.msra.gmra.mxu1 %v4615_v8  ;;  %5558 = vmatmul.mubr.bf16.vlgmr.msra.gmra.mxu0 %v4671_v9  ;;  %v5994_v8 = vld [vmem:[%s8170_s1 + $0x118] sm:$0xff]   ;;  %v4619_v9 = vcombine.low %v199_v51, %v6359_v43  ;;  %v5997_v43 = vld [vmem:[%s8170_s1 + $0xd0] sm:$0xff]   ;;  %v207_v51 = vld [vmem:[%s6241_s9 + $0x6c] sm:$0xf]  ;;  %v4651_v34 = vrot.slane %v1037_v23, 10 }
  0x56   : > { %5590 = vmatpush3.bf16.msra.mxu1 %v5977_v4  ;;  %5638 = vmatpush3.bf16.msra.mxu0 %v5978_v63  ;;  %v1025_v4 = vld [vmem:[%s6241_s9 + $0x54] sm:$0xc]  ;;  %v1026_v63 = vld [vmem:[%s6241_s9 + $0x5c] sm:$0x3]  ;;  %v4623_v3 = vcombine.low %v207_v51, %v6279_v28 }
  0x57   : > { %5513 = vmatprep.mubr.bf16.mxu1 %v4616_v10  ;;  %5561 = vmatprep.mubr.bf16.mxu0 %v4672_v18  ;;  %v4675_v10 = vcombine.low %v1116_v61, %v1119_v62  ;;  %v4645_v17 = vrot.slane %v1025_v4, 10  ;;  %v1131_v18 = vrot.slane %v1129_v60, 4  ;;  %v1132_v19 = vrot.slane %v1026_v63, 6  ;;  %v1033_v4 = vld [vmem:[%s6241_s9 + $0x84] sm:$0xc] }
  0x58   : > { %5591 = vmatprep.subr.bf16.mxu1 %v5981_v21  ;;  %5639 = vmatprep.subr.bf16.mxu0 %v5982_v37  ;;  %v1034_v62 = vld [vmem:[%s6241_s9 + $0x8c] sm:$0x3]  ;;  %v1159_v63 = vrot.slane %v1157_v53, 4 }
  0x59   : > { %v1130_v24 = vsel %vm6463_vm5, %v4645_v17, %v1129_v60  ;;  %v1133_v26 = vsel %vm6463_vm5, %v1131_v18, %v1132_v19  ;;  %v1166_v17 = vrot.slane %v1164_v1, 4  ;;  %v1167_v18 = vrot.slane %v1036_v2, 6  ;;  %v213_v19 = vld [vmem:[%s6241_s9 + $0x90] sm:$0xf]  ;;  %v4769_v2 = vld [vmem:[%s6241_s9 + $0x24] sm:$0xe] }
  0x5a   : > { %5592 = vmatpush3.bf16.msra.mxu1 %v5981_v21  ;;  %5640 = vmatpush3.bf16.msra.mxu0 %v5982_v37  ;;  %v1143_v21 = vrot.slane %v6279_v28, 6  ;;  %v203_v37 = vld [vmem:[%s6241_s9 + $0x54] sm:$0xf]  ;;  %v4650_v28 = vrot.slane %v1035_v0, 10  ;;  %v6688_v0 = vld [vmem:[%s6241_s9 + $0x28] sm:$0xf] }
  0x5b   : > { %5593 = vmatprep.subr.bf16.mxu1 %v5985_v35  ;;  %5641 = vmatprep.subr.bf16.mxu0 %v5986_v36 }
  0x5d   : > { %5514 = vmatmul.mubr.bf16.gmra.mxu1 %v4617_v44  ;;  %5562 = vmatmul.mubr.bf16.gmra.mxu0 %v4673_v45  ;;  %v4621_v44 = vcombine.low %v203_v37, %v6429_v40  ;;  %v4677_v45 = vcombine.low %v1130_v24, %v1133_v26  ;;  %v6005_v40 = vld [vmem:[%s8170_s1 + $0xc0] sm:$0xff]   ;;  %v1165_v37 = vsel %vm6463_vm5, %v4650_v28, %v1164_v1  ;;  %v1039_v26 = vld [vmem:[%s6241_s9 + $0xa8] sm:$0xc]  ;;  %v219_v1 = vld [vmem:[%s6241_s9 + $0xb4] sm:$0xf] }
  0x5e   : > { %5517 = vmatprep.mubr.bf16.mxu1 %v4618_v47  ;;  %5565 = vmatprep.mubr.bf16.mxu0 %v4674_v48  ;;  %v4622_v47 = vcombine.low %v205_v31, %v6257_v11  ;;  %v4678_v48 = vcombine.low %v1137_v32, %v1140_v33  ;;  %v6006_v11 = vld [vmem:[%s8170_s1 + $0x100] sm:$0xff]   ;;  %v1168_v24 = vsel %vm6463_vm5, %v1166_v17, %v1167_v18  ;;  %v4652_v38 = vrot.slane %v1039_v26, 10  ;;  %v4772_v28 = vld [vmem:[%s6241_s9 + $0x30] sm:$0xe]  ;;  %v4774_v17 = vld [vmem:[%s6241_s9 + $0x38] sm:$0x1] }
  0x5f   : > { %5594 = vmatpush3.bf16.msra.mxu1 %v5985_v35  ;;  %5642 = vmatpush3.bf16.msra.mxu0 %v5986_v36  ;;  %v1150_v35 = vrot.slane %v6298_v42, 6  ;;  %v1145_v36 = vrot.slane %v1143_v21, 4  ;;  %v4626_v32 = vcombine.low %v213_v19, %v6350_v30  ;;  %v4682_v33 = vcombine.low %v1165_v37, %v1168_v24  ;;  %v6007_v19 = vld [vmem:[%s6241_s9 + $0x18] sm:$0xff]   ;;  %v6714_v26 = vld [vmem:[%s6241_s9 + $0x4c] sm:$0xf] }
  0x60   : > { %5595 = vmatprep.subr.bf16.mxu1 %v5989_v57  ;;  %5643 = vmatprep.subr.bf16.mxu0 %v5990_v58  ;;  %v4629_v18 = vcombine.low %v219_v1, %v6435_v55  ;;  %v2017_v24 = vrot.slane %v4774_v17, 5 }
  0x61   : > { %v1152_v56 = vrot.slane %v1150_v35, 4  ;;  %v1151_v60 = vsel %vm6463_vm5, %v4648_v52, %v1150_v35  ;;  %v4766_v52 = vld [vmem:[%s6241_s9 + $0x18] sm:$0xe] }
  0x63   : > { %5596 = vmatpush3.bf16.msra.mxu1 %v5989_v57  ;;  %5644 = vmatpush3.bf16.msra.mxu0 %v5990_v58  ;;  %v1144_v57 = vsel %vm6463_vm5, %v4647_v46, %v1143_v21  ;;  %v1147_v58 = vsel %vm6463_vm5, %v1145_v36, %v1146_v50  ;;  %v1154_v61 = vsel %vm6463_vm5, %v1152_v56, %v1153_v54  ;;  %v1171_v21 = vrot.slane %v6368_v49, 6  ;;  %v6669_v46 = vld [vmem:[%s6241_s9 + $0x1c] sm:$0xf] }
  0x64   : > { %5597 = vmatprep.subr.bf16.mxu1 %v5993_v6  ;;  %5645 = vmatprep.subr.bf16.mxu0 %v5994_v8  ;;  %v4679_v5 = vcombine.low %v1144_v57, %v1147_v58  ;;  %v1042_v50 = vld [vmem:[%s6241_s9 + $0xbc] sm:$0x3]  ;;  %v2000_v54 = vrot.slane %v6669_v46, 5 }
  0x65   : > { %5518 = vmatmul.mubr.bf16.gmra.mxu1 %v4619_v9  ;;  %5566 = vmatmul.mubr.bf16.gmra.mxu0 %v4675_v10  ;;  %v4624_v9 = vcombine.low %v209_v16, %v6298_v42  ;;  %v4680_v10 = vcombine.low %v1151_v60, %v1154_v61  ;;  %v211_v42 = vld [vmem:[%s6241_s9 + $0x84] sm:$0xf]  ;;  %v1173_v35 = vrot.slane %v1171_v21, 4  ;;  %v1172_v30 = vsel %vm6463_vm5, %v4651_v34, %v1171_v21  ;;  %v6711_v21 = vld [vmem:[%s6241_s9 + $0x40] sm:$0xf] }
  0x66   : > { %5521 = vmatprep.mubr.bf16.mxu1 %v4620_v12  ;;  %5569 = vmatprep.mubr.bf16.mxu0 %v4676_v13  ;;  %v1160_v12 = vrot.slane %v1034_v62, 6  ;;  %v6644_v13 = vld [vmem:[%s8170_s1 + $0x1b8] sm:$0xff]   ;;  %v4625_v29 = vcombine.low %v211_v42, %v6312_v59  ;;  %v1041_v59 = vld [vmem:[%s6241_s9 + $0xb4] sm:$0xc]  ;;  %v1188_v60 = vrot.slane %v1042_v50, 6  ;;  %v4814_v61 = vrot.slane %v4766_v52, 9 }
  0x67   : > { %5598 = vmatpush3.bf16.msra.mxu1 %v5993_v6  ;;  %5646 = vmatpush3.bf16.msra.mxu0 %v5994_v8  ;;  %v4649_v6 = vrot.slane %v1033_v4, 10  ;;  %v6638_v8 = vld [vmem:[%s8170_s1 + $0x178] sm:$0xff]   ;;  %v4653_v4 = vrot.slane %v1041_v59, 10  ;;  %v2002_v62 = vrot.slane %v2000_v54, 4  ;;  %v4778_v34 = vld [vmem:[%s6241_s9 + $0x48] sm:$0xe] }
  0x68   : > { %5599 = vmatprep.subr.bf16.mxu1 %v5997_v43  ;;  %5647 = vmatprep.subr.bf16.mxu0 %v5998_v14  ;;  %v1161_v22 = vsel %vm6463_vm5, %v1159_v63, %v1160_v12 }
  0x69   : > { %v1158_v20 = vsel %vm6463_vm5, %v4649_v6, %v1157_v53  ;;  %v2007_v6 = vrot.slane %v6688_v0, 5 }
  0x6a   : > { %v4681_v31 = vcombine.low %v1158_v20, %v1161_v22  ;;  %v4815_v20 = vrot.slane %v4769_v2, 9 }
  0x6b   : > { %5600 = vmatpush3.bf16.msra.mxu1 %v5997_v43  ;;  %5648 = vmatpush3.bf16.msra.mxu0 %v5998_v14  ;;  %v1038_v43 = vld [vmem:[%s6241_s9 + $0xa4] sm:$0x3]  ;;  %v1178_v14 = vrot.slane %v6413_v25, 6  ;;  %v2009_v23 = vrot.slane %v2007_v6, 4 }
  0x6c   : > { %5601 = vmatprep.subr.bf16.mxu1 %v6001_v39  ;;  %5649 = vmatprep.subr.bf16.mxu0 %v6002_v41  ;;  %v1174_v36 = vrot.slane %v1038_v43, 6 }
  0x6d   : > { %5522 = vmatmul.mubr.bf16.gmra.mxu1 %v4621_v44  ;;  %5570 = vmatmul.mubr.bf16.gmra.mxu0 %v4677_v45  ;;  %v215_v44 = vld [vmem:[%s6241_s9 + $0x9c] sm:$0xf]  ;;  %v217_v45 = vld [vmem:[%s6241_s9 + $0xa8] sm:$0xf]  ;;  %v1179_v53 = vsel %vm6463_vm5, %v4652_v38, %v1178_v14 }
  0x6e   : > { %5525 = vmatprep.mubr.bf16.mxu1 %v4622_v47  ;;  %5573 = vmatprep.mubr.bf16.mxu0 %v4678_v48  ;;  %v1185_v47 = vrot.slane %v6435_v55, 6  ;;  %v1175_v48 = vsel %vm6463_vm5, %v1173_v35, %v1174_v36  ;;  %v4628_v57 = vcombine.low %v217_v45, %v6413_v25  ;;  %v2021_v55 = vrot.slane %v6711_v21, 5  ;;  %v4780_v35 = vld [vmem:[%s6241_s9 + $0x50] sm:$0x1]  ;;  %v6008_v36 = vld [vmem:[%s6241_s9 + $0x24] sm:$0xff]  }
  0x6f   : > { %5602 = vmatpush3.bf16.msra.mxu1 %v6001_v39  ;;  %5650 = vmatpush3.bf16.msra.mxu0 %v6002_v41  ;;  %v1180_v39 = vrot.slane %v1178_v14, 4  ;;  %v1181_v41 = vrot.slane %v1040_v27, 6  ;;  %v4683_v51 = vcombine.low %v1172_v30, %v1175_v48  ;;  %v4816_v14 = vrot.slane %v4772_v28, 9  ;;  %v4775_v27 = vld [vmem:[%s6241_s9 + $0x3c] sm:$0xe]  ;;  %v6014_v30 = vld [vmem:[%s8170_s1 + $0x1b0] sm:$0xff]  }
  0x70   : > { %5603 = vmatprep.subr.bf16.mxu1 %v6005_v40  ;;  %5651 = vmatprep.subr.bf16.mxu0 %v6006_v11  ;;  %v1187_v58 = vrot.slane %v1185_v47, 4  ;;  %v1186_v25 = vsel %vm6463_vm5, %v4653_v4, %v1185_v47  ;;  %v4817_v45 = vrot.slane %v4775_v27, 9  ;;  %v2023_v59 = vrot.slane %v2021_v55, 4  ;;  %v6013_v47 = vld [vmem:[%s8170_s1 + $0x170] sm:$0xff]   ;;  %v4784_v4 = vld [vmem:[%s6241_s9 + $0x60] sm:$0xe] }
  0x71   : > { %v1182_v56 = vsel %vm6463_vm5, %v1180_v39, %v1181_v41  ;;  %v4818_v48 = vrot.slane %v4778_v34, 9  ;;  %v6016_v27 = vld [vmem:[%s6241_s9 + $0x54] sm:$0xff]  }
  0x72   : > { %v4684_v16 = vcombine.low %v1179_v53, %v1182_v56  ;;  %v2031_v53 = vrot.slane %v4780_v35, 5  ;;  %v6739_v56 = vld [vmem:[%s6241_s9 + $0x58] sm:$0xf] }
  0x73   : > { %5604 = vmatpush3.bf16.msra.mxu1 %v6005_v40  ;;  %5652 = vmatpush3.bf16.msra.mxu0 %v6006_v11  ;;  %v4768_v40 = vld [vmem:[%s6241_s9 + $0x20] sm:$0x1]  ;;  %v4627_v11 = vcombine.low %v215_v44, %v6368_v49  ;;  %v4771_v49 = vld [vmem:[%s6241_s9 + $0x2c] sm:$0x1]  ;;  %v6011_v44 = vld [vmem:[%s6241_s9 + $0x30] sm:$0xff]  }
  0x74   : > { %5685 = vmatprep.subr.bf16.mxu1 %v6638_v8  ;;  %5733 = vmatprep.subr.bf16.mxu0 %v6644_v13  ;;  %v2003_v63 = vrot.slane %v4768_v40, 5  ;;  %v2010_v43 = vrot.slane %v4771_v49, 5  ;;  %v4781_v40 = vld [vmem:[%s6241_s9 + $0x54] sm:$0xe]  ;;  %v6767_v49 = vld [vmem:[%s6241_s9 + $0x70] sm:$0xf] }
  0x75   : > { %5526 = vmatmul.mubr.bf16.gmra.mxu1 %v4623_v3  ;;  %5574 = vmatmul.mubr.bf16.gmra.mxu0 %v4679_v5  ;;  %v6693_v3 = vld [vmem:[%s6241_s9 + $0x34] sm:$0xf]  ;;  %v1189_v5 = vsel %vm6463_vm5, %v1187_v58, %v1188_v60  ;;  %v4786_v60 = vld [vmem:[%s6241_s9 + $0x68] sm:$0x1]  ;;  %v4819_v2 = vrot.slane %v4781_v40, 9 }
  0x76   : > { %5529 = vmatprep.mubr.bf16.mxu1 %v4624_v9  ;;  %5577 = vmatprep.mubr.bf16.mxu0 %v4680_v10  ;;  %v2001_v9 = vsel %vm6251_vm2, %v4814_v61, %v2000_v54  ;;  %v2004_v10 = vsel %vm6251_vm2, %v2002_v62, %v2003_v63  ;;  %v2014_v12 = vrot.slane %v6693_v3, 5  ;;  %v4685_v42 = vcombine.low %v1186_v25, %v1189_v5  ;;  %v6012_v25 = vld [vmem:[%s6241_s9 + $0x3c] sm:$0xff]   ;;  %v6015_v5 = vld [vmem:[%s6241_s9 + $0x48] sm:$0xff]  }
  0x77   : > { %v4846_v22 = vcombine.low %v2001_v9, %v2004_v10  ;;  %v4820_v10 = vrot.slane %v4784_v4, 9  ;;  %v4795_v40 = vld [vmem:[%s6241_s9 + $0x8c] sm:$0x1] }
  0x78   : > { %v2016_v37 = vrot.slane %v2014_v12, 4  ;;  %v2015_v38 = vsel %vm6251_vm2, %v4816_v14, %v2014_v12  ;;  %v2045_v12 = vrot.slane %v4786_v60, 5 }
  0x7a   : > { %v2018_v39 = vsel %vm6251_vm2, %v2016_v37, %v2017_v24  ;;  %v4790_v37 = vld [vmem:[%s6241_s9 + $0x78] sm:$0xe]  ;;  %v4792_v24 = vld [vmem:[%s6241_s9 + $0x80] sm:$0x1] }
  0x7b   : > { %v4848_v54 = vcombine.low %v2015_v38, %v2018_v39  ;;  %v6026_v38 = vld [vmem:[%s8170_s1 + $0x198] sm:$0xff]  }
  0x7d   : > { %5530 = vmatmul.mubr.bf16.gmra.mxu1 %v4625_v29  ;;  %5578 = vmatmul.mubr.bf16.gmra.mxu0 %v4681_v31  ;;  %v4777_v29 = vld [vmem:[%s6241_s9 + $0x44] sm:$0x1]  ;;  %v2008_v31 = vsel %vm6251_vm2, %v4815_v20, %v2007_v6  ;;  %v6779_v20 = vld [vmem:[%s6241_s9 + $0x7c] sm:$0xf] }
  0x7e   : > { %5533 = vmatprep.mubr.bf16.mxu1 %v4626_v32  ;;  %5581 = vmatprep.mubr.bf16.mxu0 %v4682_v33  ;;  %v2011_v32 = vsel %vm6251_vm2, %v2009_v23, %v2010_v43  ;;  %v2028_v33 = vrot.slane %v6714_v26, 5  ;;  %v2024_v50 = vrot.slane %v4777_v29, 5  ;;  %v4789_v23 = vld [vmem:[%s6241_s9 + $0x74] sm:$0x1] }
  0x7f   : > { %v4847_v41 = vcombine.low %v2008_v31, %v2011_v32  ;;  %v2056_v31 = vrot.slane %v6779_v20, 5  ;;  %v6019_v32 = vld [vmem:[%s6241_s9 + $0x60] sm:$0xff]   ;;  %v2052_v35 = vrot.slane %v4789_v23, 5 }
  0x80   : > { %v2030_v52 = vrot.slane %v2028_v33, 4  ;;  %v2025_v58 = vsel %vm6251_vm2, %v2023_v59, %v2024_v50  ;;  %v2029_v62 = vsel %vm6251_vm2, %v4818_v48, %v2028_v33  ;;  %v6803_v59 = vld [vmem:[%s6241_s9 + $0x88] sm:$0xf]  ;;  %v6029_v48 = vld [vmem:[%s8170_s1 + $0x150] sm:$0xff]  }
  0x81   : > { %v2058_v50 = vrot.slane %v2056_v31, 4 }
  0x82   : > { %v2032_v63 = vsel %vm6251_vm2, %v2030_v52, %v2031_v53  ;;  %v6030_v52 = vld [vmem:[%s8170_s1 + $0x190] sm:$0xff]  }
  0x83   : > { %v4850_v28 = vcombine.low %v2029_v62, %v2032_v63  ;;  %v6033_v62 = vld [vmem:[%s8170_s1 + $0x148] sm:$0xff]  }
  0x85   : > { %5534 = vmatmul.mubr.bf16.gmra.mxu1 %v4627_v11  ;;  %5582 = vmatmul.mubr.bf16.gmra.mxu0 %v4683_v51  ;;  %v6743_v11 = vld [vmem:[%s6241_s9 + $0x64] sm:$0xf]  ;;  %v4783_v51 = vld [vmem:[%s6241_s9 + $0x5c] sm:$0x1] }
  0x86   : > { %5537 = vmatprep.mubr.bf16.mxu1 %v4628_v57  ;;  %5585 = vmatprep.mubr.bf16.mxu0 %v4684_v16  ;;  %v2022_v57 = vsel %vm6251_vm2, %v4817_v45, %v2021_v55  ;;  %v2035_v16 = vrot.slane %v6739_v56, 5  ;;  %v2042_v61 = vrot.slane %v6743_v11, 5  ;;  %v2038_v9 = vrot.slane %v4783_v51, 5 }
  0x87   : > { %v4849_v1 = vcombine.low %v2022_v57, %v2025_v58  ;;  %v2063_v51 = vrot.slane %v6803_v59, 5  ;;  %v4796_v57 = vld [vmem:[%s6241_s9 + $0x90] sm:$0xe]  ;;  %v4798_v58 = vld [vmem:[%s6241_s9 + $0x98] sm:$0x1] }
  0x88   : > { %v2037_v6 = vrot.slane %v2035_v16, 4  ;;  %v2044_v17 = vrot.slane %v2042_v61, 4  ;;  %v2036_v43 = vsel %vm6251_vm2, %v4819_v2, %v2035_v16  ;;  %v2043_v29 = vsel %vm6251_vm2, %v4820_v10, %v2042_v61  ;;  %v6020_v16 = vld [vmem:[%s6241_s9 + $0x6c] sm:$0xff]   ;;  %v6837_v10 = vld [vmem:[%s6241_s9 + $0xa0] sm:$0xf] }
  0x89   : > { %v2065_v2 = vrot.slane %v2063_v51, 4 }
  0x8a   : > { %v2039_v14 = vsel %vm6251_vm2, %v2037_v6, %v2038_v9  ;;  %v2046_v55 = vsel %vm6251_vm2, %v2044_v17, %v2045_v12  ;;  %v2073_v6 = vrot.slane %v4798_v58, 5  ;;  %v6840_v12 = vld [vmem:[%s6241_s9 + $0xac] sm:$0xf]  ;;  %v4799_v17 = vld [vmem:[%s6241_s9 + $0x9c] sm:$0xe] }
  0x8b   : > { %v4851_v39 = vcombine.low %v2036_v43, %v2039_v14  ;;  %v4852_v45 = vcombine.low %v2043_v29, %v2046_v55  ;;  %v2077_v43 = vrot.slane %v6837_v10, 5  ;;  %v2084_v14 = vrot.slane %v6840_v12, 5 }
  0x8d   : > { %5538 = vmatmul.mubr.bf16.gmra.mxu1 %v4629_v18  ;;  %5586 = vmatmul.mubr.bf16.gmra.mxu0 %v4685_v42  ;;  %v6021_v18 = vld [vmem:[%s8170_s1 + $0x160] sm:$0xff]   ;;  %v2049_v42 = vrot.slane %v6767_v49, 5 }
  0x8e   : > { %5605 = vmatprep.mubr.bf16.mxu1 %v6007_v19  ;;  %5653 = vmatprep.mubr.bf16.mxu0 %v4846_v22  ;;  %v6022_v19 = vld [vmem:[%s8170_s1 + $0x1a0] sm:$0xff]   ;;  %v4787_v22 = vld [vmem:[%s6241_s9 + $0x6c] sm:$0xe] }
  0x8f   : > { %v4821_v33 = vrot.slane %v4787_v22, 9  ;;  %v2051_v34 = vrot.slane %v2049_v42, 4 }
  0x91   : > { %v2050_v53 = vsel %vm6251_vm2, %v4821_v33, %v2049_v42  ;;  %v6037_v42 = vld [vmem:[%s8170_s1 + $0x140] sm:$0xff]   ;;  %v4825_v33 = vrot.slane %v4799_v17, 9  ;;  %v2498_v17 = vrot.slane %v6669_v46, 6 }
  0x92   : > { %v6035_v46 = vld [vmem:[%s6241_s9 + $0xc0] sm:$0xff]  }
  0x95   : > { %5606 = vmatmul.mubr.bf16.vlgmr.msra.gmra.mxu1 %v6008_v36  ;;  %5654 = vmatmul.mubr.bf16.vlgmr.msra.gmra.mxu0 %v4847_v41  ;;  %v6025_v36 = vld [vmem:[%s8170_s1 + $0x158] sm:$0xff]   ;;  %v4822_v41 = vrot.slane %v4790_v37, 9  ;;  %v4802_v37 = vld [vmem:[%s6241_s9 + $0xa8] sm:$0xe] }
  0x96   : > { %5686 = vmatpush3.bf16.msra.mxu1 %v6638_v8  ;;  %5734 = vmatpush3.bf16.msra.mxu0 %v6644_v13  ;;  %v6017_v8 = vld [vmem:[%s8170_s1 + $0x168] sm:$0xff]  }
  0x97   : > { %5609 = vmatprep.mubr.bf16.mxu1 %v6011_v44  ;;  %5657 = vmatprep.mubr.bf16.mxu0 %v4848_v54  ;;  %v6018_v13 = vld [vmem:[%s8170_s1 + $0x1a8] sm:$0xff]   ;;  %v2059_v44 = vrot.slane %v4792_v24, 5  ;;  %v2053_v54 = vsel %vm6251_vm2, %v2051_v34, %v2052_v35  ;;  %v2057_v4 = vsel %vm6251_vm2, %v4822_v41, %v2056_v31  ;;  %v4804_v24 = vld [vmem:[%s6241_s9 + $0xb0] sm:$0x1]  ;;  %v6867_v35 = vld [vmem:[%s8170_s1 + $0x1f8] sm:$0xff]   ;;  %v2086_v41 = vrot.slane %v2084_v14, 4 }
  0x98   : > { %5687 = vmatprep.subr.bf16.mxu1 %v6013_v47  ;;  %5735 = vmatprep.subr.bf16.mxu0 %v6014_v30  ;;  %v4853_v63 = vcombine.low %v2050_v53, %v2053_v54  ;;  %v2078_v53 = vsel %vm6251_vm2, %v4825_v33, %v2077_v43 }
  0x99   : > { %v2060_v60 = vsel %vm6251_vm2, %v2058_v50, %v2059_v44  ;;  %v2087_v44 = vrot.slane %v4804_v24, 5  ;;  %v6875_v50 = vld [vmem:[%s6241_s9 + $0xb8] sm:$0xf] }
  0x9a   : > { %5688 = vmatpush3.bf16.msra.mxu1 %v6013_v47  ;;  %5736 = vmatpush3.bf16.msra.mxu0 %v6014_v30  ;;  %v4793_v47 = vld [vmem:[%s6241_s9 + $0x84] sm:$0xe]  ;;  %v6807_v30 = vld [vmem:[%s6241_s9 + $0x94] sm:$0xf]  ;;  %v4854_v9 = vcombine.low %v2057_v4, %v2060_v60  ;;  %v4810_v4 = vld [vmem:[%s6241_s9 + $0xc8] sm:$0x1] }
  0x9b   : > { %5689 = vmatprep.subr.bf16.mxu1 %v6017_v8  ;;  %5737 = vmatprep.subr.bf16.mxu0 %v6018_v13  ;;  %v2070_v61 = vrot.slane %v6807_v30, 5  ;;  %v2088_v58 = vsel %vm6251_vm2, %v2086_v41, %v2087_v44  ;;  %v6028_v60 = vld [vmem:[%s6241_s9 + $0x9c] sm:$0xff]   ;;  %v6036_v44 = vld [vmem:[%s6241_s9 + $0xcc] sm:$0xff]  }
  0x9d   : > { %5610 = vmatmul.mubr.bf16.gmra.mxu1 %v6012_v25  ;;  %5658 = vmatmul.mubr.bf16.gmra.mxu0 %v4849_v1  ;;  %v6034_v1 = vld [vmem:[%s8170_s1 + $0x188] sm:$0xff]   ;;  %v2066_v25 = vrot.slane %v4795_v40, 5  ;;  %v2091_v40 = vrot.slane %v6875_v50, 5 }
  0x9e   : > { %5613 = vmatprep.mubr.bf16.mxu1 %v6015_v5  ;;  %5661 = vmatprep.mubr.bf16.mxu0 %v4850_v28  ;;  %v4824_v5 = vrot.slane %v4796_v57, 9  ;;  %v2072_v28 = vrot.slane %v2070_v61, 4 }
  0x9f   : > { %5690 = vmatpush3.bf16.msra.mxu1 %v6017_v8  ;;  %5738 = vmatpush3.bf16.msra.mxu0 %v6018_v13  ;;  %v6023_v8 = vld [vmem:[%s6241_s9 + $0x78] sm:$0xff]   ;;  %v4823_v13 = vrot.slane %v4793_v47, 9  ;;  %v2067_v23 = vsel %vm6251_vm2, %v2065_v2, %v2066_v25  ;;  %v6878_v47 = vld [vmem:[%s6241_s9 + $0xc4] sm:$0xf]  ;;  %v6899_v2 = vld [vmem:[%s6241_s9 + $0xd0] sm:$0xf] }
  0xa0   : > { %5691 = vmatprep.subr.bf16.mxu1 %v6021_v18  ;;  %5739 = vmatprep.subr.bf16.mxu0 %v6022_v19  ;;  %v2071_v29 = vsel %vm6251_vm2, %v4824_v5, %v2070_v61  ;;  %v2074_v55 = vsel %vm6251_vm2, %v2072_v28, %v2073_v6  ;;  %v2101_v6 = vrot.slane %v4810_v4, 5  ;;  %v2105_v28 = vrot.slane %v6899_v2, 5 }
  0xa1   : > { %v2064_v22 = vsel %vm6251_vm2, %v4823_v13, %v2063_v51  ;;  %v4808_v51 = vld [vmem:[%s6241_s9 + $0xc0] sm:$0xe]  ;;  %v2093_v13 = vrot.slane %v2091_v40, 4 }
  0xa2   : > { %v4855_v31 = vcombine.low %v2064_v22, %v2067_v23  ;;  %v4828_v25 = vrot.slane %v4808_v51, 9  ;;  %v4813_v23 = vld [vmem:[%s6241_s9 + $0xd4] sm:$0x1]  ;;  %v4874_v51 = vld [vmem:[%s6241_s9 + $0x30] sm:$0xc] }
  0xa3   : > { %5692 = vmatpush3.bf16.msra.mxu1 %v6021_v18  ;;  %5740 = vmatpush3.bf16.msra.mxu0 %v6022_v19  ;;  %v4801_v18 = vld [vmem:[%s6241_s9 + $0xa4] sm:$0x1]  ;;  %v2108_v33 = vrot.slane %v4813_v23, 5  ;;  %v6043_v23 = vld [vmem:[%s6241_s9 + $0x48] sm:$0xff]  }
  0xa4   : > { %5693 = vmatprep.subr.bf16.mxu1 %v6025_v36  ;;  %5741 = vmatprep.subr.bf16.mxu0 %v6026_v38  ;;  %v6038_v19 = vld [vmem:[%s8170_s1 + $0x180] sm:$0xff]   ;;  %v2080_v34 = vrot.slane %v4801_v18, 5 }
  0xa5   : > { %5614 = vmatmul.mubr.bf16.gmra.mxu1 %v6016_v27  ;;  %5662 = vmatmul.mubr.bf16.gmra.mxu0 %v4851_v39  ;;  %v6024_v27 = vld [vmem:[%s6241_s9 + $0x84] sm:$0xff]   ;;  %v4826_v39 = vrot.slane %v4802_v37, 9  ;;  %v6032_v37 = vld [vmem:[%s6241_s9 + $0xb4] sm:$0xff]  }
  0xa6   : > { %5617 = vmatprep.mubr.bf16.mxu1 %v6019_v32  ;;  %5665 = vmatprep.mubr.bf16.mxu0 %v4852_v45  ;;  %v6027_v32 = vld [vmem:[%s6241_s9 + $0x90] sm:$0xff]   ;;  %v4856_v45 = vcombine.low %v2071_v29, %v2074_v55  ;;  %v2500_v29 = vrot.slane %v2498_v17, 4  ;;  %v2505_v55 = vrot.slane %v6688_v0, 6 }
  0xa7   : > { %5694 = vmatpush3.bf16.msra.mxu1 %v6025_v36  ;;  %5742 = vmatpush3.bf16.msra.mxu0 %v6026_v38  ;;  %v6872_v36 = vld [vmem:[%s8170_s1 + $0x238] sm:$0xff]   ;;  %v2079_v38 = vrot.slane %v2077_v43, 4  ;;  %v2085_v57 = vsel %vm6251_vm2, %v4826_v39, %v2084_v14  ;;  %v4871_v14 = vld [vmem:[%s6241_s9 + $0x20] sm:$0x3] }
  0xa8   : > { %5695 = vmatprep.subr.bf16.mxu1 %v6029_v48  ;;  %5743 = vmatprep.subr.bf16.mxu0 %v6030_v52  ;;  %v4870_v43 = vld [vmem:[%s6241_s9 + $0x18] sm:$0xc]  ;;  %v2507_v41 = vrot.slane %v2505_v55, 4 }
  0xa9   : > { %v2081_v54 = vsel %vm6251_vm2, %v2079_v38, %v2080_v34  ;;  %v4902_v34 = vrot.slane %v4870_v43, 10  ;;  %v2501_v38 = vrot.slane %v4871_v14, 6 }
  0xaa   : > { %v4857_v61 = vcombine.low %v2078_v53, %v2081_v54  ;;  %v4873_v53 = vld [vmem:[%s6241_s9 + $0x2c] sm:$0x3]  ;;  %v2512_v54 = vrot.slane %v6693_v3, 6  ;;  %v2526_v3 = vrot.slane %v6714_v26, 6  ;;  %v6040_v26 = vld [vmem:[%s6241_s9 + $0x3c] sm:$0xff]  }
  0xab   : > { %5696 = vmatpush3.bf16.msra.mxu1 %v6029_v48  ;;  %5744 = vmatpush3.bf16.msra.mxu0 %v6030_v52  ;;  %v4805_v48 = vld [vmem:[%s6241_s9 + $0xb4] sm:$0xe]  ;;  %v4807_v52 = vld [vmem:[%s6241_s9 + $0xbc] sm:$0x1] }
  0xac   : > { %5697 = vmatprep.subr.bf16.mxu1 %v6033_v62  ;;  %5745 = vmatprep.subr.bf16.mxu0 %v6034_v1  ;;  %v2528_v14 = vrot.slane %v2526_v3, 4 }
  0xad   : > { %5618 = vmatmul.mubr.bf16.gmra.mxu1 %v6020_v16  ;;  %5666 = vmatmul.mubr.bf16.gmra.mxu0 %v4853_v63  ;;  %v2098_v16 = vrot.slane %v6878_v47, 5  ;;  %v4827_v63 = vrot.slane %v4805_v48, 9  ;;  %v2502_v48 = vsel %vm6463_vm5, %v2500_v29, %v2501_v38  ;;  %v4882_v38 = vld [vmem:[%s6241_s9 + $0x60] sm:$0xc] }
  0xae   : > { %5621 = vmatprep.mubr.bf16.mxu1 %v6023_v8  ;;  %5669 = vmatprep.mubr.bf16.mxu0 %v4854_v9  ;;  %v4858_v8 = vcombine.low %v2085_v57, %v2088_v58  ;;  %v4811_v9 = vld [vmem:[%s6241_s9 + $0xcc] sm:$0xe]  ;;  %v4875_v58 = vld [vmem:[%s6241_s9 + $0x38] sm:$0x3] }
  0xaf   : > { %5698 = vmatpush3.bf16.msra.mxu1 %v6033_v62  ;;  %5746 = vmatpush3.bf16.msra.mxu0 %v6034_v1  ;;  %v6031_v62 = vld [vmem:[%s6241_s9 + $0xa8] sm:$0xff]   ;;  %v2094_v1 = vrot.slane %v4807_v52, 5  ;;  %v2100_v5 = vrot.slane %v2098_v16, 4  ;;  %v2092_v18 = vsel %vm6251_vm2, %v4827_v63, %v2091_v40  ;;  %v4872_v52 = vld [vmem:[%s6241_s9 + $0x24] sm:$0xc]  ;;  %v6039_v40 = vld [vmem:[%s6241_s9 + $0x30] sm:$0xff]  }
  0xb0   : > { %5699 = vmatprep.subr.bf16.mxu1 %v6037_v42  ;;  %5747 = vmatprep.subr.bf16.mxu0 %v6038_v19  ;;  %v4903_v4 = vrot.slane %v4872_v52, 10  ;;  %v2515_v63 = vrot.slane %v4875_v58, 6 }
  0xb1   : > { %v2102_v22 = vsel %vm6251_vm2, %v2100_v5, %v2101_v6  ;;  %v4877_v5 = vld [vmem:[%s6241_s9 + $0x44] sm:$0x3]  ;;  %v4878_v6 = vld [vmem:[%s6241_s9 + $0x48] sm:$0xc] }
  0xb2   : > { %v4906_v43 = vrot.slane %v4878_v6, 10  ;;  %v6051_v6 = vld [vmem:[%s6241_s9 + $0x78] sm:$0xff]  }
  0xb3   : > { %5700 = vmatpush3.bf16.msra.mxu1 %v6037_v42  ;;  %5748 = vmatpush3.bf16.msra.mxu0 %v6038_v19  ;;  %v2095_v42 = vsel %vm6251_vm2, %v2093_v13, %v2094_v1  ;;  %v2099_v19 = vsel %vm6251_vm2, %v4828_v25, %v2098_v16  ;;  %v2519_v13 = vrot.slane %v6711_v21, 6  ;;  %v2506_v1 = vsel %vm6463_vm5, %v4903_v4, %v2505_v55  ;;  %v4879_v21 = vld [vmem:[%s6241_s9 + $0x50] sm:$0x3]  ;;  %v4880_v55 = vld [vmem:[%s6241_s9 + $0x54] sm:$0xc] }
  0xb4   : > { %5781 = vmatprep.subr.bf16.mxu1 %v6867_v35  ;;  %5829 = vmatprep.subr.bf16.mxu0 %v6872_v36  ;;  %v4859_v24 = vcombine.low %v2092_v18, %v2095_v42  ;;  %v2547_v4 = vrot.slane %v6767_v49, 6  ;;  %v6057_v49 = vld [vmem:[%s8170_s1 + $0x1d8] sm:$0xff]  }
  0xb5   : > { %5622 = vmatmul.mubr.bf16.gmra.mxu1 %v6024_v27  ;;  %5670 = vmatmul.mubr.bf16.gmra.mxu0 %v4855_v31  ;;  %v4829_v27 = vrot.slane %v4811_v9, 9  ;;  %v4860_v31 = vcombine.low %v2099_v19, %v2102_v22  ;;  %v2521_v42 = vrot.slane %v2519_v13, 4  ;;  %v2522_v19 = vrot.slane %v4877_v5, 6 }
  0xb6   : > { %5625 = vmatprep.mubr.bf16.mxu1 %v6027_v32  ;;  %5673 = vmatprep.mubr.bf16.mxu0 %v4856_v45  ;;  %v2107_v32 = vrot.slane %v2105_v28, 4  ;;  %v2499_v45 = vsel %vm6463_vm5, %v4902_v34, %v2498_v17  ;;  %v6050_v34 = vld [vmem:[%s8170_s1 + $0x228] sm:$0xff]  }
  0xb7   : > { %v2106_v39 = vsel %vm6251_vm2, %v4829_v27, %v2105_v28  ;;  %v4934_v16 = vcombine.low %v2499_v45, %v2502_v48  ;;  %v2523_v29 = vsel %vm6463_vm5, %v2521_v42, %v2522_v19  ;;  %v6047_v45 = vld [vmem:[%s6241_s9 + $0x60] sm:$0xff]   ;;  %v4907_v48 = vrot.slane %v4880_v55, 10  ;;  %v6061_v42 = vld [vmem:[%s8170_s1 + $0x1d0] sm:$0xff]   ;;  %v6065_v55 = vld [vmem:[%s8170_s1 + $0x1c8] sm:$0xff]  }
  0xb8   : > { %v2109_v0 = vsel %vm6251_vm2, %v2107_v32, %v2108_v33  ;;  %v4881_v32 = vld [vmem:[%s6241_s9 + $0x5c] sm:$0x3]  ;;  %v6049_v33 = vld [vmem:[%s8170_s1 + $0x1e8] sm:$0xff]   ;;  %v6062_v19 = vld [vmem:[%s8170_s1 + $0x210] sm:$0xff]  }
  0xb9   : > { %v4861_v57 = vcombine.low %v2106_v39, %v2109_v0  ;;  %v4883_v39 = vld [vmem:[%s6241_s9 + $0x68] sm:$0x3] }
  0xbd   : > { %5626 = vmatmul.mubr.bf16.gmra.mxu1 %v6028_v60  ;;  %5674 = vmatmul.mubr.bf16.gmra.mxu0 %v4857_v61  ;;  %v2508_v60 = vrot.slane %v4873_v53, 6  ;;  %v4904_v61 = vrot.slane %v4874_v51, 10  ;;  %v2536_v53 = vrot.slane %v4881_v32, 6  ;;  %v2543_v51 = vrot.slane %v4883_v39, 6 }
  0xbe   : > { %5629 = vmatprep.mubr.bf16.mxu1 %v6031_v62  ;;  %5677 = vmatprep.mubr.bf16.mxu0 %v4858_v8  ;;  %v2514_v62 = vrot.slane %v2512_v54, 4  ;;  %v4876_v8 = vld [vmem:[%s6241_s9 + $0x3c] sm:$0xc] }
  0xbf   : > { %v2509_v25 = vsel %vm6463_vm5, %v2507_v41, %v2508_v60  ;;  %v2513_v9 = vsel %vm6463_vm5, %v4904_v61, %v2512_v54  ;;  %v4905_v18 = vrot.slane %v4876_v8, 10  ;;  %v6044_v41 = vld [vmem:[%s6241_s9 + $0x54] sm:$0xff]   ;;  %v4908_v54 = vrot.slane %v4882_v38, 10 }
  0xc0   : > { %v2516_v28 = vsel %vm6463_vm5, %v2514_v62, %v2515_v63  ;;  %v4935_v17 = vcombine.low %v2506_v1, %v2509_v25  ;;  %v2554_v60 = vrot.slane %v6779_v20, 6  ;;  %v4884_v63 = vld [vmem:[%s6241_s9 + $0x6c] sm:$0xc]  ;;  %v4885_v8 = vld [vmem:[%s6241_s9 + $0x74] sm:$0x3]  ;;  %v6058_v20 = vld [vmem:[%s8170_s1 + $0x218] sm:$0xff]  }
  0xc1   : > { %v4936_v22 = vcombine.low %v2513_v9, %v2516_v28  ;;  %v2520_v27 = vsel %vm6463_vm5, %v4905_v18, %v2519_v13  ;;  %v4886_v13 = vld [vmem:[%s6241_s9 + $0x78] sm:$0xc]  ;;  %v6048_v25 = vld [vmem:[%s6241_s9 + $0x6c] sm:$0xff]   ;;  %v4909_v9 = vrot.slane %v4884_v63, 10  ;;  %v2549_v28 = vrot.slane %v2547_v4, 4 }
  0xc2   : > { %v4937_v0 = vcombine.low %v2520_v27, %v2523_v29  ;;  %v2568_v27 = vrot.slane %v6807_v30, 6  ;;  %v4891_v29 = vld [vmem:[%s6241_s9 + $0x98] sm:$0x3]  ;;  %v6055_v38 = vld [vmem:[%s6241_s9 + $0x90] sm:$0xff]   ;;  %v6059_v63 = vld [vmem:[%s6241_s9 + $0xa8] sm:$0xff]  }
  0xc4   : > { %v2570_v39 = vrot.slane %v2568_v27, 4 }
  0xc5   : > { %5630 = vmatmul.mubr.bf16.gmra.mxu1 %v6032_v37  ;;  %5678 = vmatmul.mubr.bf16.gmra.mxu0 %v4859_v24  ;;  %v2529_v37 = vrot.slane %v4879_v21, 6  ;;  %v6045_v24 = vld [vmem:[%s8170_s1 + $0x1f0] sm:$0xff]   ;;  %v2550_v21 = vrot.slane %v4885_v8, 6 }
  0xc6   : > { %5633 = vmatprep.mubr.bf16.mxu1 %v6035_v46  ;;  %5681 = vmatprep.mubr.bf16.mxu0 %v4860_v31  ;;  %v6046_v46 = vld [vmem:[%s8170_s1 + $0x230] sm:$0xff]   ;;  %v2533_v31 = vrot.slane %v6739_v56, 6  ;;  %v2540_v56 = vrot.slane %v6743_v11, 6  ;;  %v6053_v11 = vld [vmem:[%s8170_s1 + $0x1e0] sm:$0xff]  }
  0xc8   : > { %v2535_v52 = vrot.slane %v2533_v31, 4  ;;  %v2534_v58 = vsel %vm6463_vm5, %v4907_v48, %v2533_v31  ;;  %v2541_v61 = vsel %vm6463_vm5, %v4908_v54, %v2540_v56  ;;  %v6066_v31 = vld [vmem:[%s8170_s1 + $0x208] sm:$0xff]   ;;  %v4893_v54 = vld [vmem:[%s6241_s9 + $0xa4] sm:$0x3] }
  0xcd   : > { %5634 = vmatmul.mubr.bf16.gmra.mxu1 %v6036_v44  ;;  %5682 = vmatmul.mubr.bf16.gmra.mxu0 %v4861_v57  ;;  %v6054_v57 = vld [vmem:[%s8170_s1 + $0x220] sm:$0xff]  }
  0xce   : > { %5701 = vmatprep.mubr.bf16.mxu1 %v4934_v16  ;;  %5749 = vmatprep.mubr.bf16.mxu0 %v6039_v40  ;;  %v2542_v40 = vrot.slane %v2540_v56, 4  ;;  %v2537_v16 = vsel %vm6463_vm5, %v2535_v52, %v2536_v53  ;;  %v4892_v52 = vld [vmem:[%s6241_s9 + $0x9c] sm:$0xc]  ;;  %v2575_v53 = vrot.slane %v6837_v10, 6 }
  0xcf   : > { %v4939_v1 = vcombine.low %v2534_v58, %v2537_v16  ;;  %v4895_v58 = vld [vmem:[%s6241_s9 + $0xb0] sm:$0x3]  ;;  %v6056_v10 = vld [vmem:[%s6241_s9 + $0x9c] sm:$0xff]  }
  0xd0   : > { %v2544_v62 = vsel %vm6463_vm5, %v2542_v40, %v2543_v51  ;;  %v4894_v40 = vld [vmem:[%s6241_s9 + $0xa8] sm:$0xc]  ;;  %v2582_v51 = vrot.slane %v6840_v12, 6 }
  0xd1   : > { %v4940_v5 = vcombine.low %v2541_v61, %v2544_v62  ;;  %v2578_v61 = vrot.slane %v4893_v54, 6  ;;  %v4914_v62 = vrot.slane %v4894_v40, 10 }
  0xd2   : > { %v2584_v8 = vrot.slane %v2582_v51, 4 }
  0xd5   : > { %5702 = vmatmul.mubr.bf16.vlgmr.msra.gmra.mxu1 %v4935_v17  ;;  %5750 = vmatmul.mubr.bf16.vlgmr.msra.gmra.mxu0 %v6040_v26  ;;  %v4910_v17 = vrot.slane %v4886_v13, 10  ;;  %v2556_v26 = vrot.slane %v2554_v60, 4  ;;  %v2585_v13 = vrot.slane %v4895_v58, 6  ;;  %v5035_v58 = vld [vmem:[%s6241_s9 + $0x44] sm:$0x1] }
  0xd6   : > { %5782 = vmatpush3.bf16.msra.mxu1 %v6867_v35  ;;  %5830 = vmatpush3.bf16.msra.mxu0 %v6872_v36  ;;  %v2527_v35 = vsel %vm6463_vm5, %v4906_v43, %v2526_v3  ;;  %v2530_v36 = vsel %vm6463_vm5, %v2528_v14, %v2529_v37  ;;  %v4887_v3 = vld [vmem:[%s6241_s9 + $0x80] sm:$0x3]  ;;  %v2551_v43 = vsel %vm6463_vm5, %v2549_v28, %v2550_v21  ;;  %v4888_v14 = vld [vmem:[%s6241_s9 + $0x84] sm:$0xc]  ;;  %v4889_v37 = vld [vmem:[%s6241_s9 + $0x8c] sm:$0x3] }
  0xd7   : > { %5705 = vmatprep.mubr.bf16.mxu1 %v4936_v22  ;;  %5753 = vmatprep.mubr.bf16.mxu0 %v6043_v23  ;;  %v4938_v44 = vcombine.low %v2527_v35, %v2530_v36  ;;  %v2557_v18 = vrot.slane %v4887_v3, 6  ;;  %v2561_v22 = vrot.slane %v6803_v59, 6  ;;  %v2548_v23 = vsel %vm6463_vm5, %v4909_v9, %v2547_v4  ;;  %v4890_v59 = vld [vmem:[%s6241_s9 + $0x90] sm:$0xc]  ;;  %v6052_v36 = vld [vmem:[%s6241_s9 + $0x84] sm:$0xff]  }
  0xd8   : > { %5783 = vmatprep.subr.bf16.mxu1 %v6045_v24  ;;  %5831 = vmatprep.subr.bf16.mxu0 %v6046_v46  ;;  %v4941_v35 = vcombine.low %v2548_v23, %v2551_v43  ;;  %v4911_v32 = vrot.slane %v4888_v14, 10  ;;  %v4912_v30 = vrot.slane %v4890_v59, 10  ;;  %v4913_v4 = vrot.slane %v4892_v52, 10  ;;  %v7080_v23 = vld [vmem:[%s6241_s9 + $0xcc] sm:$0xc] }
  0xd9   : > { %v2589_v3 = vrot.slane %v6875_v50, 6  ;;  %v2586_v9 = vsel %vm6463_vm5, %v2584_v8, %v2585_v13  ;;  %v7083_v43 = vld [vmem:[%s6241_s9 + $0xd4] sm:$0x3]  ;;  %v5135_v52 = vld [vmem:[%s6241_s9 + $0x38] sm:$0x3]  ;;  %v6064_v13 = vld [vmem:[%s6241_s9 + $0xcc] sm:$0xff]  }
  0xda   : > { %5784 = vmatpush3.bf16.msra.mxu1 %v6045_v24  ;;  %5832 = vmatpush3.bf16.msra.mxu0 %v6046_v46  ;;  %v2555_v24 = vsel %vm6463_vm5, %v4910_v17, %v2554_v60  ;;  %v2558_v46 = vsel %vm6463_vm5, %v2556_v26, %v2557_v18  ;;  %v2577_v60 = vrot.slane %v2575_v53, 4  ;;  %v7139_v8 = vld [vmem:[%s6241_s9 + $0x4c] sm:$0xf] }
  0xdb   : > { %5785 = vmatprep.subr.bf16.mxu1 %v6049_v33  ;;  %5833 = vmatprep.subr.bf16.mxu0 %v6050_v34  ;;  %v4942_v56 = vcombine.low %v2555_v24, %v2558_v46  ;;  %v2591_v21 = vrot.slane %v2589_v3, 4  ;;  %v6060_v46 = vld [vmem:[%s6241_s9 + $0xb4] sm:$0xff]  }
  0xdc   : > { %v2579_v50 = vsel %vm6463_vm5, %v2577_v60, %v2578_v61 }
  0xdd   : > { %5706 = vmatmul.mubr.bf16.gmra.mxu1 %v4937_v0  ;;  %5754 = vmatmul.mubr.bf16.gmra.mxu0 %v6044_v41  ;;  %v2571_v0 = vrot.slane %v4891_v29, 6  ;;  %v6069_v41 = vld [vmem:[%s8170_s1 + $0x1c0] sm:$0xff]  }
  0xde   : > { %5709 = vmatprep.mubr.bf16.mxu1 %v4938_v44  ;;  %5757 = vmatprep.mubr.bf16.mxu0 %v6047_v45  ;;  %v6070_v44 = vld [vmem:[%s8170_s1 + $0x200] sm:$0xff]   ;;  %v2562_v45 = vsel %vm6463_vm5, %v4911_v32, %v2561_v22 }
  0xdf   : > { %5786 = vmatpush3.bf16.msra.mxu1 %v6049_v33  ;;  %5834 = vmatpush3.bf16.msra.mxu0 %v6050_v34  ;;  %v2563_v33 = vrot.slane %v2561_v22, 4  ;;  %v2564_v34 = vrot.slane %v4889_v37, 6  ;;  %v4899_v22 = vld [vmem:[%s6241_s9 + $0xc8] sm:$0x3]  ;;  %v6063_v29 = vld [vmem:[%s6241_s9 + $0xc0] sm:$0xff]  }
  0xe0   : > { %5787 = vmatprep.subr.bf16.mxu1 %v6053_v11  ;;  %5835 = vmatprep.subr.bf16.mxu0 %v6054_v57 }
  0xe1   : > { %v2565_v48 = vsel %vm6463_vm5, %v2563_v33, %v2564_v34 }
  0xe2   : > { %v4943_v16 = vcombine.low %v2562_v45, %v2565_v48 }
  0xe3   : > { %5788 = vmatpush3.bf16.msra.mxu1 %v6053_v11  ;;  %5836 = vmatpush3.bf16.msra.mxu0 %v6054_v57  ;;  %v2569_v11 = vsel %vm6463_vm5, %v4912_v30, %v2568_v27  ;;  %v2572_v57 = vsel %vm6463_vm5, %v2570_v39, %v2571_v0  ;;  %v7091_v27 = vld [vmem:[%s6241_s9 + $0x34] sm:$0xf]  ;;  %v2606_v30 = vrot.slane %v7083_v43, 6  ;;  %v5030_v39 = vld [vmem:[%s6241_s9 + $0x30] sm:$0xe] }
  0xe4   : > { %5789 = vmatprep.subr.bf16.mxu1 %v6057_v49  ;;  %5837 = vmatprep.subr.bf16.mxu0 %v6058_v20  ;;  %v4944_v12 = vcombine.low %v2569_v11, %v2572_v57  ;;  %v5032_v0 = vld [vmem:[%s6241_s9 + $0x38] sm:$0x1]  ;;  %v5078_v57 = vrot.slane %v5030_v39, 9  ;;  %v7149_v43 = vld [vmem:[%s6241_s9 + $0x50] sm:$0x1] }
  0xe5   : > { %5710 = vmatmul.mubr.bf16.gmra.mxu1 %v4939_v1  ;;  %5758 = vmatmul.mubr.bf16.gmra.mxu0 %v6048_v25 }
  0xe6   : > { %5713 = vmatprep.mubr.bf16.mxu1 %v4940_v5  ;;  %5761 = vmatprep.mubr.bf16.mxu0 %v6051_v6  ;;  %v2576_v5 = vsel %vm6463_vm5, %v4913_v4, %v2575_v53  ;;  %v2583_v6 = vsel %vm6463_vm5, %v4914_v62, %v2582_v51  ;;  %v5033_v53 = vld [vmem:[%s6241_s9 + $0x3c] sm:$0xe]  ;;  %v3421_v62 = vrot.slane %v5032_v0, 5 }
  0xe7   : > { %5790 = vmatpush3.bf16.msra.mxu1 %v6057_v49  ;;  %5838 = vmatpush3.bf16.msra.mxu0 %v6058_v20  ;;  %v4896_v49 = vld [vmem:[%s6241_s9 + $0xb4] sm:$0xc]  ;;  %v4897_v20 = vld [vmem:[%s6241_s9 + $0xbc] sm:$0x3]  ;;  %v4945_v24 = vcombine.low %v2576_v5, %v2579_v50  ;;  %v4946_v59 = vcombine.low %v2583_v6, %v2586_v9  ;;  %v3919_v5 = vrot.slane %v5135_v52, 6  ;;  %v5079_v50 = vrot.slane %v5033_v53, 9 }
  0xe8   : > { %5791 = vmatprep.subr.bf16.mxu1 %v6061_v42  ;;  %5839 = vmatprep.subr.bf16.mxu0 %v6062_v19  ;;  %v4915_v28 = vrot.slane %v4896_v49, 10  ;;  %v2592_v17 = vrot.slane %v4897_v20, 6  ;;  %v7200_v53 = vld [vmem:[%s6241_s9 + $0x64] sm:$0xf] }
  0xeb   : > { %5792 = vmatpush3.bf16.msra.mxu1 %v6061_v42  ;;  %5840 = vmatpush3.bf16.msra.mxu0 %v6062_v19  ;;  %v4898_v42 = vld [vmem:[%s6241_s9 + $0xc0] sm:$0xc]  ;;  %v2596_v19 = vrot.slane %v6878_v47, 6  ;;  %v7096_v47 = vsel %vm6463_vm5, %v4915_v28, %v2589_v3  ;;  %v6067_v3 = vld [vmem:[%s6241_s9 + $0xd8] sm:$0xff]  }
  0xec   : > { %5793 = vmatprep.subr.bf16.mxu1 %v6065_v55  ;;  %5841 = vmatprep.subr.bf16.mxu0 %v6066_v31 }
  0xed   : > { %5714 = vmatmul.mubr.bf16.gmra.mxu1 %v4941_v35  ;;  %5762 = vmatmul.mubr.bf16.gmra.mxu0 %v6052_v36  ;;  %v2603_v35 = vrot.slane %v6899_v2, 6  ;;  %v7104_v36 = vld [vmem:[%s6241_s9 + $0x40] sm:$0xf]  ;;  %v2598_v34 = vrot.slane %v2596_v19, 4  ;;  %v5134_v2 = vld [vmem:[%s6241_s9 + $0x30] sm:$0xc] }
  0xee   : > { %5717 = vmatprep.mubr.bf16.mxu1 %v4942_v56  ;;  %5765 = vmatprep.mubr.bf16.mxu0 %v6055_v38  ;;  %v2599_v56 = vrot.slane %v4899_v22, 6  ;;  %v4917_v38 = vrot.slane %v7080_v23, 10  ;;  %v3425_v54 = vrot.slane %v7104_v36, 5  ;;  %v3923_v40 = vrot.slane %v7104_v36, 6  ;;  %v7174_v36 = vld [vmem:[%s6241_s9 + $0x58] sm:$0xf] }
  0xef   : > { %5794 = vmatpush3.bf16.msra.mxu1 %v6065_v55  ;;  %5842 = vmatpush3.bf16.msra.mxu0 %v6066_v31  ;;  %v7100_v55 = vsel %vm6463_vm5, %v2591_v21, %v2592_v17  ;;  %v4916_v31 = vrot.slane %v4898_v42, 10  ;;  %v2605_v11 = vrot.slane %v2603_v35, 4  ;;  %v3428_v21 = vrot.slane %v5035_v58, 5  ;;  %v5041_v58 = vld [vmem:[%s6241_s9 + $0x5c] sm:$0x1] }
  0xf0   : > { %5795 = vmatprep.subr.bf16.mxu1 %v6069_v41  ;;  %5843 = vmatprep.subr.bf16.mxu0 %v6070_v44  ;;  %v4947_v51 = vcombine.low %v7096_v47, %v7100_v55  ;;  %v2600_v61 = vsel %vm6463_vm5, %v2598_v34, %v2599_v56  ;;  %v3427_v28 = vrot.slane %v3425_v54, 4  ;;  %v3925_v42 = vrot.slane %v3923_v40, 4 }
  0xf1   : > { %v2597_v60 = vsel %vm6463_vm5, %v4916_v31, %v2596_v19  ;;  %v5036_v19 = vld [vmem:[%s6241_s9 + $0x48] sm:$0xe]  ;;  %v7163_v47 = vsel %vm6463_vm5, %v2605_v11, %v2606_v30  ;;  %v7186_v56 = vsel %vm6251_vm2, %v5079_v50, %v3425_v54  ;;  %v3930_v30 = vrot.slane %v7139_v8, 6 }
  0xf2   : > { %v4948_v22 = vcombine.low %v2597_v60, %v2600_v61  ;;  %v3446_v50 = vrot.slane %v7200_v53, 5 }
  0xf3   : > { %5796 = vmatpush3.bf16.msra.mxu1 %v6069_v41  ;;  %5844 = vmatpush3.bf16.msra.mxu0 %v6070_v44  ;;  %v3418_v41 = vrot.slane %v7091_v27, 5  ;;  %v3916_v44 = vrot.slane %v7091_v27, 6 }
  0xf5   : > { %v7060_v1 = vpop.f32.mrf.mxu0  ;;  %v7062_v25 = vpop.f32.mrf.mxu1  ;;  %5718 = vmatmul.mubr.bf16.gmra.mxu1 %v4943_v16  ;;  %5766 = vmatmul.mubr.bf16.gmra.mxu0 %v6056_v10  ;;  %v5136_v16 = vld [vmem:[%s6241_s9 + $0x3c] sm:$0xc]  ;;  %v3420_v49 = vrot.slane %v3418_v41, 4  ;;  %v3918_v20 = vrot.slane %v3916_v44, 4  ;;  %v7167_v55 = vsel %vm6251_vm2, %v5078_v57, %v3418_v41  ;;  %v7196_v41 = vsel %vm6251_vm2, %v3427_v28, %v3428_v21  ;;  %v5039_v57 = vld [vmem:[%s6241_s9 + $0x54] sm:$0xe] }
  0xf6   : > { %5721 = vmatprep.mubr.bf16.mxu1 %v4944_v12  ;;  %5769 = vmatprep.mubr.bf16.mxu0 %v6059_v63  ;;  %v5166_v12 = vrot.slane %v5134_v2, 10  ;;  %v5137_v63 = vld [vmem:[%s6241_s9 + $0x44] sm:$0x3]  ;;  %v5167_v17 = vrot.slane %v5136_v16, 10  ;;  %v5080_v2 = vrot.slane %v5036_v19, 9  ;;  %v3439_v16 = vrot.slane %v7174_v36, 5 }
  0xf7   : > { %v7072_v26 = vpop.f32.mrf.mxu0  ;;  %v7074_v18 = vpop.f32.mrf.mxu1  ;;  %v3926_v23 = vrot.slane %v5137_v63, 6  ;;  %v7178_v34 = vsel %vm6251_vm2, %v3420_v49, %v3421_v62  ;;  %v5140_v63 = vld [vmem:[%s6241_s9 + $0x54] sm:$0xc]  ;;  %v5142_v28 = vld [vmem:[%s6241_s9 + $0x60] sm:$0xc] }
  0xf8   : > { %v7171_v31 = vsel %vm6463_vm5, %v5166_v12, %v3916_v44  ;;  %v3435_v44 = vrot.slane %v7149_v43, 5  ;;  %v7204_v54 = vsel %vm6463_vm5, %v5167_v17, %v3923_v40  ;;  %v5110_v62 = vcombine.low %v7167_v55, %v7178_v34  ;;  %v5044_v43 = vld [vmem:[%s6241_s9 + $0x68] sm:$0x1]  ;;  %v7250_v34 = vld [vmem:[%s6241_s9 + $0x70] sm:$0xf] }
  0xf9   : > { %v7085_v14 = vpop.f32.mrf.mxu0  ;;  %v7087_v37 = vpop.f32.mrf.mxu1  ;;  %v3441_v55 = vrot.slane %v3439_v16, 4  ;;  %v3449_v19 = vrot.slane %v5044_v43, 5  ;;  %v5047_v49 = vld [vmem:[%s6241_s9 + $0x74] sm:$0x1] }
  0xfb   : > { %v7106_v32 = vpop.f32.mrf.mxu0  ;;  %v7108_v33 = vpop.f32.mrf.mxu1 }
  0xfd   : > { %v7117_v45 = vpop.f32.mrf.mxu0  ;;  %v7119_v48 = vpop.f32.mrf.mxu1  ;;  %5722 = vmatmul.mubr.bf16.gmra.mxu1 %v4945_v24  ;;  %5770 = vmatmul.mubr.bf16.gmra.mxu0 %v6060_v46  ;;  %v3432_v24 = vrot.slane %v7139_v8, 5  ;;  %v5138_v46 = vld [vmem:[%s6241_s9 + $0x48] sm:$0xc]  ;;  %v5141_v8 = vld [vmem:[%s6241_s9 + $0x5c] sm:$0x3] }
  0xfe   : > { %8179 = vst [vmem:[#allocation5_spill] sm:$0xff] %v7119_v48  ;;  %5725 = vmatprep.mubr.bf16.mxu1 %v4946_v59  ;;  %5773 = vmatprep.mubr.bf16.mxu0 %v6063_v29  ;;  %v7159_v29 = vsel %vm6463_vm5, %v4917_v38, %v2603_v35  ;;  %v7182_v35 = vsel %vm6463_vm5, %v3918_v20, %v3919_v5  ;;  %v5139_v38 = vld [vmem:[%s6241_s9 + $0x50] sm:$0x3]  ;;  %v5168_v52 = vrot.slane %v5138_v46, 10  ;;  %v3932_v20 = vrot.slane %v3930_v30, 4 }
  0xff   : > { %v7129_v10 = vpop.f32.mrf.mxu0  ;;  %v7131_v4 = vpop.f32.mrf.mxu1  ;;  %v3434_v11 = vrot.slane %v3432_v24, 4  ;;  %v4949_v40 = vcombine.low %v7159_v29, %v7163_v47  ;;  %v3933_v12 = vrot.slane %v5139_v38, 6  ;;  %v5042_v5 = vld [vmem:[%s6241_s9 + $0x60] sm:$0xe]  ;;  %v3944_v46 = vrot.slane %v7200_v53, 6 }
 0x100   : > { %8180 = vst [vmem:[#allocation6_spill] sm:$0xff] %v7131_v4  ;;  %v7242_v29 = vsel %vm6251_vm2, %v5080_v2, %v3432_v24  ;;  %v7246_v47 = vsel %vm6463_vm5, %v5168_v52, %v3930_v30  ;;  %v5170_v24 = vrot.slane %v5142_v28, 10  ;;  %v5045_v2 = vld [vmem:[%s6241_s9 + $0x6c] sm:$0xe] }
 0x101   : > { %v7143_v6 = vpop.f32.mrf.mxu0  ;;  %v7145_v9 = vpop.f32.mrf.mxu1  ;;  %v7259_v30 = vsel %vm6251_vm2, %v3434_v11, %v3435_v44  ;;  %v7263_v52 = vsel %vm6463_vm5, %v3932_v20, %v3933_v12  ;;  %v3453_v11 = vrot.slane %v7250_v34, 5  ;;  %v5144_v28 = vld [vmem:[%s6241_s9 + $0x6c] sm:$0xc]  ;;  %v3951_v12 = vrot.slane %v7250_v34, 6 }
 0x102   : > { %8181 = vst [vmem:[#allocation7_spill] sm:$0xff] %v7145_v9  ;;  %v5171_v34 = vrot.slane %v5144_v28, 10 }
 0x103   : > { %v7153_v59 = vpop.f32.mrf.mxu0  ;;  %v7155_v27 = vpop.f32.mrf.mxu1 }
 0x104   : > { %8182 = vst [vmem:[#allocation8_spill] sm:$0xff] %v7155_v27 }
 0x105   : > { %v7190_v39 = vpop.f32.mrf.mxu0  ;;  %v7192_v0 = vpop.f32.mrf.mxu1  ;;  %5726 = vmatmul.mubr.bf16.gmra.mxu1 %v4947_v51  ;;  %5774 = vmatmul.mubr.bf16.gmra.mxu0 %v6064_v13  ;;  %v7208_v51 = vsel %vm6463_vm5, %v3925_v42, %v3926_v23  ;;  %v3937_v13 = vrot.slane %v7174_v36, 6  ;;  %v6068_v42 = vld [vmem:[%s6241_s9 + $0xe4] sm:$0xff]   ;;  %v3442_v23 = vrot.slane %v5041_v58, 5  ;;  %v5082_v58 = vrot.slane %v5042_v5, 9 }
 0x106   : > { %8183 = vst [vmem:[#allocation9_spill] sm:$0xff] %v7192_v0  ;;  %5729 = vmatprep.mubr.bf16.mxu1 %v4948_v22  ;;  %5777 = vmatprep.mubr.bf16.mxu0 %v6067_v3  ;;  %v5198_v3 = vcombine.low %v7171_v31, %v7182_v35  ;;  %v5081_v22 = vrot.slane %v5039_v57, 9  ;;  %v5169_v31 = vrot.slane %v5140_v63, 10  ;;  %v5143_v36 = vld [vmem:[%s6241_s9 + $0x68] sm:$0x3]  ;;  %v3940_v57 = vrot.slane %v5141_v8, 6 }
 0x107   : > { %v7213_v60 = vpop.f32.mrf.mxu0  ;;  %v7215_v61 = vpop.f32.mrf.mxu1  ;;  %v3939_v53 = vrot.slane %v3937_v13, 4  ;;  %v3448_v63 = vrot.slane %v3446_v50, 4  ;;  %v3946_v5 = vrot.slane %v3944_v46, 4  ;;  %v3947_v44 = vrot.slane %v5143_v36, 6  ;;  %v5147_v0 = vld [vmem:[%s6241_s9 + $0x80] sm:$0x3] }
 0x108   : > { %8184 = vst [vmem:[#allocation10_spill] sm:$0xff] %v7215_v61  ;;  %v7278_v20 = vsel %vm6251_vm2, %v5081_v22, %v3439_v16  ;;  %v7282_v43 = vsel %vm6251_vm2, %v3441_v55, %v3442_v23  ;;  %v7299_v16 = vsel %vm6251_vm2, %v5082_v58, %v3446_v50  ;;  %v5048_v22 = vld [vmem:[%s6241_s9 + $0x78] sm:$0xe]  ;;  %v5083_v55 = vrot.slane %v5045_v2, 9 }
 0x109   : > { %v7231_v21 = vpop.f32.mrf.mxu0  ;;  %v7233_v17 = vpop.f32.mrf.mxu1  ;;  %v7309_v23 = vsel %vm6251_vm2, %v3448_v63, %v3449_v19  ;;  %v3455_v58 = vrot.slane %v3453_v11, 4  ;;  %v5112_v19 = vcombine.low %v7242_v29, %v7259_v30  ;;  %v5084_v2 = vrot.slane %v5048_v22, 9  ;;  %v5146_v63 = vld [vmem:[%s6241_s9 + $0x78] sm:$0xc]  ;;  %v7345_v22 = vld [vmem:[%s6241_s9 + $0x88] sm:$0xf] }
 0x10a   : > { %8185 = vst [vmem:[#allocation11_spill] sm:$0xff] %v7233_v17  ;;  %v7267_v17 = vld [vmem:[%s6241_s9 + $0x7c] sm:$0xf]  ;;  %v7341_v30 = vsel %vm6251_vm2, %v5083_v55, %v3453_v11  ;;  %v7359_v11 = vsel %vm6463_vm5, %v5171_v34, %v3951_v12 }
 0x10b   : > { %v7252_v35 = vpop.f32.mrf.mxu0  ;;  %v7254_v38 = vpop.f32.mrf.mxu1  ;;  %v3958_v28 = vrot.slane %v7267_v17, 6 }
 0x10c   : > { %8186 = vst [vmem:[#allocation12_spill] sm:$0xff] %v7254_v38 }
 0x10d   : > { %v7269_v38 = vpop.f32.mrf.mxu0  ;;  %v7271_v8 = vpop.f32.mrf.mxu1  ;;  %5730 = vmatmul.mubr.bf16.gmra.mxu1 %v4949_v40  ;;  %5778 = vmatmul.mubr.bf16.gmra.mxu0 %v6068_v42  ;;  %v7286_v40 = vsel %vm6463_vm5, %v5169_v31, %v3937_v13  ;;  %v5145_v42 = vld [vmem:[%s6241_s9 + $0x74] sm:$0x3]  ;;  %v3460_v13 = vrot.slane %v7267_v17, 5  ;;  %v3456_v31 = vrot.slane %v5047_v49, 5  ;;  %v5200_v49 = vcombine.low %v7246_v47, %v7263_v52  ;;  %v5051_v52 = vld [vmem:[%s6241_s9 + $0x84] sm:$0xe] }
 0x10e   : > { %8187 = vst [vmem:[#allocation13_spill] sm:$0xff] %v7271_v8  ;;  %5797 = vmatprep.mubr.bf16.mxu1 %v5110_v62  ;;  %5845 = vmatprep.mubr.bf16.mxu0 %v5198_v3  ;;  %v7295_v62 = vsel %vm6463_vm5, %v3939_v53, %v3940_v57  ;;  %v7303_v3 = vsel %vm6463_vm5, %v5170_v24, %v3944_v46  ;;  %v5050_v53 = vld [vmem:[%s6241_s9 + $0x80] sm:$0x1]  ;;  %v3953_v24 = vrot.slane %v3951_v12, 4  ;;  %v5172_v47 = vrot.slane %v5146_v63, 10 }
 0x10f   : > { %v7289_v36 = vpop.f32.mrf.mxu0  ;;  %v7291_v8 = vpop.f32.mrf.mxu1  ;;  %v7318_v46 = vsel %vm6463_vm5, %v3946_v5, %v3947_v44  ;;  %v3462_v44 = vrot.slane %v3460_v13, 4  ;;  %v5201_v29 = vcombine.low %v7286_v40, %v7295_v62  ;;  %v8191_v40 = vcombine.low %v7186_v56, %v7196_v41  ;;  %v5148_v12 = vld [vmem:[%s6241_s9 + $0x84] sm:$0xc]  ;;  %v5149_v63 = vld [vmem:[%s6241_s9 + $0x8c] sm:$0x3] }
 0x110   : > { %8188 = vst [vmem:[#allocation14_spill] sm:$0xff] %v7291_v8  ;;  %v3954_v8 = vrot.slane %v5145_v42, 6  ;;  %v3463_v42 = vrot.slane %v5050_v53, 5  ;;  %v8192_v62 = vcombine.low %v7204_v54, %v7208_v51  ;;  %v7355_v17 = vsel %vm6251_vm2, %v3455_v58, %v3456_v31  ;;  %v7375_v31 = vld [vmem:[%s6241_s9 + $0x94] sm:$0xf] }
 0x111   : > { %v7312_v57 = vpop.f32.mrf.mxu0  ;;  %v7314_v50 = vpop.f32.mrf.mxu1  ;;  %v7371_v41 = vsel %vm6251_vm2, %v5084_v2, %v3460_v13  ;;  %v3960_v54 = vrot.slane %v3958_v28, 4  ;;  %v3961_v51 = vrot.slane %v5147_v0, 6  ;;  %v5150_v2 = vld [vmem:[%s6241_s9 + $0x90] sm:$0xc] }
 0x112   : > { %8189 = vst [vmem:[#allocation15_spill] sm:$0xff] %v7314_v50  ;;  %v7363_v55 = vsel %vm6463_vm5, %v3953_v24, %v3954_v8  ;;  %v7379_v58 = vsel %vm6251_vm2, %v3462_v44, %v3463_v42  ;;  %v3467_v24 = vrot.slane %v7345_v22, 5  ;;  %v5054_v44 = vld [vmem:[%s6241_s9 + $0x90] sm:$0xe] }
 0x113   : > { %v7326_v50 = vpop.f32.mrf.mxu0  ;;  %v7328_v61 = vpop.f32.mrf.mxu1  ;;  %v8208_v15 = vld [vmem:[#allocation12_spill] sm:$0xff] }
 0x114   : > { %8190 = vst [vmem:[#allocation16_spill] sm:$0xff] %v7328_v61  ;;  %v7366_v61 = vld [vmem:[%s6241_s9 + $0x8c] sm:$0x1] }
 0x115   : > { %v5511_v53 = vpop.f32.mrf.mxu1  ;;  %v5559_v5 = vpop.f32.mrf.mxu0  ;;  %5798 = vmatmul.mubr.bf16.vlgmr.msra.gmra.mxu1 %v8191_v40  ;;  %5846 = vmatmul.mubr.bf16.vlgmr.msra.gmra.mxu0 %v8192_v62  ;;  %v3474_v40 = vrot.slane %v7375_v31, 5 }
 0x116   : > { %v893_v56 = vadd.f32 %v5511_v53, %v7060_v1  ;;  %5801 = vmatprep.mubr.bf16.mxu1 %v5112_v19  ;;  %5849 = vmatprep.mubr.bf16.mxu0 %v5200_v49  ;;  %v5085_v1 = vrot.slane %v5051_v52, 9  ;;  %v3965_v19 = vrot.slane %v7345_v22, 6  ;;  %v7394_v53 = vsel %vm6463_vm5, %v5172_v47, %v3958_v28  ;;  %v5151_v49 = vld [vmem:[%s6241_s9 + $0x98] sm:$0x3] }
 0x117   : > { %v884_v8 = vpop.f32.mrf.mxu1  ;;  %v1353_v34 = vpop.f32.mrf.mxu0  ;;  %v5173_v22 = vrot.slane %v5148_v12, 10  ;;  %v3975_v4 = vrot.slane %v5151_v49, 6 }
 0x118   : > { %v7383_v13 = vadd.f32 %v5559_v5, %v893_v56  ;;  %v885_v0 = vadd.f32 %v884_v8, %v7072_v26  ;;  %v3470_v5 = vrot.slane %v7366_v61, 5  ;;  %v5056_v26 = vld [vmem:[%s6241_s9 + $0x98] sm:$0x1]  ;;  %v7409_v61 = vsel %vm6463_vm5, %v3960_v54, %v3961_v51 }
 0x119   : > { %v5512_v42 = vpop.f32.mrf.mxu1  ;;  %v5560_v52 = vpop.f32.mrf.mxu0  ;;  %v7413_v12 = vsel %vm6251_vm2, %v5085_v1, %v3467_v24  ;;  %v8195_v54 = vcombine.low %v7278_v20, %v7282_v43  ;;  %v3476_v51 = vrot.slane %v3474_v40, 4  ;;  %v3477_v1 = vrot.slane %v5056_v26, 5  ;;  %v5057_v43 = vld [vmem:[%s6241_s9 + $0x9c] sm:$0xe] }
 0x11a   : > { %8193 = vst [vmem:[#allocation17_spill] sm:$0xff] %v7383_v13  ;;  %v7399_v62 = vadd.f32 %v1353_v34, %v885_v0  ;;  %v896_v56 = vadd.f32 %v5512_v42, %v7085_v14  ;;  %v3972_v13 = vrot.slane %v7375_v31, 6  ;;  %v3469_v34 = vrot.slane %v3467_v24, 4  ;;  %v7416_v14 = vld [vmem:[%s6241_s9 + $0xa0] sm:$0xf] }
 0x11b   : > { %v887_v28 = vpop.f32.mrf.mxu1  ;;  %v1356_v47 = vpop.f32.mrf.mxu0  ;;  %v3967_v0 = vrot.slane %v3965_v19, 4  ;;  %v3968_v31 = vrot.slane %v5149_v63, 6  ;;  %v5174_v24 = vrot.slane %v5150_v2, 10  ;;  %v8197_v63 = vcombine.low %v7303_v3, %v7318_v46 }
 0x11c   : > { %8194 = vst [vmem:[#allocation18_spill] sm:$0xff] %v7399_v62  ;;  %v7418_v42 = vadd.f32 %v5560_v52, %v896_v56  ;;  %v888_v8 = vadd.f32 %v887_v28, %v7106_v32  ;;  %v5086_v62 = vrot.slane %v5054_v44, 9  ;;  %v8196_v32 = vcombine.low %v7299_v16, %v7309_v23  ;;  %v5153_v56 = vld [vmem:[%s6241_s9 + $0xa4] sm:$0x3] }
 0x11d   : > { %v5515_v27 = vpop.f32.mrf.mxu1  ;;  %v5563_v9 = vpop.f32.mrf.mxu0  ;;  %5802 = vmatmul.mubr.bf16.gmra.mxu1 %v8195_v54  ;;  %5850 = vmatmul.mubr.bf16.gmra.mxu0 %v5201_v29  ;;  %v3974_v20 = vrot.slane %v3972_v13, 4  ;;  %v5059_v29 = vld [vmem:[%s6241_s9 + $0xa4] sm:$0x1]  ;;  %v3481_v2 = vrot.slane %v7416_v14, 5  ;;  %v7444_v16 = vsel %vm6463_vm5, %v5173_v22, %v3965_v19  ;;  %v3979_v3 = vrot.slane %v7416_v14, 6 }
 0x11e   : > { %v7424_v48 = vadd.f32 %v1356_v47, %v888_v8  ;;  %v909_v52 = vadd.f32 %v5515_v27, %v7117_v45  ;;  %5805 = vmatprep.mubr.bf16.mxu1 %v8196_v32  ;;  %5853 = vmatprep.mubr.bf16.mxu0 %v8197_v63  ;;  %v5204_v45 = vcombine.low %v7394_v53, %v7409_v61  ;;  %v3484_v22 = vrot.slane %v5059_v29, 5  ;;  %v5061_v47 = vld [vmem:[%s6241_s9 + $0xac] sm:$0xf]  ;;  %v5154_v32 = vld [vmem:[%s6241_s9 + $0xa8] sm:$0xc] }
 0x11f   : > { %v900_v49 = vpop.f32.mrf.mxu1  ;;  %v1369_v44 = vpop.f32.mrf.mxu0  ;;  %v7440_v27 = vsel %vm6251_vm2, %v3469_v34, %v3470_v5  ;;  %v7452_v26 = vsel %vm6463_vm5, %v3967_v0, %v3968_v31  ;;  %v7456_v53 = vsel %vm6251_vm2, %v5086_v62, %v3474_v40  ;;  %v5152_v5 = vld [vmem:[%s6241_s9 + $0x9c] sm:$0xc]  ;;  %v7462_v19 = vsel %vm6251_vm2, %v3476_v51, %v3477_v1 }
 0x120   : > { %v7447_v23 = vadd.f32 %v5563_v9, %v909_v52  ;;  %v901_v46 = vadd.f32 %v900_v49, %v7129_v10  ;;  %v7466_v9 = vsel %vm6463_vm5, %v5174_v24, %v3972_v13  ;;  %v5087_v10 = vrot.slane %v5057_v43, 9  ;;  %v5060_v52 = vld [vmem:[%s6241_s9 + $0xa8] sm:$0xe] }
 0x121   : > { %v5516_v8 = vpop.f32.mrf.mxu1  ;;  %v5564_v28 = vpop.f32.mrf.mxu0  ;;  %v7474_v62 = vsel %vm6463_vm5, %v3974_v20, %v3975_v4  ;;  %v3483_v34 = vrot.slane %v3481_v2, 4  ;;  %v5117_v13 = vcombine.low %v7413_v12, %v7440_v27  ;;  %v5175_v31 = vrot.slane %v5152_v5, 10 }
 0x122   : > { %v7469_v61 = vadd.f32 %v1369_v44, %v901_v46  ;;  %v912_v40 = vadd.f32 %v5516_v8, %v7143_v6  ;;  %v3981_v54 = vrot.slane %v3979_v3, 4  ;;  %v3982_v51 = vrot.slane %v5153_v56, 6 }
 0x123   : > { %v903_v0 = vpop.f32.mrf.mxu1  ;;  %v1372_v14 = vpop.f32.mrf.mxu0  ;;  %v5205_v6 = vcombine.low %v7444_v16, %v7452_v26  ;;  %v3488_v4 = vrot.slane %v5061_v47, 5  ;;  %v8198_v43 = vcombine.low %v7341_v30, %v7355_v17  ;;  %v8199_v29 = vcombine.low %v7359_v11, %v7363_v55  ;;  %v5062_v16 = vld [vmem:[%s6241_s9 + $0xb0] sm:$0x1] }
 0x124   : > { %v7478_v1 = vadd.f32 %v5564_v28, %v912_v40  ;;  %v904_v24 = vadd.f32 %v903_v0, %v7153_v59  ;;  %v5118_v59 = vcombine.low %v7456_v53, %v7462_v19  ;;  %v5206_v49 = vcombine.low %v7466_v9, %v7474_v62  ;;  %v5155_v55 = vld [vmem:[%s6241_s9 + $0xb0] sm:$0x3]  ;;  %v5063_v9 = vld [vmem:[%s6241_s9 + $0xb4] sm:$0xe] }
 0x125   : > { %v5519_v63 = vpop.f32.mrf.mxu1  ;;  %v5567_v20 = vpop.f32.mrf.mxu0  ;;  %5806 = vmatmul.mubr.bf16.gmra.mxu1 %v8198_v43  ;;  %5854 = vmatmul.mubr.bf16.gmra.mxu0 %v8199_v29  ;;  %v7497_v44 = vsel %vm6251_vm2, %v5087_v10, %v3481_v2  ;;  %v3986_v46 = vrot.slane %v5061_v47, 6  ;;  %v8200_v30 = vcombine.low %v7371_v41, %v7379_v58  ;;  %v7508_v11 = vsel %vm6251_vm2, %v3483_v34, %v3484_v22  ;;  %v7512_v2 = vld [vmem:[%s6241_s9 + $0xb8] sm:$0xf]  ;;  %v7527_v10 = vld [vmem:[%s6241_s9 + $0xc4] sm:$0xf] }
 0x126   : > { %v7500_v26 = vadd.f32 %v1372_v14, %v904_v24  ;;  %v925_v17 = vadd.f32 %v5519_v63, %v7190_v39  ;;  %5857 = vmatprep.mubr.bf16.mxu0 %v5204_v45  ;;  %v7516_v56 = vsel %vm6463_vm5, %v5175_v31, %v3979_v3  ;;  %v7520_v39 = vsel %vm6463_vm5, %v3981_v54, %v3982_v51  ;;  %v5065_v31 = vld [vmem:[%s6241_s9 + $0xbc] sm:$0x1]  ;;  %v5156_v54 = vld [vmem:[%s6241_s9 + $0xb4] sm:$0xc]  ;;  %v5066_v43 = vld [vmem:[%s6241_s9 + $0xc0] sm:$0xe] }
 0x127   : > { %5809 = vmatprep.mubr.bf16.mxu1 %v8200_v30  ;;  %v916_v53 = vpop.f32.mrf.mxu1  ;;  %v1385_v5 = vpop.f32.mrf.mxu0  ;;  %v5088_v41 = vrot.slane %v5060_v52, 9  ;;  %v5176_v58 = vrot.slane %v5154_v32, 10  ;;  %v3490_v28 = vrot.slane %v3488_v4, 4  ;;  %v3491_v19 = vrot.slane %v5062_v16, 5 }
 0x128   : > { %v7522_v45 = vadd.f32 %v5567_v20, %v925_v17  ;;  %v917_v8 = vadd.f32 %v916_v53, %v7213_v60  ;;  %v5119_v47 = vcombine.low %v7497_v44, %v7508_v11  ;;  %v3988_v40 = vrot.slane %v3986_v46, 4  ;;  %v5157_v20 = vld [vmem:[%s6241_s9 + $0xbc] sm:$0x3] }
 0x129   : > { %v5520_v22 = vpop.f32.mrf.mxu1  ;;  %v5568_v3 = vpop.f32.mrf.mxu0  ;;  %v3989_v62 = vrot.slane %v5155_v55, 6  ;;  %v3495_v34 = vrot.slane %v7512_v2, 5  ;;  %v5207_v14 = vcombine.low %v7516_v56, %v7520_v39  ;;  %v3993_v51 = vrot.slane %v7512_v2, 6  ;;  %v5158_v55 = vld [vmem:[%s6241_s9 + $0xc0] sm:$0xc] }
 0x12a   : > { %v7532_v0 = vadd.f32 %v1385_v5, %v917_v8  ;;  %v928_v60 = vadd.f32 %v5520_v22, %v7231_v21  ;;  %v7542_v32 = vsel %vm6251_vm2, %v5088_v41, %v3488_v4  ;;  %v7546_v63 = vsel %vm6463_vm5, %v5176_v58, %v3986_v46  ;;  %v5068_v4 = vld [vmem:[%s6241_s9 + $0xc8] sm:$0x1]  ;;  %v5074_v56 = vld [vmem:[%s6241_s9 + $0xe0] sm:$0x1]  ;;  %v5162_v39 = vld [vmem:[%s6241_s9 + $0xd8] sm:$0xc] }
 0x12b   : > { %v919_v24 = vpop.f32.mrf.mxu1  ;;  %v1388_v52 = vpop.f32.mrf.mxu0  ;;  %v5089_v21 = vrot.slane %v5063_v9, 9  ;;  %v3502_v29 = vrot.slane %v7527_v10, 5  ;;  %v7556_v30 = vsel %vm6251_vm2, %v3490_v28, %v3491_v19  ;;  %v4000_v2 = vrot.slane %v7527_v10, 6  ;;  %v5159_v8 = vld [vmem:[%s6241_s9 + $0xc8] sm:$0x3] }
 0x12c   : > { %v7551_v16 = vadd.f32 %v5568_v3, %v928_v60  ;;  %v920_v17 = vadd.f32 %v919_v24, %v7252_v35  ;;  %v3990_v5 = vsel %vm6463_vm5, %v3988_v40, %v3989_v62  ;;  %v3497_v41 = vrot.slane %v3495_v34, 4 }
 0x12d   : > { %v5523_v46 = vpop.f32.mrf.mxu1  ;;  %v5571_v53 = vpop.f32.mrf.mxu0  ;;  %5810 = vmatmul.mubr.bf16.gmra.mxu1 %v5117_v13  ;;  %5858 = vmatmul.mubr.bf16.gmra.mxu0 %v5205_v6  ;;  %v3498_v35 = vrot.slane %v5065_v31, 5  ;;  %v5177_v58 = vrot.slane %v5156_v54, 10  ;;  %v3995_v9 = vrot.slane %v3993_v51, 4  ;;  %v3996_v10 = vrot.slane %v5157_v20, 6  ;;  %v7574_v54 = vld [vmem:[%s6241_s9 + $0xd0] sm:$0xf] }
 0x12e   : > { %v7567_v28 = vadd.f32 %v1388_v52, %v920_v17  ;;  %v941_v19 = vadd.f32 %v5523_v46, %v7269_v38  ;;  %5813 = vmatprep.mubr.bf16.mxu1 %v5118_v59  ;;  %5861 = vmatprep.mubr.bf16.mxu0 %v5206_v49  ;;  %v5090_v27 = vrot.slane %v5066_v43, 9  ;;  %v3504_v13 = vrot.slane %v3502_v29, 4 }
 0x12f   : > { %v932_v22 = vpop.f32.mrf.mxu1  ;;  %v1401_v12 = vpop.f32.mrf.mxu0  ;;  %v3505_v6 = vrot.slane %v5068_v4, 5  ;;  %v5178_v3 = vrot.slane %v5158_v55, 10  ;;  %v4002_v60 = vrot.slane %v4000_v2, 4  ;;  %v4003_v31 = vrot.slane %v5159_v8, 6  ;;  %v5071_v55 = vld [vmem:[%s6241_s9 + $0xd4] sm:$0x1] }
 0x130   : > { %v7570_v40 = vadd.f32 %v5571_v53, %v941_v19  ;;  %v933_v62 = vadd.f32 %v932_v22, %v7289_v36  ;;  %v5120_v49 = vcombine.low %v7542_v32, %v7556_v30  ;;  %v5208_v24 = vcombine.low %v7546_v63, %v3990_v5  ;;  %v5069_v63 = vld [vmem:[%s6241_s9 + $0xcc] sm:$0xe] }
 0x131   : > { %v5524_v38 = vpop.f32.mrf.mxu1  ;;  %v5572_v59 = vpop.f32.mrf.mxu0  ;;  %v7581_v52 = vsel %vm6251_vm2, %v5089_v21, %v3495_v34  ;;  %v7585_v20 = vsel %vm6463_vm5, %v5177_v58, %v3993_v51  ;;  %v7592_v17 = vsel %vm6251_vm2, %v3497_v41, %v3498_v35  ;;  %v7596_v32 = vsel %vm6463_vm5, %v3995_v9, %v3996_v10  ;;  %v7600_v34 = vld [vmem:[%s6241_s9 + $0xdc] sm:$0xf]  ;;  %v5160_v41 = vld [vmem:[%s6241_s9 + $0xcc] sm:$0xc]  ;;  %v5161_v9 = vld [vmem:[%s6241_s9 + $0xd4] sm:$0x3] }
 0x132   : > { %v7587_v36 = vadd.f32 %v1401_v12, %v933_v62  ;;  %v944_v43 = vadd.f32 %v5524_v38, %v7312_v57  ;;  %v7604_v51 = vsel %vm6251_vm2, %v5090_v27, %v3502_v29  ;;  %v7608_v57 = vsel %vm6251_vm2, %v3504_v13, %v3505_v6  ;;  %v5072_v10 = vld [vmem:[%s6241_s9 + $0xd8] sm:$0xe] }
 0x133   : > { %v935_v21 = vpop.f32.mrf.mxu1  ;;  %v1404_v30 = vpop.f32.mrf.mxu0  ;;  %v7612_v4 = vsel %vm6463_vm5, %v5178_v3, %v4000_v2  ;;  %v3509_v46 = vrot.slane %v7574_v54, 5  ;;  %v7621_v29 = vsel %vm6463_vm5, %v4002_v60, %v4003_v31  ;;  %v4007_v35 = vrot.slane %v7574_v54, 6  ;;  %v5163_v60 = vld [vmem:[%s6241_s9 + $0xe0] sm:$0x3] }
 0x134   : > { %v7616_v53 = vadd.f32 %v5572_v59, %v944_v43  ;;  %v936_v5 = vadd.f32 %v935_v21, %v7326_v50  ;;  %v5121_v50 = vcombine.low %v7581_v52, %v7592_v17  ;;  %v5209_v8 = vcombine.low %v7585_v20, %v7596_v32  ;;  %v5076_v21 = vld [vmem:[%s6241_s9 + $0xe8] sm:$0xf] }
 0x135   : > { %v5527_v58 = vpop.f32.mrf.mxu1  ;;  %v5575_v2 = vpop.f32.mrf.mxu0  ;;  %5814 = vmatmul.mubr.bf16.gmra.mxu1 %v5119_v47  ;;  %5862 = vmatmul.mubr.bf16.gmra.mxu0 %v5207_v14  ;;  %v5091_v19 = vrot.slane %v5069_v63, 9  ;;  %v3516_v22 = vrot.slane %v7600_v34, 5  ;;  %v3512_v11 = vrot.slane %v5071_v55, 5  ;;  %v4014_v47 = vrot.slane %v7600_v34, 6 }
 0x136   : > { %v7638_v12 = vadd.f32 %v1404_v30, %v936_v5  ;;  %v957_v44 = vadd.f32 %v5527_v58, %v7062_v25  ;;  %5817 = vmatprep.mubr.bf16.mxu1 %v5120_v49  ;;  %5865 = vmatprep.mubr.bf16.mxu0 %v5208_v24  ;;  %v5122_v13 = vcombine.low %v7604_v51, %v7608_v57  ;;  %v3511_v3 = vrot.slane %v3509_v46, 4  ;;  %v5075_v58 = vld [vmem:[%s6241_s9 + $0xe4] sm:$0xe] }
 0x137   : > { %v948_v14 = vpop.f32.mrf.mxu1  ;;  %v1417_v27 = vpop.f32.mrf.mxu0  ;;  %v5210_v6 = vcombine.low %v7612_v4, %v7621_v29  ;;  %v5179_v62 = vrot.slane %v5160_v41, 10  ;;  %v4009_v54 = vrot.slane %v4007_v35, 4  ;;  %v4010_v38 = vrot.slane %v5161_v9, 6 }
 0x138   : > { %v7649_v25 = vadd.f32 %v5575_v2, %v957_v44  ;;  %v949_v31 = vadd.f32 %v948_v14, %v7074_v18  ;;  %v5092_v24 = vrot.slane %v5072_v10, 9  ;;  %v3518_v52 = vrot.slane %v3516_v22, 4  ;;  %v5077_v2 = vld [vmem:[%s6241_s9 + $0xec] sm:$0x1]  ;;  %v8201_v10 = vld [vmem:[#allocation5_spill] sm:$0xff] }
 0x139   : > { %v5528_v59 = vpop.f32.mrf.mxu1  ;;  %v5576_v49 = vpop.f32.mrf.mxu0  ;;  %v3519_v20 = vrot.slane %v5074_v56, 5  ;;  %v5180_v43 = vrot.slane %v5162_v39, 10  ;;  %v4016_v63 = vrot.slane %v4014_v47, 4  ;;  %v4017_v34 = vrot.slane %v5163_v60, 6 }
 0x13a   : > { %v7652_v17 = vadd.f32 %v1417_v27, %v949_v31  ;;  %v960_v32 = vadd.f32 %v5528_v59, %v7087_v37  ;;  %v3510_v18 = vsel %vm6251_vm2, %v5091_v19, %v3509_v46  ;;  %v4008_v57 = vsel %vm6463_vm5, %v5179_v62, %v4007_v35  ;;  %v5165_v27 = vld [vmem:[%s6241_s9 + $0xec] sm:$0x3] }
 0x13b   : > { %v951_v30 = vpop.f32.mrf.mxu1  ;;  %v1420_v51 = vpop.f32.mrf.mxu0  ;;  %v3513_v37 = vsel %vm6251_vm2, %v3511_v3, %v3512_v11  ;;  %v4011_v5 = vsel %vm6463_vm5, %v4009_v54, %v4010_v38  ;;  %v3517_v46 = vsel %vm6251_vm2, %v5092_v24, %v3516_v22  ;;  %v3520_v35 = vsel %vm6251_vm2, %v3518_v52, %v3519_v20  ;;  %v8202_v3 = vld [vmem:[#allocation6_spill] sm:$0xff]  ;;  %v8203_v52 = vld [vmem:[#allocation7_spill] sm:$0xff] }
 0x13c   : > { %v7660_v4 = vadd.f32 %v5576_v49, %v960_v32  ;;  %v952_v55 = vadd.f32 %v951_v30, %v7108_v33  ;;  %v4015_v33 = vsel %vm6463_vm5, %v5180_v43, %v4014_v47  ;;  %v3523_v19 = vrot.slane %v5076_v21, 5  ;;  %v8204_v30 = vld [vmem:[#allocation8_spill] sm:$0xff] }
 0x13d   : > { %v5531_v29 = vpop.f32.mrf.mxu1  ;;  %v5579_v41 = vpop.f32.mrf.mxu0  ;;  %5818 = vmatmul.mubr.bf16.gmra.mxu1 %v5121_v50  ;;  %5866 = vmatmul.mubr.bf16.gmra.mxu0 %v5209_v8  ;;  %v4018_v50 = vsel %vm6463_vm5, %v4016_v63, %v4017_v34  ;;  %v5164_v8 = vld [vmem:[%s6241_s9 + $0xe4] sm:$0xc]  ;;  %v4021_v22 = vrot.slane %v5076_v21, 6  ;;  %v5123_v39 = vcombine.low %v3510_v18, %v3513_v37  ;;  %v5211_v14 = vcombine.low %v4008_v57, %v4011_v5  ;;  %s175_s9 = sand.u32 1, %s6131_s13  }
 0x13e   : > { %v7675_v9 = vadd.f32 %v1420_v51, %v952_v55  ;;  %v973_v44 = vadd.f32 %v5531_v29, %v8201_v10  ;;  %5821 = vmatprep.mubr.bf16.mxu1 %v5122_v13  ;;  %5869 = vmatprep.mubr.bf16.mxu0 %v5210_v6  ;;  %v5093_v60 = vrot.slane %v5075_v58, 9  ;;  %v3526_v31 = vrot.slane %v5077_v2, 5  ;;  %s4556_s5 = sshll.u32 %s175_s9, 8  ;;  %s8124_s15 = scalar_lea.sflag [#allocation3], %s175_s9 }
 0x13f   : > { %v964_v11 = vpop.f32.mrf.mxu1  ;;  %v1433_v56 = vpop.f32.mrf.mxu0  ;;  %v5124_v13 = vcombine.low %v3517_v46, %v3520_v35  ;;  %v5212_v6 = vcombine.low %v4015_v33, %v4018_v50  ;;  %v3525_v59 = vrot.slane %v3523_v19, 4  ;;  %v5181_v49 = vrot.slane %v5164_v8, 10  ;;  %s7975_s6 = scalar_lea.vmem [#allocation2], %s4556_s5 }
 0x140   : > { %v7682_v47 = vadd.f32 %v5579_v41, %v973_v44  ;;  %v965_v62 = vadd.f32 %v964_v11, %v8202_v3  ;;  %v4023_v43 = vrot.slane %v4021_v22, 4  ;;  %v4024_v32 = vrot.slane %v5165_v27, 6  ;;  %v8205_v41 = vld [vmem:[#allocation9_spill] sm:$0xff]  ;;  %v8207_v11 = vld [vmem:[#allocation11_spill] sm:$0xff]  ;;  %s4468_s8 = sshll.u32 %s7975_s6, 4  ;;  %s8118_s8 = int_to_ptr.vmem [resolvable:$true] %s4468_s8 }
 0x141   : > { %v5532_v54 = vpop.f32.mrf.mxu1  ;;  %v5580_v38 = vpop.f32.mrf.mxu0  ;;  %v3524_v55 = vsel %vm6251_vm2, %v5093_v60, %v3523_v19  ;;  %v3527_v37 = vsel %vm6251_vm2, %v3525_v59, %v3526_v31  ;;  %v4022_v5 = vsel %vm6463_vm5, %v5181_v49, %v4021_v22  ;;  %v8206_v19 = vld [vmem:[#allocation10_spill] sm:$0xff]  ;;  %s6071_s19 = scalar_lea.vmem %s8118_s8, 4096  ;;  %p6078_p1 = scmp.lt.s32.totalorder %s8118_s8, %s6076_s23 }
 0x142   : > { %v7685_v24 = vadd.f32 %v1433_v56, %v965_v62  ;;  %v976_v20 = vadd.f32 %v5532_v54, %v8203_v52  ;;  %v4025_v35 = vsel %vm6463_vm5, %v4023_v43, %v4024_v32  ;;  %v5125_v50 = vcombine.low %v3524_v55, %v3527_v37  ;;  %v8209_v54 = vld [vmem:[#allocation13_spill] sm:$0xff]  ;;  %v8210_v49 = vld [vmem:[#allocation14_spill] sm:$0xff]  ;;  %p6072_p12 = scmp.ne.s32.totalorder %s8118_s8, %s6071_s19  ;;  %p6079_p2 = scmp.lt.s32.totalorder %s6077_s26, %s6071_s19 }
 0x143   : > { %v967_v63 = vpop.f32.mrf.mxu1  ;;  %v1436_v34 = vpop.f32.mrf.mxu0  ;;  %v5213_v8 = vcombine.low %v4022_v5, %v4025_v35 }
 0x144   : > { %v7688_v21 = vadd.f32 %v5580_v38, %v976_v20  ;;  %v968_v51 = vadd.f32 %v967_v63, %v8204_v30  ;;  %v8211_v63 = vld [vmem:[#allocation15_spill] sm:$0xff]  ;;  %p6073_p13 = pnand %p6072_p12, %p6212_p4  ;;  %p6080_p3 = por %p6079_p2, %p6078_p1 }
 0x145   : > { %v5535_v18 = vpop.f32.mrf.mxu1  ;;  %v5583_v57 = vpop.f32.mrf.mxu0  ;;  %5822 = vmatmul.mubr.bf16.gmra.mxu1 %v5123_v39  ;;  %5870 = vmatmul.mubr.bf16.gmra.mxu0 %v5211_v14 }
 0x146   : > { %v7697_v29 = vadd.f32 %v1436_v34, %v968_v51  ;;  %v989_v46 = vadd.f32 %v5535_v18, %v8205_v41  ;;  %5825 = vmatprep.mubr.bf16.mxu1 %v5124_v13  ;;  %5873 = vmatprep.mubr.bf16.mxu0 %v5212_v6  ;;  %p6074_p0 = pneg %p6073_p13 }
 0x147   : > { %v980_v33 = vpop.f32.mrf.mxu1  ;;  %v1449_v58 = vpop.f32.mrf.mxu0 }
 0x148   : > { %v7702_v2 = vadd.f32 %v5583_v57, %v989_v46  ;;  %v981_v10 = vadd.f32 %v980_v33, %v8206_v19  ;;  %v8212_v57 = vld [vmem:[#allocation16_spill] sm:$0xff]  ;;  %v8213_v46 = vld [vmem:[#allocation17_spill] sm:$0xff]  ;;  %p6081_p5 = pnand %p6080_p3, %p6074_p0 }
 0x149   : > { %v5536_v7 = vpop.f32.mrf.mxu1  ;;  %v5584_v44 = vpop.f32.mrf.mxu0 }
 0x14a   : > { %v7705_v22 = vadd.f32 %v1449_v58, %v981_v10  ;;  %v992_v56 = vadd.f32 %v5536_v7, %v8207_v11  ;;  %v8214_v10 = vld [vmem:[#allocation18_spill] sm:$0xff] }
 0x14b   : > { %v983_v39 = vpop.f32.mrf.mxu1  ;;  %v1452_v14 = vpop.f32.mrf.mxu0 }
 0x14c   : > { %v7708_v27 = vadd.f32 %v5584_v44, %v992_v56  ;;  %v984_v3 = vadd.f32 %v983_v39, %v8208_v15 }
 0x14d   : > { %v5539_v62 = vpop.f32.mrf.mxu1  ;;  %v5587_v60 = vpop.f32.mrf.mxu0  ;;  %5826 = vmatmul.mubr.bf16.gmra.mxu1 %v5125_v50  ;;  %5874 = vmatmul.mubr.bf16.gmra.mxu0 %v5213_v8 }
 0x14e   : > { %v7711_v31 = vadd.f32 %v1452_v14, %v984_v3  ;;  %v1005_v38 = vadd.f32 %v5539_v62, %v8209_v54 }
 0x14f   : > { %v996_v13 = vpop.f32.mrf.mxu1  ;;  %v1465_v6 = vpop.f32.mrf.mxu0 }
 0x150   : > { %v7714_v59 = vadd.f32 %v5587_v60, %v1005_v38  ;;  %v997_v52 = vadd.f32 %v996_v13, %v8210_v49 }
 0x151   : > { %v5540_v20 = vpop.f32.mrf.mxu1  ;;  %v5588_v43 = vpop.f32.mrf.mxu0 }
 0x152   : > { %v7717_v32 = vadd.f32 %v1465_v6, %v997_v52  ;;  %v1008_v34 = vadd.f32 %v5540_v20, %v8211_v63 }
 0x153   : > { %v999_v30 = vpop.f32.mrf.mxu1  ;;  %v1468_v51 = vpop.f32.mrf.mxu0 }
 0x154   : > { %v7720_v18 = vadd.f32 %v5588_v43, %v1008_v34  ;;  %v1000_v55 = vadd.f32 %v999_v30, %v8212_v57 }
 0x155   : > { %v5607_v37 = vpop.f32.mrf.mxu1  ;;  %v5655_v5 = vpop.f32.mrf.mxu0 }
 0x156   : > { %v7723_v41 = vadd.f32 %v1468_v51, %v1000_v55  ;;  %v1872_v35 = vadd.f32 %v5607_v37, %v8213_v46 }
 0x157   : > { %v1743_v33 = vpop.f32.mrf.mxu1  ;;  %v2273_v58 = vpop.f32.mrf.mxu0 }
 0x158   : > { %v7726_v19 = vadd.f32 %v5655_v5, %v1872_v35  ;;  %v1870_v7 = vadd.f32 %v1743_v33, %v8214_v10 }
 0x159   : > { %v5608_v44 = vpop.f32.mrf.mxu1  ;;  %v5656_v50 = vpop.f32.mrf.mxu0 }
 0x15a   : > { %v7729_v8 = vadd.f32 %v2273_v58, %v1870_v7  ;;  %v1873_v11 = vadd.f32 %v5608_v44, %v7418_v42 }
 0x15b   : > { %v1746_v56 = vpop.f32.mrf.mxu1  ;;  %v2276_v39 = vpop.f32.mrf.mxu0 }
 0x15c   : > { %v7732_v14 = vadd.f32 %v5656_v50, %v1873_v11  ;;  %v1871_v15 = vadd.f32 %v1746_v56, %v7424_v48 }
 0x15d   : > { %v5611_v3 = vpop.f32.mrf.mxu1  ;;  %v5659_v62 = vpop.f32.mrf.mxu0 }
 0x15e   : > { %v7735_v60 = vadd.f32 %v2276_v39, %v1871_v15  ;;  %v1876_v54 = vadd.f32 %v5611_v3, %v7447_v23 }
 0x15f   : > { %v1759_v38 = vpop.f32.mrf.mxu1  ;;  %v2289_v13 = vpop.f32.mrf.mxu0 }
 0x160   : > { %v7738_v6 = vadd.f32 %v5659_v62, %v1876_v54  ;;  %v1874_v49 = vadd.f32 %v1759_v38, %v7469_v61 }
 0x161   : > { %v5612_v52 = vpop.f32.mrf.mxu1  ;;  %v5660_v42 = vpop.f32.mrf.mxu0 }
 0x162   : > { %v7741_v20 = vadd.f32 %v2289_v13, %v1874_v49  ;;  %v1877_v43 = vadd.f32 %v5612_v52, %v7478_v1 }
 0x163   : > { %v1762_v63 = vpop.f32.mrf.mxu1  ;;  %v2292_v48 = vpop.f32.mrf.mxu0 }
 0x164   : > { %v7744_v34 = vadd.f32 %v5660_v42, %v1877_v43  ;;  %v1875_v30 = vadd.f32 %v1762_v63, %v7500_v26 }
 0x165   : > { %v5615_v51 = vpop.f32.mrf.mxu1  ;;  %v5663_v23 = vpop.f32.mrf.mxu0 }
 0x166   : > { %v7747_v57 = vadd.f32 %v2292_v48, %v1875_v30  ;;  %v1880_v55 = vadd.f32 %v5615_v51, %v7522_v45 }
 0x167   : > { %v1775_v37 = vpop.f32.mrf.mxu1  ;;  %v2305_v61 = vpop.f32.mrf.mxu0 }
 0x168   : > { %v7750_v5 = vadd.f32 %v5663_v23, %v1880_v55  ;;  %v1878_v46 = vadd.f32 %v1775_v37, %v7532_v0 }
 0x169   : > { %v5616_v35 = vpop.f32.mrf.mxu1  ;;  %v5664_v1 = vpop.f32.mrf.mxu0 }
 0x16a   : > { %v7753_v33 = vadd.f32 %v2305_v61, %v1878_v46  ;;  %v1881_v58 = vadd.f32 %v5616_v35, %v7551_v16 }
 0x16b   : > { %v1778_v10 = vpop.f32.mrf.mxu1  ;;  %v2308_v26 = vpop.f32.mrf.mxu0 }
 0x16c   : > { %v7756_v7 = vadd.f32 %v5664_v1, %v1881_v58  ;;  %v1879_v44 = vadd.f32 %v1778_v10, %v7567_v28 }
 0x16d   : > { %v5619_v50 = vpop.f32.mrf.mxu1  ;;  %v5667_v45 = vpop.f32.mrf.mxu0 }
 0x16e   : > { %v7759_v11 = vadd.f32 %v2308_v26, %v1879_v44  ;;  %v1884_v56 = vadd.f32 %v5619_v50, %v7570_v40 }
 0x16f   : > { %v1791_v39 = vpop.f32.mrf.mxu1  ;;  %v2321_v0 = vpop.f32.mrf.mxu0 }
 0x170   : > { %v7762_v15 = vadd.f32 %v5667_v45, %v1884_v56  ;;  %v1882_v3 = vadd.f32 %v1791_v39, %v7587_v36 }
 0x171   : > { %v5620_v62 = vpop.f32.mrf.mxu1  ;;  %v5668_v16 = vpop.f32.mrf.mxu0 }
 0x172   : > { %v7765_v54 = vadd.f32 %v2321_v0, %v1882_v3  ;;  %v1885_v38 = vadd.f32 %v5620_v62, %v7616_v53 }
 0x173   : > { %v1794_v13 = vpop.f32.mrf.mxu1  ;;  %v2324_v28 = vpop.f32.mrf.mxu0 }
 0x174   : > { %v7768_v49 = vadd.f32 %v5668_v16, %v1885_v38  ;;  %v1883_v52 = vadd.f32 %v1794_v13, %v7638_v12 }
 0x175   : > { %v5623_v42 = vpop.f32.mrf.mxu1  ;;  %v5671_v40 = vpop.f32.mrf.mxu0 }
 0x176   : > { %v7771_v43 = vadd.f32 %v2324_v28, %v1883_v52  ;;  %v1888_v63 = vadd.f32 %v5623_v42, %v7649_v25 }
 0x177   : > { %v1807_v48 = vpop.f32.mrf.mxu1  ;;  %v2337_v36 = vpop.f32.mrf.mxu0 }
 0x178   : > { %v7774_v30 = vadd.f32 %v5671_v40, %v1888_v63  ;;  %v1886_v51 = vadd.f32 %v1807_v48, %v7652_v17 }
 0x179   : > { %v5624_v23 = vpop.f32.mrf.mxu1  ;;  %v5672_v53 = vpop.f32.mrf.mxu0 }
 0x17a   : > { %v7777_v55 = vadd.f32 %v2337_v36, %v1886_v51  ;;  %v1889_v37 = vadd.f32 %v5624_v23, %v7660_v4 }
 0x17b   : > { %v1810_v61 = vpop.f32.mrf.mxu1  ;;  %v2340_v12 = vpop.f32.mrf.mxu0 }
 0x17c   : > { %v7780_v46 = vadd.f32 %v5672_v53, %v1889_v37  ;;  %v1887_v35 = vadd.f32 %v1810_v61, %v7675_v9 }
 0x17d   : > { %v5627_v1 = vpop.f32.mrf.mxu1  ;;  %v5675_v25 = vpop.f32.mrf.mxu0 }
 0x17e   : > { %8215 = vst [vmem:[#allocation5_spill] sm:$0xff] %v7780_v46  ;;  %v7783_v58 = vadd.f32 %v2340_v12, %v1887_v35  ;;  %v1892_v10 = vadd.f32 %v5627_v1, %v7682_v47 }
 0x17f   : > { %v1823_v26 = vpop.f32.mrf.mxu1  ;;  %v2353_v17 = vpop.f32.mrf.mxu0 }
 0x180   : > { %8216 = vst [vmem:[#allocation6_spill] sm:$0xff] %v7783_v58  ;;  %v7786_v44 = vadd.f32 %v5675_v25, %v1892_v10  ;;  %v1890_v50 = vadd.f32 %v1823_v26, %v7685_v24 }
 0x181   : > { %v5628_v45 = vpop.f32.mrf.mxu1  ;;  %v5676_v4 = vpop.f32.mrf.mxu0 }
 0x182   : > { %8217 = vst [vmem:[#allocation7_spill] sm:$0xff] %v7786_v44  ;;  %v7789_v56 = vadd.f32 %v2353_v17, %v1890_v50  ;;  %v1893_v39 = vadd.f32 %v5628_v45, %v7688_v21 }
 0x183   : > { %v1826_v0 = vpop.f32.mrf.mxu1  ;;  %v2356_v9 = vpop.f32.mrf.mxu0 }
 0x184   : > { %8218 = vst [vmem:[#allocation8_spill] sm:$0xff] %v7789_v56  ;;  %v7792_v3 = vadd.f32 %v5676_v4, %v1893_v39  ;;  %v1891_v62 = vadd.f32 %v1826_v0, %v7697_v29 }
 0x185   : > { %v5631_v16 = vpop.f32.mrf.mxu1  ;;  %v5679_v47 = vpop.f32.mrf.mxu0 }
 0x186   : > { %8219 = vst [vmem:[#allocation9_spill] sm:$0xff] %v7792_v3  ;;  %v7795_v38 = vadd.f32 %v2356_v9, %v1891_v62  ;;  %v1896_v13 = vadd.f32 %v5631_v16, %v7702_v2 }
 0x187   : > { %v1839_v28 = vpop.f32.mrf.mxu1  ;;  %v2369_v24 = vpop.f32.mrf.mxu0 }
 0x188   : > { %8220 = vst [vmem:[#allocation10_spill] sm:$0xff] %v7795_v38  ;;  %v7798_v52 = vadd.f32 %v5679_v47, %v1896_v13  ;;  %v1894_v42 = vadd.f32 %v1839_v28, %v7705_v22 }
 0x189   : > { %v5632_v40 = vpop.f32.mrf.mxu1  ;;  %v5680_v21 = vpop.f32.mrf.mxu0 }
 0x18a   : > { %8221 = vst [vmem:[#allocation11_spill] sm:$0xff] %v7798_v52  ;;  %v7801_v63 = vadd.f32 %v2369_v24, %v1894_v42  ;;  %v1897_v48 = vadd.f32 %v5632_v40, %v7708_v27 }
 0x18b   : > { %v1842_v36 = vpop.f32.mrf.mxu1  ;;  %v2372_v29 = vpop.f32.mrf.mxu0 }
 0x18c   : > { %8222 = vst [vmem:[#allocation12_spill] sm:$0xff] %v7801_v63  ;;  %v7804_v51 = vadd.f32 %v5680_v21, %v1897_v48  ;;  %v1895_v23 = vadd.f32 %v1842_v36, %v7711_v31 }
 0x18d   : > { %v5635_v53 = vpop.f32.mrf.mxu1  ;;  %v5683_v2 = vpop.f32.mrf.mxu0 }
 0x18e   : > { %8223 = vst [vmem:[#allocation13_spill] sm:$0xff] %v7804_v51  ;;  %v7807_v37 = vadd.f32 %v2372_v29, %v1895_v23  ;;  %v1900_v61 = vadd.f32 %v5635_v53, %v7714_v59 }
 0x18f   : > { %v1855_v12 = vpop.f32.mrf.mxu1  ;;  %v2385_v22 = vpop.f32.mrf.mxu0 }
 0x190   : > { %8224 = vst [vmem:[#allocation14_spill] sm:$0xff] %v7807_v37  ;;  %v7810_v35 = vadd.f32 %v5683_v2, %v1900_v61  ;;  %v1898_v1 = vadd.f32 %v1855_v12, %v7717_v32 }
 0x191   : > { %v5636_v25 = vpop.f32.mrf.mxu1  ;;  %v5684_v27 = vpop.f32.mrf.mxu0 }
 0x192   : > { %8225 = vst [vmem:[#allocation15_spill] sm:$0xff] %v7810_v35  ;;  %v7813_v10 = vadd.f32 %v2385_v22, %v1898_v1  ;;  %v1901_v26 = vadd.f32 %v5636_v25, %v7720_v18 }
 0x193   : > { %v1858_v17 = vpop.f32.mrf.mxu1  ;;  %v2388_v31 = vpop.f32.mrf.mxu0 }
 0x194   : > { %8226 = vst [vmem:[#allocation16_spill] sm:$0xff] %v7813_v10  ;;  %v7816_v50 = vadd.f32 %v5684_v27, %v1901_v26  ;;  %v1899_v45 = vadd.f32 %v1858_v17, %v7723_v41 }
 0x195   : > { %v5703_v4 = vpop.f32.mrf.mxu1  ;;  %v7819_v59 = vpop.f32.mrf.mxu0 }
 0x196   : > { %8227 = vst [vmem:[#allocation17_spill] sm:$0xff] %v7816_v50  ;;  %v7821_v39 = vadd.f32 %v2388_v31, %v1899_v45 }
 0x197   : > { %v2771_v0 = vpop.f32.mrf.mxu1  ;;  %v7823_v9 = vpop.f32.mrf.mxu0 }
 0x198   : > { %8228 = vst [vmem:[#allocation18_spill] sm:$0xff] %v7821_v39 }
 0x199   : > { %v7825_v32 = vpop.f32.mrf.mxu1  ;;  %v7827_v62 = vpop.f32.mrf.mxu0 }
 0x19b   : > { %v7829_v16 = vpop.f32.mrf.mxu1  ;;  %v7831_v18 = vpop.f32.mrf.mxu0 }
 0x19d   : > { %v7833_v47 = vpop.f32.mrf.mxu1  ;;  %v7835_v13 = vpop.f32.mrf.mxu0 }
 0x19f   : > { %v7837_v41 = vpop.f32.mrf.mxu1  ;;  %v7839_v28 = vpop.f32.mrf.mxu0 }
 0x1a1   : > { %v7841_v24 = vpop.f32.mrf.mxu1  ;;  %v7843_v42 = vpop.f32.mrf.mxu0 }
 0x1a3   : > { %v7845_v40 = vpop.f32.mrf.mxu1  ;;  %v7847_v21 = vpop.f32.mrf.mxu0 }
 0x1a5   : > { %v7849_v48 = vpop.f32.mrf.mxu1  ;;  %v7851_v36 = vpop.f32.mrf.mxu0 }
 0x1a7   : > { %v7853_v29 = vpop.f32.mrf.mxu1  ;;  %v7855_v23 = vpop.f32.mrf.mxu0 }
 0x1a9   : > { %v7857_v53 = vpop.f32.mrf.mxu1  ;;  %v7859_v2 = vpop.f32.mrf.mxu0 }
 0x1ab   : > { %v7861_v61 = vpop.f32.mrf.mxu1  ;;  %v7863_v12 = vpop.f32.mrf.mxu0 }
 0x1ad   : > { %v7865_v22 = vpop.f32.mrf.mxu1  ;;  %v7867_v1 = vpop.f32.mrf.mxu0 }
 0x1af   : > { %v7869_v25 = vpop.f32.mrf.mxu1  ;;  %v7871_v27 = vpop.f32.mrf.mxu0 }
 0x1b1   : > { %v7873_v26 = vpop.f32.mrf.mxu1  ;;  %v7875_v17 = vpop.f32.mrf.mxu0 }
 0x1b3   : > { %v7877_v31 = vpop.f32.mrf.mxu1  ;;  %v7879_v45 = vpop.f32.mrf.mxu0 }
 0x1b5   : > { %v7881_v39 = vpop.f32.mrf.mxu1  ;;  %v7883_v50 = vpop.f32.mrf.mxu0 }
 0x1b7   : > { %v7885_v10 = vpop.f32.mrf.mxu1  ;;  %v7887_v35 = vpop.f32.mrf.mxu0 }
 0x1b8   : > { %8229 = vst [vmem:[#allocation19_spill] sm:$0xff] %v7887_v35 }
 0x1b9   : > { %v7889_v37 = vpop.f32.mrf.mxu1  ;;  %v7891_v51 = vpop.f32.mrf.mxu0 }
 0x1ba   : > { %8230 = vst [vmem:[#allocation20_spill] sm:$0xff] %v7889_v37  ;;  %8231 = vst [vmem:[#allocation21_spill] sm:$0xff] %v7891_v51 }
 0x1bb   : > { %v7893_v63 = vpop.f32.mrf.mxu1  ;;  %v7895_v52 = vpop.f32.mrf.mxu0 }
 0x1bc   : > { %8232 = vst [vmem:[#allocation22_spill] sm:$0xff] %v7893_v63  ;;  %8233 = vst [vmem:[#allocation23_spill] sm:$0xff] %v7895_v52 }
 0x1bd   : > { %v7897_v38 = vpop.f32.mrf.mxu1  ;;  %v7899_v3 = vpop.f32.mrf.mxu0 }
 0x1be   : > { %8234 = vst [vmem:[#allocation24_spill] sm:$0xff] %v7897_v38  ;;  %8235 = vst [vmem:[#allocation25_spill] sm:$0xff] %v7899_v3 }
 0x1bf   : > { %v7901_v56 = vpop.f32.mrf.mxu1  ;;  %v7903_v44 = vpop.f32.mrf.mxu0 }
 0x1c0   : > { %8236 = vst [vmem:[#allocation26_spill] sm:$0xff] %v7901_v56  ;;  %8237 = vst [vmem:[#allocation27_spill] sm:$0xff] %v7903_v44 }
 0x1c1   : > { %v7905_v58 = vpop.f32.mrf.mxu1  ;;  %v7907_v46 = vpop.f32.mrf.mxu0 }
 0x1c2   : > { %8238 = vst [vmem:[#allocation28_spill] sm:$0xff] %v7907_v46 }
 0x1c3   : > { %v7909_v35 = vpop.f32.mrf.mxu1  ;;  %v7911_v37 = vpop.f32.mrf.mxu0 }
 0x1c4   : > { %8239 = vst [vmem:[#allocation29_spill] sm:$0xff] %v7909_v35  ;;  %8240 = vst [vmem:[#allocation30_spill] sm:$0xff] %v7911_v37 }
 0x1c5   : > { %v7913_v51 = vpop.f32.mrf.mxu1  ;;  %v7915_v63 = vpop.f32.mrf.mxu0 }
 0x1c6   : > { %8241 = vst [vmem:[#allocation31_spill] sm:$0xff] %v7913_v51  ;;  %8242 = vst [vmem:[#allocation32_spill] sm:$0xff] %v7915_v63 }
 0x1c7   : > { %v7917_v52 = vpop.f32.mrf.mxu1  ;;  %v7919_v38 = vpop.f32.mrf.mxu0 }
 0x1c8   : > { %8243 = vst [vmem:[#allocation33_spill] sm:$0xff] %v7917_v52  ;;  %8244 = vst [vmem:[#allocation34_spill] sm:$0xff] %v7919_v38  ;;  %v2900_v52 = vadd.f32 %v5703_v4, %v7726_v19  ;;  %v2899_v4 = vadd.f32 %v7829_v16, %v7735_v60  ;;  %v2902_v60 = vadd.f32 %v7837_v41, %v7741_v20 }
 0x1c9   : > { %v7921_v3 = vpop.f32.mrf.mxu1  ;;  %v7923_v56 = vpop.f32.mrf.mxu0 }
 0x1ca   : > { %8245 = vst [vmem:[#allocation35_spill] sm:$0xff] %v7921_v3  ;;  %8246 = vst [vmem:[#allocation36_spill] sm:$0xff] %v7923_v56  ;;  %v2898_v56 = vadd.f32 %v2771_v0, %v7729_v8  ;;  %v2904_v8 = vadd.f32 %v7833_v47, %v7738_v6  ;;  %v7959_v0 = vld [vmem:[%s8171_s2] ss:$0 sm:$0xff]  ;;  %v3289_v6 = vadd.f32 %v7831_v18, %v2899_v4 }
 0x1cb   : > { %v7925_v44 = vpop.f32.mrf.mxu1  ;;  %v7927_v46 = vpop.f32.mrf.mxu0  ;;  %v3292_v41 = vadd.f32 %v7839_v28, %v2902_v60  ;;  %v2903_v18 = vadd.f32 %v7845_v40, %v7747_v57  ;;  %v2908_v28 = vadd.f32 %v7849_v48, %v7750_v5 }
 0x1cc   : > { %8247 = vst [vmem:[#allocation37_spill] sm:$0xff] %v7925_v44  ;;  %8248 = vst [vmem:[#allocation38_spill] sm:$0xff] %v7927_v46  ;;  %v3288_v19 = vadd.f32 %v7823_v9, %v2898_v56 }
 0x1cd   : > { %v7929_v35 = vpop.f32.mrf.mxu1  ;;  %v7931_v37 = vpop.f32.mrf.mxu0 }
 0x1ce   : > { %8249 = vst [vmem:[#allocation39_spill] sm:$0xff] %v7929_v35  ;;  %8250 = vst [vmem:[#allocation40_spill] sm:$0xff] %v7931_v37  ;;  %v3290_v35 = vadd.f32 %v7819_v59, %v2900_v52  ;;  %v2901_v37 = vadd.f32 %v7825_v32, %v7732_v14 }
 0x1cf   : > { %v7933_v51 = vpop.f32.mrf.mxu1  ;;  %v7935_v63 = vpop.f32.mrf.mxu0 }
 0x1d0   : > { %8251 = vst [vmem:[#allocation41_spill] sm:$0xff] %v7933_v51  ;;  %8252 = vst [vmem:[#allocation42_spill] sm:$0xff] %v7935_v63  ;;  %v3291_v14 = vadd.f32 %v7827_v62, %v2901_v37  ;;  %v2905_v37 = vadd.f32 %v7841_v24, %v7744_v34 }
 0x1d1   : > { %v7938_v38 = vpop.f32.mrf.mxu1  ;;  %v7940_v3 = vpop.f32.mrf.mxu0 }
 0x1d2   : > { %8253 = vst [vmem:[#allocation43_spill] sm:$0xff] %v7940_v3 }
 0x1d3   : > { %v7943_v44 = vpop.f32.mrf.mxu1  ;;  %v7945_v46 = vpop.f32.mrf.mxu0 }
 0x1d4   : > { %8254 = vst [vmem:[#allocation44_spill] sm:$0xff] %v7943_v44  ;;  %8255 = vst [vmem:[#allocation45_spill] sm:$0xff] %v7945_v46  ;;  %v3294_v46 = vadd.f32 %v7835_v13, %v2904_v8 }
 0x1d5   : > { %v5799_v51 = vpop.f32.mrf.mxu1  ;;  %v5847_v63 = vpop.f32.mrf.mxu0 }
 0x1d6   : > { %v3820_v3 = vadd.f32 %v5799_v51, %v3290_v35 }
 0x1d7   : > { %v3691_v52 = vpop.f32.mrf.mxu1  ;;  %v4189_v59 = vpop.f32.mrf.mxu0 }
 0x1d8   : > { %v4318_v32 = vadd.f32 %v5847_v63, %v3820_v3  ;;  %v3818_v56 = vadd.f32 %v3691_v52, %v3288_v19 }
 0x1d9   : > { %v5800_v51 = vpop.f32.mrf.mxu1  ;;  %v5848_v35 = vpop.f32.mrf.mxu0 }
 0x1da   : > { %v4357_v9 = vadd.f32 %v7959_v0, %v4318_v32  ;;  %v4316_v16 = vadd.f32 %v4189_v59, %v3818_v56  ;;  %v3821_v47 = vadd.f32 %v5800_v51, %v3291_v14  ;;  %v3295_v59 = vadd.f32 %v7843_v42, %v2905_v37 }
 0x1db   : > { %v3694_v62 = vpop.f32.mrf.mxu1  ;;  %v4192_v44 = vpop.f32.mrf.mxu0  ;;  %v3293_v51 = vadd.f32 %v7847_v21, %v2903_v18 }
 0x1dc   : > { %v4389_v3 = vmax.f32 %v4357_v9, 0.0  ;;  %v4355_v63 = vadd.f32 %v7959_v0, %v4316_v16  ;;  %v4319_v19 = vadd.f32 %v5848_v35, %v3821_v47  ;;  %v3819_v20 = vadd.f32 %v3694_v62, %v3289_v6 }
 0x1dd   : > { %v5803_v4 = vpop.f32.mrf.mxu1  ;;  %v5851_v52 = vpop.f32.mrf.mxu0  ;;  %v3298_v9 = vadd.f32 %v7851_v36, %v2908_v28  ;;  %v2909_v16 = vadd.f32 %v7857_v53, %v7756_v7 }
 0x1de   : > { %4421 = vst [vmem:[%s7975_s6 + $0x10] sm:$0xff] %v4389_v3  ;;  %v4387_v34 = vmax.f32 %v4355_v63, 0.0  ;;  %v4358_v13 = vadd.f32 %v7959_v0, %v4319_v19  ;;  %v4317_v24 = vadd.f32 %v4192_v44, %v3819_v20  ;;  %v3824_v8 = vadd.f32 %v5803_v4, %v3294_v46 }
 0x1df   : > { %v3707_v14 = vpop.f32.mrf.mxu1  ;;  %v4205_v57 = vpop.f32.mrf.mxu0  ;;  %v2906_v44 = vadd.f32 %v7853_v29, %v7753_v33  ;;  %v2907_v63 = vadd.f32 %v7861_v61, %v7759_v11  ;;  %v3299_v18 = vadd.f32 %v7859_v2, %v2909_v16  ;;  %v2912_v4 = vadd.f32 %v7865_v22, %v7762_v15 }
 0x1e0   : > { %4419 = vst [vmem:[%s7975_s6] sm:$0xff] %v4387_v34  ;;  %v4390_v40 = vmax.f32 %v4358_v13, 0.0  ;;  %v4356_v32 = vadd.f32 %v7959_v0, %v4317_v24  ;;  %v4322_v56 = vadd.f32 %v5851_v52, %v3824_v8  ;;  %v3822_v60 = vadd.f32 %v3707_v14, %v3292_v41 }
 0x1e1   : > { %v5804_v46 = vpop.f32.mrf.mxu1  ;;  %v5852_v35 = vpop.f32.mrf.mxu0  ;;  %v3296_v3 = vadd.f32 %v7855_v23, %v2906_v44  ;;  %v3297_v24 = vadd.f32 %v7863_v12, %v2907_v63  ;;  %v2910_v8 = vadd.f32 %v7869_v25, %v7765_v54  ;;  %v2911_v44 = vadd.f32 %v7877_v31, %v7771_v43  ;;  %v8257_v63 = vld [vmem:[#allocation20_spill] sm:$0xff] }
 0x1e2   : > { %4422 = vst [vmem:[%s7975_s6 + $0x18] sm:$0xff] %v4390_v40  ;;  %v4388_v42 = vmax.f32 %v4356_v32, 0.0  ;;  %v4361_v5 = vadd.f32 %v7959_v0, %v4322_v56  ;;  %v4320_v48 = vadd.f32 %v4205_v57, %v3822_v60  ;;  %v3825_v6 = vadd.f32 %v5804_v46, %v3295_v59 }
 0x1e3   : > { %v3710_v47 = vpop.f32.mrf.mxu1  ;;  %v4208_v37 = vpop.f32.mrf.mxu0  ;;  %v3302_v57 = vadd.f32 %v7867_v1, %v2912_v4  ;;  %v2913_v40 = vadd.f32 %v7873_v26, %v7768_v49  ;;  %v8260_v4 = vld [vmem:[#allocation22_spill] sm:$0xff] }
 0x1e4   : > { %4420 = vst [vmem:[%s7975_s6 + $0x8] sm:$0xff] %v4388_v42  ;;  %v4393_v21 = vmax.f32 %v4361_v5, 0.0  ;;  %v4359_v33 = vadd.f32 %v7959_v0, %v4320_v48  ;;  %v4323_v29 = vadd.f32 %v5852_v35, %v3825_v6  ;;  %v3823_v62 = vadd.f32 %v3710_v47, %v3293_v51 }
 0x1e5   : > { %v5807_v19 = vpop.f32.mrf.mxu1  ;;  %v5855_v20 = vpop.f32.mrf.mxu0  ;;  %v3300_v51 = vadd.f32 %v7871_v27, %v2910_v8  ;;  %v3303_v5 = vadd.f32 %v7875_v17, %v2913_v40  ;;  %v2916_v48 = vadd.f32 %v7881_v39, %v7774_v30  ;;  %v3301_v47 = vadd.f32 %v7879_v45, %v2911_v44 }
 0x1e6   : > { %4425 = vst [vmem:[%s7975_s6 + $0x30] sm:$0xff] %v4393_v21  ;;  %v4391_v36 = vmax.f32 %v4359_v33, 0.0  ;;  %v4362_v7 = vadd.f32 %v7959_v0, %v4323_v29  ;;  %v4321_v53 = vadd.f32 %v4208_v37, %v3823_v62  ;;  %v3828_v41 = vadd.f32 %v5807_v19, %v3298_v9 }
 0x1e7   : > { %v3723_v52 = vpop.f32.mrf.mxu1  ;;  %v4221_v34 = vpop.f32.mrf.mxu0  ;;  %v2914_v37 = vadd.f32 %v7885_v10, %v7777_v55  ;;  %v3306_v62 = vadd.f32 %v7883_v50, %v2916_v48 }
 0x1e8   : > { %4423 = vst [vmem:[%s7975_s6 + $0x20] sm:$0xff] %v4391_v36  ;;  %v4394_v23 = vmax.f32 %v4362_v7, 0.0  ;;  %v4360_v11 = vadd.f32 %v7959_v0, %v4321_v53  ;;  %v4326_v61 = vadd.f32 %v5855_v20, %v3828_v41  ;;  %v3826_v13 = vadd.f32 %v3723_v52, %v3296_v3  ;;  %v8256_v3 = vld [vmem:[#allocation5_spill] sm:$0xff]  ;;  %v8258_v53 = vld [vmem:[#allocation19_spill] sm:$0xff] }
 0x1e9   : > { %v5808_v59 = vpop.f32.mrf.mxu1  ;;  %v5856_v28 = vpop.f32.mrf.mxu0  ;;  %v2917_v19 = vadd.f32 %v8257_v63, %v8256_v3  ;;  %v3304_v41 = vadd.f32 %v8258_v53, %v2914_v37  ;;  %v8272_v63 = vld [vmem:[#allocation28_spill] sm:$0xff] }
 0x1ea   : > { %4426 = vst [vmem:[%s7975_s6 + $0x38] sm:$0xff] %v4394_v23  ;;  %v4392_v2 = vmax.f32 %v4360_v11, 0.0  ;;  %v4365_v15 = vadd.f32 %v7959_v0, %v4326_v61  ;;  %v4324_v22 = vadd.f32 %v4221_v34, %v3826_v13  ;;  %v3829_v14 = vadd.f32 %v5808_v59, %v3299_v18  ;;  %v8259_v18 = vld [vmem:[#allocation6_spill] sm:$0xff]  ;;  %v8262_v59 = vld [vmem:[#allocation7_spill] sm:$0xff] }
 0x1eb   : > { %v3726_v32 = vpop.f32.mrf.mxu1  ;;  %v4224_v56 = vpop.f32.mrf.mxu0  ;;  %v2915_v52 = vadd.f32 %v8260_v4, %v8259_v18  ;;  %v8275_v4 = vld [vmem:[#allocation30_spill] sm:$0xff] }
 0x1ec   : > { %4424 = vst [vmem:[%s7975_s6 + $0x28] sm:$0xff] %v4392_v2  ;;  %v4397_v12 = vmax.f32 %v4365_v15, 0.0  ;;  %v4363_v54 = vadd.f32 %v7959_v0, %v4324_v22  ;;  %v4327_v25 = vadd.f32 %v5856_v28, %v3829_v14  ;;  %v3827_v60 = vadd.f32 %v3726_v32, %v3297_v24  ;;  %v8261_v24 = vld [vmem:[#allocation21_spill] sm:$0xff]  ;;  %v8263_v28 = vld [vmem:[#allocation24_spill] sm:$0xff] }
 0x1ed   : > { %v5811_v46 = vpop.f32.mrf.mxu1  ;;  %v5859_v35 = vpop.f32.mrf.mxu0  ;;  %v3307_v8 = vadd.f32 %v8261_v24, %v2917_v19  ;;  %v2920_v2 = vadd.f32 %v8263_v28, %v8262_v59  ;;  %v8278_v28 = vld [vmem:[#allocation32_spill] sm:$0xff] }
 0x1ee   : > { %4429 = vst [vmem:[%s7975_s6 + $0x50] sm:$0xff] %v4397_v12  ;;  %v4395_v1 = vmax.f32 %v4363_v54, 0.0  ;;  %v4366_v49 = vadd.f32 %v7959_v0, %v4327_v25  ;;  %v4325_v26 = vadd.f32 %v4224_v56, %v3827_v60  ;;  %v3832_v42 = vadd.f32 %v5811_v46, %v3302_v57  ;;  %v8264_v56 = vld [vmem:[#allocation23_spill] sm:$0xff]  ;;  %v8265_v54 = vld [vmem:[#allocation8_spill] sm:$0xff]  ;;  %v8266_v25 = vld [vmem:[#allocation26_spill] sm:$0xff] }
 0x1ef   : > { %v3739_v6 = vpop.f32.mrf.mxu1  ;;  %v4237_v9 = vpop.f32.mrf.mxu0  ;;  %v3305_v12 = vadd.f32 %v8264_v56, %v2915_v52  ;;  %v2918_v60 = vadd.f32 %v8266_v25, %v8265_v54  ;;  %v8281_v25 = vld [vmem:[#allocation34_spill] sm:$0xff] }
 0x1f0   : > { %4427 = vst [vmem:[%s7975_s6 + $0x40] sm:$0xff] %v4395_v1  ;;  %v4398_v27 = vmax.f32 %v4366_v49, 0.0  ;;  %v4364_v43 = vadd.f32 %v7959_v0, %v4325_v26  ;;  %v4330_v31 = vadd.f32 %v5859_v35, %v3832_v42  ;;  %v3830_v16 = vadd.f32 %v3739_v6, %v3300_v51  ;;  %v8267_v26 = vld [vmem:[#allocation25_spill] sm:$0xff] }
 0x1f1   : > { %v5812_v21 = vpop.f32.mrf.mxu1  ;;  %v5860_v33 = vpop.f32.mrf.mxu0  ;;  %v3310_v42 = vadd.f32 %v8267_v26, %v2920_v2 }
 0x1f2   : > { %4430 = vst [vmem:[%s7975_s6 + $0x58] sm:$0xff] %v4398_v27  ;;  %v4396_v17 = vmax.f32 %v4364_v43, 0.0  ;;  %v4369_v30 = vadd.f32 %v7959_v0, %v4330_v31  ;;  %v4328_v39 = vadd.f32 %v4237_v9, %v3830_v16  ;;  %v3833_v29 = vadd.f32 %v5812_v21, %v3303_v5  ;;  %v8268_v5 = vld [vmem:[#allocation9_spill] sm:$0xff]  ;;  %v8270_v21 = vld [vmem:[#allocation10_spill] sm:$0xff] }
 0x1f3   : > { %v3742_v20 = vpop.f32.mrf.mxu1  ;;  %v4240_v36 = vpop.f32.mrf.mxu0  ;;  %v2921_v48 = vadd.f32 %v7905_v58, %v8268_v5 }
 0x1f4   : > { %4428 = vst [vmem:[%s7975_s6 + $0x48] sm:$0xff] %v4396_v17  ;;  %v4401_v45 = vmax.f32 %v4369_v30, 0.0  ;;  %v4367_v55 = vadd.f32 %v7959_v0, %v4328_v39  ;;  %v4331_v10 = vadd.f32 %v5860_v33, %v3833_v29  ;;  %v3831_v7 = vadd.f32 %v3742_v20, %v3301_v47  ;;  %v8269_v47 = vld [vmem:[#allocation27_spill] sm:$0xff]  ;;  %v8271_v33 = vld [vmem:[#allocation29_spill] sm:$0xff] }
 0x1f5   : > { %v5815_v34 = vpop.f32.mrf.mxu1  ;;  %v5863_v23 = vpop.f32.mrf.mxu0  ;;  %v3308_v37 = vadd.f32 %v8269_v47, %v2918_v60  ;;  %v2919_v17 = vadd.f32 %v8271_v33, %v8270_v21  ;;  %v3311_v19 = vadd.f32 %v8272_v63, %v2921_v48  ;;  %v8273_v20 = vld [vmem:[#allocation11_spill] sm:$0xff]  ;;  %v8284_v48 = vld [vmem:[#allocation36_spill] sm:$0xff] }
 0x1f6   : > { %4433 = vst [vmem:[%s7975_s6 + $0x70] sm:$0xff] %v4401_v45  ;;  %v4399_v50 = vmax.f32 %v4367_v55, 0.0  ;;  %v4370_v11 = vadd.f32 %v7959_v0, %v4331_v10  ;;  %v4329_v61 = vadd.f32 %v4240_v36, %v3831_v7  ;;  %v3836_v13 = vadd.f32 %v5815_v34, %v3306_v62  ;;  %v8274_v36 = vld [vmem:[#allocation31_spill] sm:$0xff]  ;;  %v8276_v34 = vld [vmem:[#allocation12_spill] sm:$0xff] }
 0x1f7   : > { %v3755_v15 = vpop.f32.mrf.mxu1  ;;  %v4253_v22 = vpop.f32.mrf.mxu0  ;;  %v2924_v45 = vadd.f32 %v8274_v36, %v8273_v20  ;;  %v3309_v52 = vadd.f32 %v8275_v4, %v2919_v17  ;;  %v8287_v17 = vld [vmem:[#allocation38_spill] sm:$0xff] }
 0x1f8   : > { %4431 = vst [vmem:[%s7975_s6 + $0x60] sm:$0xff] %v4399_v50  ;;  %v4402_v14 = vmax.f32 %v4370_v11, 0.0  ;;  %v4368_v57 = vadd.f32 %v7959_v0, %v4329_v61  ;;  %v4334_v40 = vadd.f32 %v5863_v23, %v3836_v13  ;;  %v3834_v32 = vadd.f32 %v3755_v15, %v3304_v41  ;;  %v8277_v23 = vld [vmem:[#allocation33_spill] sm:$0xff] }
 0x1f9   : > { %v5816_v51 = vpop.f32.mrf.mxu1  ;;  %v5864_v44 = vpop.f32.mrf.mxu0  ;;  %v2922_v50 = vadd.f32 %v8277_v23, %v8276_v34  ;;  %v3314_v2 = vadd.f32 %v8278_v28, %v2924_v45  ;;  %v8279_v15 = vld [vmem:[#allocation13_spill] sm:$0xff]  ;;  %v8290_v45 = vld [vmem:[#allocation40_spill] sm:$0xff]  ;;  %v8292_v23 = vld [vmem:[#allocation42_spill] sm:$0xff] }
 0x1fa   : > { %4434 = vst [vmem:[%s7975_s6 + $0x78] sm:$0xff] %v4402_v14  ;;  %v4400_v46 = vmax.f32 %v4368_v57, 0.0  ;;  %v4373_v35 = vadd.f32 %v7959_v0, %v4334_v40  ;;  %v4332_v1 = vadd.f32 %v4253_v22, %v3834_v32  ;;  %v3837_v49 = vadd.f32 %v5816_v51, %v3307_v8  ;;  %v8280_v22 = vld [vmem:[#allocation35_spill] sm:$0xff]  ;;  %v8282_v51 = vld [vmem:[#allocation14_spill] sm:$0xff] }
 0x1fb   : > { %v3758_v6 = vpop.f32.mrf.mxu1  ;;  %v4256_v9 = vpop.f32.mrf.mxu0  ;;  %v2925_v14 = vadd.f32 %v8280_v22, %v8279_v15  ;;  %v3312_v60 = vadd.f32 %v8281_v25, %v2922_v50  ;;  %v8295_v15 = vld [vmem:[#allocation43_spill] sm:$0xff] }
 0x1fc   : > { %4432 = vst [vmem:[%s7975_s6 + $0x68] sm:$0xff] %v4400_v46  ;;  %v4405_v27 = vmax.f32 %v4373_v35, 0.0  ;;  %v4371_v43 = vadd.f32 %v7959_v0, %v4332_v1  ;;  %v4335_v31 = vadd.f32 %v5864_v44, %v3837_v49  ;;  %v3835_v16 = vadd.f32 %v3758_v6, %v3305_v12  ;;  %v8283_v44 = vld [vmem:[#allocation37_spill] sm:$0xff] }
 0x1fd   : > { %v5819_v30 = vpop.f32.mrf.mxu1  ;;  %v5867_v39 = vpop.f32.mrf.mxu0  ;;  %v2923_v46 = vadd.f32 %v8283_v44, %v8282_v51  ;;  %v3315_v6 = vadd.f32 %v8284_v48, %v2925_v14 }
 0x1fe   : > { %4437 = vst [vmem:[%s7975_s6 + $0x90] sm:$0xff] %v4405_v27  ;;  %v4403_v29 = vmax.f32 %v4371_v43, 0.0  ;;  %v4374_v58 = vadd.f32 %v7959_v0, %v4335_v31  ;;  %v4333_v62 = vadd.f32 %v4256_v9, %v3835_v16  ;;  %v3840_v3 = vadd.f32 %v5819_v30, %v3310_v42  ;;  %v8285_v9 = vld [vmem:[#allocation15_spill] sm:$0xff] }
 0x1ff   : > { %v3771_v55 = vpop.f32.mrf.mxu1  ;;  %v4269_v10 = vpop.f32.mrf.mxu0  ;;  %v8286_v27 = vld [vmem:[#allocation39_spill] sm:$0xff]  ;;  %v3313_v30 = vadd.f32 %v8287_v17, %v2923_v46 }
 0x200   : > { %4435 = vst [vmem:[%s7975_s6 + $0x80] sm:$0xff] %v4403_v29  ;;  %v4406_v7 = vmax.f32 %v4374_v58, 0.0  ;;  %v4372_v53 = vadd.f32 %v7959_v0, %v4333_v62  ;;  %v4338_v41 = vadd.f32 %v5867_v39, %v3840_v3  ;;  %v3838_v18 = vadd.f32 %v3771_v55, %v3308_v37  ;;  %v8288_v39 = vld [vmem:[#allocation16_spill] sm:$0xff]  ;;  %v8289_v29 = vld [vmem:[#allocation41_spill] sm:$0xff] }
 0x201   : > { %v5820_v11 = vpop.f32.mrf.mxu1  ;;  %v5868_v61 = vpop.f32.mrf.mxu0  ;;  %v2928_v43 = vadd.f32 %v8286_v27, %v8285_v9  ;;  %v2926_v58 = vadd.f32 %v8289_v29, %v8288_v39 }
 0x202   : > { %4438 = vst [vmem:[%s7975_s6 + $0x98] sm:$0xff] %v4406_v7  ;;  %v4404_v13 = vmax.f32 %v4372_v53, 0.0  ;;  %v4377_v24 = vadd.f32 %v7959_v0, %v4338_v41  ;;  %v4336_v8 = vadd.f32 %v4269_v10, %v3838_v18  ;;  %v3841_v59 = vadd.f32 %v5820_v11, %v3311_v19  ;;  %v8291_v10 = vld [vmem:[#allocation17_spill] sm:$0xff]  ;;  %v8293_v11 = vld [vmem:[#allocation18_spill] sm:$0xff] }
 0x203   : > { %v3774_v57 = vpop.f32.mrf.mxu1  ;;  %v4272_v40 = vpop.f32.mrf.mxu0  ;;  %v3318_v55 = vadd.f32 %v8290_v45, %v2928_v43  ;;  %v2929_v7 = vadd.f32 %v7938_v38, %v8291_v10  ;;  %v3316_v50 = vadd.f32 %v8292_v23, %v2926_v58 }
 0x204   : > { %4436 = vst [vmem:[%s7975_s6 + $0x88] sm:$0xff] %v4404_v13  ;;  %v4409_v32 = vmax.f32 %v4377_v24, 0.0  ;;  %v4375_v56 = vadd.f32 %v7959_v0, %v4336_v8  ;;  %v4339_v12 = vadd.f32 %v5868_v61, %v3841_v59  ;;  %v3839_v54 = vadd.f32 %v3774_v57, %v3309_v52  ;;  %v8294_v61 = vld [vmem:[#allocation44_spill] sm:$0xff] }
 0x205   : > { %v5823_v35 = vpop.f32.mrf.mxu1  ;;  %v5871_v1 = vpop.f32.mrf.mxu0  ;;  %v2927_v13 = vadd.f32 %v8294_v61, %v8293_v11  ;;  %v3319_v22 = vadd.f32 %v8295_v15, %v2929_v7 }
 0x206   : > { %4441 = vst [vmem:[%s7975_s6 + $0xb0] sm:$0xff] %v4409_v32  ;;  %v4407_v49 = vmax.f32 %v4375_v56, 0.0  ;;  %v4378_v26 = vadd.f32 %v7959_v0, %v4339_v12  ;;  %v4337_v42 = vadd.f32 %v4272_v40, %v3839_v54  ;;  %v3844_v5 = vadd.f32 %v5823_v35, %v3314_v2  ;;  %v8296_v54 = vld [vmem:[#allocation45_spill] sm:$0xff] }
 0x207   : > { %v3787_v31 = vpop.f32.mrf.mxu1  ;;  %v4285_v16 = vpop.f32.mrf.mxu0  ;;  %v3317_v25 = vadd.f32 %v8296_v54, %v2927_v13 }
 0x208   : > { %4439 = vst [vmem:[%s7975_s6 + $0xa0] sm:$0xff] %v4407_v49  ;;  %v4410_v47 = vmax.f32 %v4378_v26, 0.0  ;;  %v4376_v37 = vadd.f32 %v7959_v0, %v4337_v42  ;;  %v4342_v21 = vadd.f32 %v5871_v1, %v3844_v5  ;;  %v3842_v33 = vadd.f32 %v3787_v31, %v3312_v60 }
 0x209   : > { %v5824_v62 = vpop.f32.mrf.mxu1  ;;  %v5872_v3 = vpop.f32.mrf.mxu0 }
 0x20a   : > { %4442 = vst [vmem:[%s7975_s6 + $0xb8] sm:$0xff] %v4410_v47  ;;  %v4408_v63 = vmax.f32 %v4376_v37, 0.0  ;;  %v4381_v19 = vadd.f32 %v7959_v0, %v4342_v21  ;;  %v4340_v20 = vadd.f32 %v4285_v16, %v3842_v33  ;;  %v3845_v36 = vadd.f32 %v5824_v62, %v3315_v6 }
 0x20b   : > { %v3790_v53 = vpop.f32.mrf.mxu1  ;;  %v4288_v41 = vpop.f32.mrf.mxu0 }
 0x20c   : > { %4440 = vst [vmem:[%s7975_s6 + $0xa8] sm:$0xff] %v4408_v63  ;;  %v4413_v18 = vmax.f32 %v4381_v19, 0.0  ;;  %v4379_v4 = vadd.f32 %v7959_v0, %v4340_v20  ;;  %v4343_v52 = vadd.f32 %v5872_v3, %v3845_v36  ;;  %v3843_v34 = vadd.f32 %v3790_v53, %v3313_v30 }
 0x20d   : > { %v5827_v24 = vpop.f32.mrf.mxu1  ;;  %v5875_v8 = vpop.f32.mrf.mxu0 }
 0x20e   : > { %4445 = vst [vmem:[%s7975_s6 + $0xd0] sm:$0xff] %v4413_v18  ;;  %v4411_v59 = vmax.f32 %v4379_v4, 0.0  ;;  %v4382_v38 = vadd.f32 %v7959_v0, %v4343_v52  ;;  %v4341_v28 = vadd.f32 %v4288_v41, %v3843_v34  ;;  %v3848_v2 = vadd.f32 %v5827_v24, %v3318_v55 }
 0x20f   : > { %v3803_v14 = vpop.f32.mrf.mxu1  ;;  %v4301_v57 = vpop.f32.mrf.mxu0 }
 0x210   : > { %4443 = vst [vmem:[%s7975_s6 + $0xc0] sm:$0xff] %v4411_v59  ;;  %v4414_v40 = vmax.f32 %v4382_v38, 0.0  ;;  %v4380_v32 = vadd.f32 %v7959_v0, %v4341_v28  ;;  %v4346_v56 = vadd.f32 %v5875_v8, %v3848_v2  ;;  %v3846_v12 = vadd.f32 %v3803_v14, %v3316_v50 }
 0x211   : > { %v5828_v60 = vpop.f32.mrf.mxu1  ;;  %v5876_v51 = vpop.f32.mrf.mxu0 }
 0x212   : > { %4446 = vst [vmem:[%s7975_s6 + $0xd8] sm:$0xff] %v4414_v40  ;;  %v4412_v44 = vmax.f32 %v4380_v32, 0.0  ;;  %v4385_v46 = vadd.f32 %v7959_v0, %v4346_v56  ;;  %v4344_v35 = vadd.f32 %v4301_v57, %v3846_v12  ;;  %v3849_v1 = vadd.f32 %v5828_v60, %v3319_v22 }
 0x213   : > { %v3806_v49 = vpop.f32.mrf.mxu1  ;;  %v4304_v6 = vpop.f32.mrf.mxu0 }
 0x214   : > { %4444 = vst [vmem:[%s7975_s6 + $0xc8] sm:$0xff] %v4412_v44  ;;  %v4417_v26 = vmax.f32 %v4385_v46, 0.0  ;;  %v4383_v42 = vadd.f32 %v7959_v0, %v4344_v35  ;;  %v4347_v5 = vadd.f32 %v5876_v51, %v3849_v1  ;;  %v3847_v48 = vadd.f32 %v3806_v49, %v3317_v25 }
 0x216   : > { %4449 = vst [vmem:[%s7975_s6 + $0xf0] sm:$0xff] %v4417_v26  ;;  %v4415_v9 = vmax.f32 %v4383_v42, 0.0  ;;  %v4386_v27 = vadd.f32 %v7959_v0, %v4347_v5  ;;  %v4345_v43 = vadd.f32 %v4304_v6, %v3847_v48 }
 0x218   : > { %4447 = vst [vmem:[%s7975_s6 + $0xe0] sm:$0xff] %v4415_v9  ;;  %v4418_v31 = vmax.f32 %v4386_v27, 0.0  ;;  %v4384_v16 = vadd.f32 %v7959_v0, %v4345_v43 }
 0x21a   : > { %4450 = vst [vmem:[%s7975_s6 + $0xf8] sm:$0xff] %v4418_v31  ;;  %v4416_v47 = vmax.f32 %v4384_v16, 0.0 }
 0x21c   : > { %4448 = vst [vmem:[%s7975_s6 + $0xe8] sm:$0xff] %v4416_v47 }
 0x21d   : > { %6084 = shalt.err (!%p6081_p5)
}
 0x21e   : > { %s6085_s27 = scalar_lea.hbm %s8116_s18, 4096  ;;  %s6089_s9 = scalar_lea.hbm %s8172_s3, 8192 }
 0x21f   : > { %p6086_p6 = scmp.ne.s32.totalorder %s8116_s18, %s6085_s27  ;;  %p6090_p10 = scmp.lt.s32.totalorder %s8116_s18, %s8172_s3 }
 0x220   : > { %p6091_p11 = scmp.lt.s32.totalorder %s6089_s9, %s6085_s27 }
 0x221   : > { %p6087_p7 = pnand %p6086_p6, %p6212_p4 }
 0x222   : > { %p6092_p12 = por %p6091_p11, %p6090_p10 }
 0x223   : > { %p6088_p9 = pneg %p6087_p7 }
 0x225   : > { %p6093_p13 = pnand %p6092_p12, %p6088_p9 }
 0x227   : > { %6096 = shalt.err (!%p6093_p13)
}
 0x228   : > { %s6150_s5 = smov 128   ;;  %s6151_s6 = smov 8  }
 0x229   : > { %5894 = dma.vmem_to_hbm [thread:$0]  (%p6212_p4), %s8118_s8, 4096, %s8116_s18, %s8124_s15, %s6150_s5, %s6150_s5, %s6151_s6  }
 0x22a PF: > { %p5900_p0 = scmp.ge.s32.totalorder %s6147_s17, 2  ;;  %s4483_s7 = sand.u32 1, %s6127_s12  }
 0x22b   : > { %s4484_s10 = scalar_lea.sflag [#allocation3], %s4483_s7 }
 0x22c   : > { %p5897_p1 = pnand %p5900_p0, %p6219_p8 }
 0x22e   : > { %p5898_p2 = pneg %p5897_p1 }
 0x230   : > { %6122 = dma.done.wait (%p5898_p2), %s4484_s10, 4096  }
 0x231   : > { %6124 = vsyncadd (%p5898_p2), %s4484_s10, 4294963200  ;;  %s16_s17 = sadd.s32 1, %s6147_s17   ;;  %s8297_s12 = smov %s6131_s13 }
 0x232   : > { %p13_p3 = scmp.ge.s32.totalorder %s16_s17, 4   ;;  %s8298_s13 = smov %s6135_s14 }
 0x233   : > { %s8299_s14 = smov %s6225_s25  ;;  %s8300_s15 = smov %s6143_s16 }
 0x234   : > { %s8301_s16 = smov %s8303_s20  ;;  %15 = sbr.rel (!%p13_p3) target bundleno = 4 (0x4), region = 78 }
 0x239   :  { %4489 = vsyncpa [#allocation3], 1 }
 0x23a   :  { %4491 = vsyncpa [#allocation3 + $0x1], 1 }

</bundles_post_ra>
